<compile_context>
chip_gen: v6e
topology: v6e:2x2x1
jax: 0.10.0
libtpu: 0.0.40
codegen_flags: <defaults>
</compile_context>

<pallas_src>
import functools

import jax
import jax.numpy as jnp
from jax import lax
from jax.experimental import pallas as pl
from jax.experimental.pallas import tpu as pltpu


def _round_up(x, m):
    return ((x + m - 1) // m) * m


def _pick_chunk(HW):
    # Largest multiple of 128 that divides HW and is <= 512 (HW is a multiple of 128).
    for c in (512, 384, 256, 128):
        if c <= HW and HW % c == 0:
            return c
    return HW


def _padded_nbytes(shape, dtype):
    s = list(shape)
    if len(s) == 1:
        s = [1] + s
    s[-2] = _round_up(s[-2], 8)
    s[-1] = _round_up(s[-1], 128)
    n = 1
    for d in s:
        n *= int(d)
    return n * jnp.dtype(dtype).itemsize


# ----------------------------------------------------------------------------
# Pallas kernel: one grid step == one batch element, fully fused:
#   relu(bn(1x1)) -> bn(depthwise lks x lks, same-pad) -> relu(bn(1x1))
#   -> 1x1 conv (bias) -> GroupNorm
# ----------------------------------------------------------------------------
def lkp_kernel(lks, H, W, halo_l, chunk, cpg,
               x_ref,
               w1_ref, b1_ref,
               wdw_ref, mask_ref,
               w3_ref, b3_ref,
               w4_ref, b4_ref,
               gmat_ref, gng_ref, gnb_ref,
               out_ref,
               pad_ref, x2_ref):
    p = (lks - 1) // 2
    HW = H * W
    halo_r = p * W + p
    dim2p = pad_ref.shape[0]
    mm_dtype = w1_ref.dtype          # matmul-operand dtype (f32 or bf16); accum stays f32

    # ---- cv1: 1x1 conv (BN scale folded into weight) + ReLU --------------------
    x1 = jnp.dot(w1_ref[...], x_ref[0].astype(mm_dtype),
                 preferred_element_type=jnp.float32) + b1_ref[...]
    x1 = jnp.maximum(x1, 0.0)                                       # (dim2p, HW) f32

    # ---- cv2: depthwise lks x lks conv, flat zero-halo 'same' padding ----------
    # Only the halos are re-zeroed (interior fully overwritten each step; scratch
    # is per-TensorCore private, so no program_id gating needed).
    pad_ref[:, 0:halo_l] = jnp.zeros((dim2p, halo_l), jnp.float32)
    pad_ref[:, halo_l + HW:halo_l + HW + halo_r] = jnp.zeros((dim2p, halo_r), jnp.float32)
    pad_ref[:, halo_l:halo_l + HW] = x1

    # Per-tap (dim2p,1) weights hoisted once, outside the HW-strip loop.
    wtap = [wdw_ref[:, t:t + 1] for t in range(lks * lks)]

    # Strip-mine HW so the tap-accumulator chain stays in vregs; the padded scratch
    # ref is indexed per tap (static offsets -> aligned-ness visible to the compiler).
    n_chunks = HW // chunk
    for c in range(n_chunks):                          # static loop, compile-time offsets
        c0 = c * chunk
        acc = jnp.zeros((dim2p, chunk), jnp.float32)
        for dj in range(lks):                          # width taps: need the column mask
            part = jnp.zeros((dim2p, chunk), jnp.float32)
            for di in range(lks):                      # height taps: zero halo handles edges
                off = halo_l + (di - p) * W + (dj - p) + c0
                part = part + pad_ref[:, off:off + chunk] * wtap[di * lks + dj]
            acc = acc + part * mask_ref[dj:dj + 1, c0:c0 + chunk]
        x2_ref[:, c0:c0 + chunk] = acc                 # cv2 BN shift folded into b3

    # ---- cv3: 1x1 conv (BN folded; cv2's BN shift pre-folded into b3) + ReLU ---
    x3 = jnp.dot(w3_ref[...], x2_ref[...].astype(mm_dtype),
                 preferred_element_type=jnp.float32) + b3_ref[...]
    x3 = jnp.maximum(x3, 0.0)                                       # (dim2p, HW)

    # ---- cv4: 1x1 conv with bias -------------------------------------------------
    y = jnp.dot(w4_ref[...], x3.astype(mm_dtype),
                preferred_element_type=jnp.float32) + b4_ref[...]   # (C4p, HW) f32

    # ---- GroupNorm (two-pass, biased var, eps=1e-5) ------------------------------
    # HW lane-reduce FIRST (XLU), then a tiny (C4p,C4p)@(C4p,1) group matvec —
    # avoids the two full-size (C4,C4)@(C4,HW) MXU matmuls of the previous version.
    n = jnp.float32(cpg * HW)
    gmat = gmat_ref[...]
    row_sum = jnp.sum(y, axis=1, keepdims=True)                          # (C4p, 1)
    mean_c = jnp.dot(gmat, row_sum, preferred_element_type=jnp.float32) / n
    cen = y - mean_c
    sq_row = jnp.sum(cen * cen, axis=1, keepdims=True)                   # (C4p, 1)
    var_c = jnp.dot(gmat, sq_row, preferred_element_type=jnp.float32) / n
    inv_c = lax.rsqrt(var_c + 1e-5)
    out_ref[0] = cen * (inv_c * gng_ref[...]) + gnb_ref[...]             # lane-dense vst


# ----------------------------------------------------------------------------
# Wrapper: NCHW in, (B, dim//groups, sks**2, H, W) out.  Only free reshapes +
# a channel-pad slice.
# ----------------------------------------------------------------------------
def lkp_forward(x_nchw, kparams, *, dim, lks, sks, groups):
    B, C, H, W = x_nchw.shape
    assert C == dim, (C, dim)
    assert dim % 2 == 0, "dim must be even"
    assert dim % groups == 0, "dim must be divisible by groups"
    assert lks % 2 == 1, "lks must be odd"
    HW = H * W
    assert HW % 128 == 0, ("H*W must be a multiple of 128 for the lane-dense layout; "
                           "lane-pad the spatial extent in the caller otherwise")

    dim2 = dim // 2
    dim2p = _round_up(dim2, 8)
    C4 = sks * sks * dim // groups
    C4p = _round_up(C4, 8)
    cpg = sks * sks
    p = (lks - 1) // 2
    halo_l = _round_up(p * W + p, 128)     # lane-aligned left halo -> aligned interior
    halo_r = p * W + p                     # exact right halo (review item)
    chunk = _pick_chunk(HW)

    (w1f, b1, wdwf, w3f, b3, w4m, b4c, gng, gnb) = kparams
    assert w1f.shape == (dim2p, dim) and w4m.shape == (C4p, dim2p)

    # Hoisted, grid-invariant constants (built once here, not per grid step).
    col = jnp.arange(HW, dtype=jnp.int32) % W
    shift = col[None, :] + jnp.arange(lks, dtype=jnp.int32)[:, None] - p
    colmask = ((shift >= 0) & (shift < W)).astype(jnp.float32)          # (lks, HW)
    gidx = jnp.concatenate([jnp.arange(C4, dtype=jnp.int32) // cpg,
                            jnp.full((C4p - C4,), dim // groups, jnp.int32)])
    gmat = (gidx[:, None] == gidx[None, :]).astype(jnp.float32)         # (C4p, C4p)

    x_flat = x_nchw.reshape(B, dim, HW).astype(jnp.float32)             # NCHW -> (B,C,HW)

    def const_spec(shape):
        nd = len(shape)
        return pl.BlockSpec(shape, lambda b, _nd=nd: (0,) * _nd)

    in_specs = [
        pl.BlockSpec((1, dim, HW), lambda b: (b, 0, 0)),                 # x
        const_spec((dim2p, dim)), const_spec((dim2p, 1)),                # cv1 (BN folded)
        const_spec((dim2p, lks * lks)),                                  # cv2 weights (BN folded)
        const_spec((lks, HW)),                                           # column masks
        const_spec((dim2p, dim2p)), const_spec((dim2p, 1)),              # cv3 (+folded cv2 shift)
        const_spec((C4p, dim2p)), const_spec((C4p, 1)),                  # cv4
        const_spec((C4p, C4p)),                                          # GN membership
        const_spec((C4p, 1)), const_spec((C4p, 1)),                      # GN affine
    ]

    # Explicit VMEM budget (review item): in/out blocks + constants double-buffered,
    # plus the two scratch buffers, with headroom.
    consts = (w1f, b1, wdwf, colmask, w3f, b3, w4m, b4c, gmat, gng, gnb)
    vmem = (_padded_nbytes((1, dim, HW), x_flat.dtype)
            + _padded_nbytes((1, C4p, HW), jnp.float32)
            + sum(_padded_nbytes(a.shape, a.dtype) for a in consts))
    vmem = 2 * vmem \
        + _padded_nbytes((dim2p, halo_l + HW + halo_r), jnp.float32) \
        + _padded_nbytes((dim2p, HW), jnp.float32)
    vmem_limit = int(min(max(2 * vmem + (2 << 20), 32 << 20), 64 << 20))

    kernel = functools.partial(lkp_kernel, lks, H, W, halo_l, chunk, cpg)

    out = pl.pallas_call(
        kernel,
        out_shape=jax.ShapeDtypeStruct((B, C4p, HW), jnp.float32),
        grid_spec=pltpu.PrefetchScalarGridSpec(
            num_scalar_prefetch=0,
            grid=(B,),
            in_specs=in_specs,
            out_specs=pl.BlockSpec((1, C4p, HW), lambda b: (b, 0, 0)),
            scratch_shapes=[pltpu.VMEM((dim2p, halo_l + HW + halo_r), jnp.float32),
                            pltpu.VMEM((dim2p, HW), jnp.float32)],
        ),
        compiler_params=pltpu.CompilerParams(
            dimension_semantics=("parallel",),
            vmem_limit_bytes=vmem_limit),
    )(x_flat, w1f, b1, wdwf, colmask, w3f, b3, w4m, b4c, gmat, gng, gnb)

    # Slice the channel pad off; splitting C4 -> (dim//groups, sks^2) and HW -> (H, W)
    # matches PyTorch's .view() (pure metadata).
    return out[:, :C4, :].reshape(B, dim // groups, sks * sks, H, W)


# ----------------------------------------------------------------------------
# Parameter preparation: fold fused-BN scales into conv weights, fold cv2's BN
# shift through cv3, pad channel dims to sublane multiples, cast matmul weights.
# ----------------------------------------------------------------------------
def prepare_kernel_params(mparams, *, dim, lks, sks, groups, matmul_dtype=jnp.float32):
    (w1, s1, sh1, wdw, s2, sh2, w3, s3, sh3, w4, b4, gn_g, gn_b) = mparams
    dim2 = dim // 2
    C4 = sks * sks * dim // groups
    dim2p = _round_up(dim2, 8)
    C4p = _round_up(C4, 8)

    def pad_to(a, shape):
        return jnp.zeros(shape, a.dtype).at[:a.shape[0], :a.shape[1]].set(a)

    w1f = w1[:, :, 0, 0] * s1[:, None]                                   # (dim2, dim)
    b1 = sh1.reshape(dim2, 1)
    wdwf = (wdw[:, 0] * s2[:, None, None]).reshape(dim2, lks * lks)      # (dim2, lks*lks)
    w3f = w3[:, :, 0, 0] * s3[:, None]                                   # (dim2, dim2)
    b3 = (sh3 + w3f @ sh2).reshape(dim2, 1)     # cv2 shift folded through cv3 (exact f32)
    w4m = w4[:, :, 0, 0]                                                 # (C4, dim2)
    b4c = b4.reshape(C4, 1)
    gng = gn_g.reshape(C4, 1)
    gnb = gn_b.reshape(C4, 1)

    return (pad_to(w1f, (dim2p, dim)).astype(matmul_dtype),
            pad_to(b1, (dim2p, 1)),
            pad_to(wdwf, (dim2p, lks * lks)),
            pad_to(w3f, (dim2p, dim2p)).astype(matmul_dtype),
            pad_to(b3, (dim2p, 1)),
            pad_to(w4m, (C4p, dim2p)).astype(matmul_dtype),
            pad_to(b4c, (C4p, 1)),
            pad_to(gng, (C4p, 1)),
            pad_to(gnb, (C4p, 1)))


# ----------------------------------------------------------------------------
# Pure-JAX reference (NCHW, mirrors the PyTorch forward, unfolded f32 params).
# ----------------------------------------------------------------------------
def lkp_reference(x, mparams, *, dim, lks, sks, groups):
    (w1, s1, sh1, wdw, s2, sh2, w3, s3, sh3, w4, b4, gn_g, gn_b) = mparams
    dim2 = dim // 2
    pad = (lks - 1) // 2

    def pw_bn(z, w_oihw, scale, shift):
        y = jnp.einsum('oc,bchw->bohw', w_oihw[:, :, 0, 0], z)
        return y * scale[None, :, None, None] + shift[None, :, None, None]

    x1 = jax.nn.relu(pw_bn(x, w1, s1, sh1))
    x2 = lax.conv_general_dilated(
        x1, wdw, (1, 1), ((pad, pad), (pad, pad)),
        dimension_numbers=('NCHW', 'OIHW', 'NCHW'),
        feature_group_count=dim2)
    x2 = x2 * s2[None, :, None, None] + sh2[None, :, None, None]
    x3 = jax.nn.relu(pw_bn(x2, w3, s3, sh3))
    y = jnp.einsum('oc,bchw->bohw', w4[:, :, 0, 0], x3) + b4[None, :, None, None]

    B, C, H, W = y.shape
    G = dim // groups
    cpg = sks * sks
    yr = y.reshape(B, G, cpg, H, W)
    mean = yr.mean(axis=(2, 3, 4), keepdims=True)
    var = ((yr - mean) ** 2).mean(axis=(2, 3, 4), keepdims=True)
    yn = (yr - mean) / jnp.sqrt(var + 1e-5)
    yn = yn.reshape(B, C, H, W) * gn_g[None, :, None, None] + gn_b[None, :, None, None]
    return yn.reshape(B, dim // groups, sks * sks, H, W)


# ----------------------------------------------------------------------------
# Deterministic synthetic parameters (module-level: OIHW weights + fused BN).
# ----------------------------------------------------------------------------
def make_params(key, *, dim, lks, sks, groups):
    dim2 = dim // 2
    C4 = sks * sks * dim // groups
    ks = jax.random.split(key, 10)
    eps = 1e-5

    def bn_params(k, n):
        k1, k2 = jax.random.split(k)
        gamma = jnp.ones((n,), jnp.float32)                 # Conv2d_BN init: weight=1
        beta = jnp.zeros((n,), jnp.float32)                 # bias=0
        mean = 0.1 * jax.random.normal(k1, (n,), jnp.float32)
        var = 1.0 + 0.1 * jnp.abs(jax.random.normal(k2, (n,), jnp.float32))
        scale = gamma / jnp.sqrt(var + eps)
        shift = beta - mean * scale
        return scale, shift

    w1 = 0.2 * jax.random.normal(ks[0], (dim2, dim, 1, 1), jnp.float32)
    wdw = 0.2 * jax.random.normal(ks[1], (dim2, 1, lks, lks), jnp.float32)
    w3 = 0.2 * jax.random.normal(ks[2], (dim2, dim2, 1, 1), jnp.float32)
    w4 = 0.2 * jax.random.normal(ks[3], (C4, dim2, 1, 1), jnp.float32)
    b4 = 0.1 * jax.random.normal(ks[4], (C4,), jnp.float32)
    s1, sh1 = bn_params(ks[5], dim2)
    s2, sh2 = bn_params(ks[6], dim2)
    s3, sh3 = bn_params(ks[7], dim2)
    gn_g = 1.0 + 0.1 * jax.random.normal(ks[8], (C4,), jnp.float32)
    gn_b = 0.1 * jax.random.normal(ks[9], (C4,), jnp.float32)
    return (w1, s1, sh1, wdw, s2, sh2, w3, s3, sh3, w4, b4, gn_g, gn_b)


if __name__ == "__main__":
    dim, lks, sks, groups = 8, 7, 3, 2
    B, H, W = 2, 16, 16

    key = jax.random.PRNGKey(0)
    kx, kp = jax.random.split(key)
    x = jax.random.normal(kx, (B, dim, H, W), jnp.float32)   # PyTorch NCHW input
    mparams = make_params(kp, dim=dim, lks=lks, sks=sks, groups=groups)

    ref = lkp_reference(x, mparams, dim=dim, lks=lks, sks=sks, groups=groups)
    ref = jax.block_until_ready(ref)

    # --- f32 matmul-operand path: strict validation against the pure-JAX reference.
    kp_f32 = prepare_kernel_params(mparams, dim=dim, lks=lks, sks=sks, groups=groups,
                                   matmul_dtype=jnp.float32)
    out = lkp_forward(x, kp_f32, dim=dim, lks=lks, sks=sks, groups=groups)
    out = jax.block_until_ready(out)
    assert out.shape == (B, dim // groups, sks * sks, H, W), out.shape
    err = float(jnp.max(jnp.abs(out - ref)))
    assert jnp.allclose(out, ref, atol=1e-3, rtol=1e-3), err

    # --- bf16 MXU-operand path (production default on v5e/v6e/v7x): f32 accumulation,
    # loose functional sanity bound vs the f32 reference (bf16 operand rounding is
    # amplified by GroupNorm's 1/std; strict validation is the f32 path above).
    kp_bf16 = prepare_kernel_params(mparams, dim=dim, lks=lks, sks=sks, groups=groups,
                                    matmul_dtype=jnp.bfloat16)
    out_bf16 = lkp_forward(x, kp_bf16, dim=dim, lks=lks, sks=sks, groups=groups)
    out_bf16 = jax.block_until_ready(out_bf16)
    err_bf16 = float(jnp.max(jnp.abs(out_bf16 - ref)))
    assert jnp.isfinite(err_bf16) and err_bf16 < 0.3, err_bf16

    print("KERNEL_OK")
</pallas_src>

<mosaic_0001>
module attributes {stable_mosaic.version = 11 : i64} {
  func.func @lkp_kernel(%arg0: i32, %arg1: memref<1x8x256xf32, #tpu.memory_space<vmem>>, %arg2: memref<8x8xf32, #tpu.memory_space<vmem>>, %arg3: memref<8x1xf32, #tpu.memory_space<vmem>>, %arg4: memref<8x49xf32, #tpu.memory_space<vmem>>, %arg5: memref<7x256xf32, #tpu.memory_space<vmem>>, %arg6: memref<8x8xf32, #tpu.memory_space<vmem>>, %arg7: memref<8x1xf32, #tpu.memory_space<vmem>>, %arg8: memref<40x8xf32, #tpu.memory_space<vmem>>, %arg9: memref<40x1xf32, #tpu.memory_space<vmem>>, %arg10: memref<40x40xf32, #tpu.memory_space<vmem>>, %arg11: memref<40x1xf32, #tpu.memory_space<vmem>>, %arg12: memref<40x1xf32, #tpu.memory_space<vmem>>, %arg13: memref<1x40x256xf32, #tpu.memory_space<vmem>>, %arg14: memref<8x435xf32, #tpu.memory_space<vmem>>, %arg15: memref<8x256xf32, #tpu.memory_space<vmem>>) attributes {dimension_semantics = [#tpu.dimension_semantics<parallel>], iteration_bounds = array<i64: 2>, scalar_prefetch = 0 : i64, scratch_operands = 2 : i64, tpu.core_type = #tpu.core_type<tc>, window_params = [{transform_indices = @transform_0, window_bounds = array<i64: 1, 8, 256>}, {pipeline_mode = #tpu.pipeline_mode<synchronous>, transform_indices = @transform_1, window_bounds = array<i64: 8, 8>}, {pipeline_mode = #tpu.pipeline_mode<synchronous>, transform_indices = @transform_2, window_bounds = array<i64: 8, 1>}, {pipeline_mode = #tpu.pipeline_mode<synchronous>, transform_indices = @transform_3, window_bounds = array<i64: 8, 49>}, {pipeline_mode = #tpu.pipeline_mode<synchronous>, transform_indices = @transform_4, window_bounds = array<i64: 7, 256>}, {pipeline_mode = #tpu.pipeline_mode<synchronous>, transform_indices = @transform_5, window_bounds = array<i64: 8, 8>}, {pipeline_mode = #tpu.pipeline_mode<synchronous>, transform_indices = @transform_6, window_bounds = array<i64: 8, 1>}, {pipeline_mode = #tpu.pipeline_mode<synchronous>, transform_indices = @transform_7, window_bounds = array<i64: 40, 8>}, {pipeline_mode = #tpu.pipeline_mode<synchronous>, transform_indices = @transform_8, window_bounds = array<i64: 40, 1>}, {pipeline_mode = #tpu.pipeline_mode<synchronous>, transform_indices = @transform_9, window_bounds = array<i64: 40, 40>}, {pipeline_mode = #tpu.pipeline_mode<synchronous>, transform_indices = @transform_10, window_bounds = array<i64: 40, 1>}, {pipeline_mode = #tpu.pipeline_mode<synchronous>, transform_indices = @transform_11, window_bounds = array<i64: 40, 1>}, {transform_indices = @transform_12, window_bounds = array<i64: 1, 40, 256>}]} {
    %c0 = arith.constant 0 : index
    %c0_0 = arith.constant 0 : index
    %0 = vector.load %arg2[%c0, %c0_0] : memref<8x8xf32, #tpu.memory_space<vmem>>, vector<8x8xf32>
    %c0_1 = arith.constant 0 : index
    %c0_2 = arith.constant 0 : index
    %c0_3 = arith.constant 0 : index
    %1 = vector.load %arg1[%c0_1, %c0_2, %c0_3] : memref<1x8x256xf32, #tpu.memory_space<vmem>>, vector<1x8x256xf32>
    %2 = vector.shape_cast %1 : vector<1x8x256xf32> to vector<8x256xf32>
    %cst = arith.constant dense<0.000000e+00> : vector<8x256xf32>
    %3 = tpu.matmul %0, %2, %cst {dimension_numbers = #tpu.dot_dimension_numbers<[1], [0], [0], [1], [0, 0, 1, 1], [], []>} : vector<8x8xf32>, vector<8x256xf32>, vector<8x256xf32> -> vector<8x256xf32>
    %c0_4 = arith.constant 0 : index
    %c0_5 = arith.constant 0 : index
    %4 = vector.load %arg3[%c0_4, %c0_5] : memref<8x1xf32, #tpu.memory_space<vmem>>, vector<8x1xf32>
    %5 = vector.broadcast %4 : vector<8x1xf32> to vector<8x256xf32>
    %6 = arith.addf %3, %5 : vector<8x256xf32>
    %cst_6 = arith.constant 0.000000e+00 : f32
    %7 = vector.broadcast %cst_6 : f32 to vector<8x256xf32>
    %8 = arith.maximumf %6, %7 : vector<8x256xf32>
    %cst_7 = arith.constant 0.000000e+00 : f32
    %9 = vector.broadcast %cst_7 : f32 to vector<8x128xf32>
    %c0_8 = arith.constant 0 : index
    %c0_9 = arith.constant 0 : index
    %10 = vector.load %arg14[%c0_8, %c0_9] : memref<8x435xf32, #tpu.memory_space<vmem>>, vector<8x128xf32>
    tpu.vector_store %arg14[%c0_8, %c0_9], %9 {strides = array<i32>} : memref<8x435xf32, #tpu.memory_space<vmem>>, vector<8x128xf32>,
    %cst_10 = arith.constant 0.000000e+00 : f32
    %11 = vector.broadcast %cst_10 : f32 to vector<8x51xf32>
    %c0_11 = arith.constant 0 : index
    %c384 = arith.constant 384 : index
    %12 = vector.load %arg14[%c0_11, %c384] : memref<8x435xf32, #tpu.memory_space<vmem>>, vector<8x51xf32>
    tpu.vector_store %arg14[%c0_11, %c384], %11 {strides = array<i32>} : memref<8x435xf32, #tpu.memory_space<vmem>>, vector<8x51xf32>,
    %c0_12 = arith.constant 0 : index
    %c128 = arith.constant 128 : index
    %13 = vector.load %arg14[%c0_12, %c128] : memref<8x435xf32, #tpu.memory_space<vmem>>, vector<8x256xf32>
    tpu.vector_store %arg14[%c0_12, %c128], %8 {strides = array<i32>} : memref<8x435xf32, #tpu.memory_space<vmem>>, vector<8x256xf32>,
    %c0_13 = arith.constant 0 : index
    %c0_14 = arith.constant 0 : index
    %14 = vector.load %arg4[%c0_13, %c0_14] : memref<8x49xf32, #tpu.memory_space<vmem>>, vector<8x1xf32>
    %c0_15 = arith.constant 0 : index
    %c1 = arith.constant 1 : index
    %15 = vector.load %arg4[%c0_15, %c1] : memref<8x49xf32, #tpu.memory_space<vmem>>, vector<8x1xf32>
    %c0_16 = arith.constant 0 : index
    %c2 = arith.constant 2 : index
    %16 = vector.load %arg4[%c0_16, %c2] : memref<8x49xf32, #tpu.memory_space<vmem>>, vector<8x1xf32>
    %c0_17 = arith.constant 0 : index
    %c3 = arith.constant 3 : index
    %17 = vector.load %arg4[%c0_17, %c3] : memref<8x49xf32, #tpu.memory_space<vmem>>, vector<8x1xf32>
    %c0_18 = arith.constant 0 : index
    %c4 = arith.constant 4 : index
    %18 = vector.load %arg4[%c0_18, %c4] : memref<8x49xf32, #tpu.memory_space<vmem>>, vector<8x1xf32>
    %c0_19 = arith.constant 0 : index
    %c5 = arith.constant 5 : index
    %19 = vector.load %arg4[%c0_19, %c5] : memref<8x49xf32, #tpu.memory_space<vmem>>, vector<8x1xf32>
    %c0_20 = arith.constant 0 : index
    %c6 = arith.constant 6 : index
    %20 = vector.load %arg4[%c0_20, %c6] : memref<8x49xf32, #tpu.memory_space<vmem>>, vector<8x1xf32>
    %c0_21 = arith.constant 0 : index
    %c7 = arith.constant 7 : index
    %21 = vector.load %arg4[%c0_21, %c7] : memref<8x49xf32, #tpu.memory_space<vmem>>, vector<8x1xf32>
    %c0_22 = arith.constant 0 : index
    %c8 = arith.constant 8 : index
    %22 = vector.load %arg4[%c0_22, %c8] : memref<8x49xf32, #tpu.memory_space<vmem>>, vector<8x1xf32>
    %c0_23 = arith.constant 0 : index
    %c9 = arith.constant 9 : index
    %23 = vector.load %arg4[%c0_23, %c9] : memref<8x49xf32, #tpu.memory_space<vmem>>, vector<8x1xf32>
    %c0_24 = arith.constant 0 : index
    %c10 = arith.constant 10 : index
    %24 = vector.load %arg4[%c0_24, %c10] : memref<8x49xf32, #tpu.memory_space<vmem>>, vector<8x1xf32>
    %c0_25 = arith.constant 0 : index
    %c11 = arith.constant 11 : index
    %25 = vector.load %arg4[%c0_25, %c11] : memref<8x49xf32, #tpu.memory_space<vmem>>, vector<8x1xf32>
    %c0_26 = arith.constant 0 : index
    %c12 = arith.constant 12 : index
    %26 = vector.load %arg4[%c0_26, %c12] : memref<8x49xf32, #tpu.memory_space<vmem>>, vector<8x1xf32>
    %c0_27 = arith.constant 0 : index
    %c13 = arith.constant 13 : index
    %27 = vector.load %arg4[%c0_27, %c13] : memref<8x49xf32, #tpu.memory_space<vmem>>, vector<8x1xf32>
    %c0_28 = arith.constant 0 : index
    %c14 = arith.constant 14 : index
    %28 = vector.load %arg4[%c0_28, %c14] : memref<8x49xf32, #tpu.memory_space<vmem>>, vector<8x1xf32>
    %c0_29 = arith.constant 0 : index
    %c15 = arith.constant 15 : index
    %29 = vector.load %arg4[%c0_29, %c15] : memref<8x49xf32, #tpu.memory_space<vmem>>, vector<8x1xf32>
    %c0_30 = arith.constant 0 : index
    %c16 = arith.constant 16 : index
    %30 = vector.load %arg4[%c0_30, %c16] : memref<8x49xf32, #tpu.memory_space<vmem>>, vector<8x1xf32>
    %c0_31 = arith.constant 0 : index
    %c17 = arith.constant 17 : index
    %31 = vector.load %arg4[%c0_31, %c17] : memref<8x49xf32, #tpu.memory_space<vmem>>, vector<8x1xf32>
    %c0_32 = arith.constant 0 : index
    %c18 = arith.constant 18 : index
    %32 = vector.load %arg4[%c0_32, %c18] : memref<8x49xf32, #tpu.memory_space<vmem>>, vector<8x1xf32>
    %c0_33 = arith.constant 0 : index
    %c19 = arith.constant 19 : index
    %33 = vector.load %arg4[%c0_33, %c19] : memref<8x49xf32, #tpu.memory_space<vmem>>, vector<8x1xf32>
    %c0_34 = arith.constant 0 : index
    %c20 = arith.constant 20 : index
    %34 = vector.load %arg4[%c0_34, %c20] : memref<8x49xf32, #tpu.memory_space<vmem>>, vector<8x1xf32>
    %c0_35 = arith.constant 0 : index
    %c21 = arith.constant 21 : index
    %35 = vector.load %arg4[%c0_35, %c21] : memref<8x49xf32, #tpu.memory_space<vmem>>, vector<8x1xf32>
    %c0_36 = arith.constant 0 : index
    %c22 = arith.constant 22 : index
    %36 = vector.load %arg4[%c0_36, %c22] : memref<8x49xf32, #tpu.memory_space<vmem>>, vector<8x1xf32>
    %c0_37 = arith.constant 0 : index
    %c23 = arith.constant 23 : index
    %37 = vector.load %arg4[%c0_37, %c23] : memref<8x49xf32, #tpu.memory_space<vmem>>, vector<8x1xf32>
    %c0_38 = arith.constant 0 : index
    %c24 = arith.constant 24 : index
    %38 = vector.load %arg4[%c0_38, %c24] : memref<8x49xf32, #tpu.memory_space<vmem>>, vector<8x1xf32>
    %c0_39 = arith.constant 0 : index
    %c25 = arith.constant 25 : index
    %39 = vector.load %arg4[%c0_39, %c25] : memref<8x49xf32, #tpu.memory_space<vmem>>, vector<8x1xf32>
    %c0_40 = arith.constant 0 : index
    %c26 = arith.constant 26 : index
    %40 = vector.load %arg4[%c0_40, %c26] : memref<8x49xf32, #tpu.memory_space<vmem>>, vector<8x1xf32>
    %c0_41 = arith.constant 0 : index
    %c27 = arith.constant 27 : index
    %41 = vector.load %arg4[%c0_41, %c27] : memref<8x49xf32, #tpu.memory_space<vmem>>, vector<8x1xf32>
    %c0_42 = arith.constant 0 : index
    %c28 = arith.constant 28 : index
    %42 = vector.load %arg4[%c0_42, %c28] : memref<8x49xf32, #tpu.memory_space<vmem>>, vector<8x1xf32>
    %c0_43 = arith.constant 0 : index
    %c29 = arith.constant 29 : index
    %43 = vector.load %arg4[%c0_43, %c29] : memref<8x49xf32, #tpu.memory_space<vmem>>, vector<8x1xf32>
    %c0_44 = arith.constant 0 : index
    %c30 = arith.constant 30 : index
    %44 = vector.load %arg4[%c0_44, %c30] : memref<8x49xf32, #tpu.memory_space<vmem>>, vector<8x1xf32>
    %c0_45 = arith.constant 0 : index
    %c31 = arith.constant 31 : index
    %45 = vector.load %arg4[%c0_45, %c31] : memref<8x49xf32, #tpu.memory_space<vmem>>, vector<8x1xf32>
    %c0_46 = arith.constant 0 : index
    %c32 = arith.constant 32 : index
    %46 = vector.load %arg4[%c0_46, %c32] : memref<8x49xf32, #tpu.memory_space<vmem>>, vector<8x1xf32>
    %c0_47 = arith.constant 0 : index
    %c33 = arith.constant 33 : index
    %47 = vector.load %arg4[%c0_47, %c33] : memref<8x49xf32, #tpu.memory_space<vmem>>, vector<8x1xf32>
    %c0_48 = arith.constant 0 : index
    %c34 = arith.constant 34 : index
    %48 = vector.load %arg4[%c0_48, %c34] : memref<8x49xf32, #tpu.memory_space<vmem>>, vector<8x1xf32>
    %c0_49 = arith.constant 0 : index
    %c35 = arith.constant 35 : index
    %49 = vector.load %arg4[%c0_49, %c35] : memref<8x49xf32, #tpu.memory_space<vmem>>, vector<8x1xf32>
    %c0_50 = arith.constant 0 : index
    %c36 = arith.constant 36 : index
    %50 = vector.load %arg4[%c0_50, %c36] : memref<8x49xf32, #tpu.memory_space<vmem>>, vector<8x1xf32>
    %c0_51 = arith.constant 0 : index
    %c37 = arith.constant 37 : index
    %51 = vector.load %arg4[%c0_51, %c37] : memref<8x49xf32, #tpu.memory_space<vmem>>, vector<8x1xf32>
    %c0_52 = arith.constant 0 : index
    %c38 = arith.constant 38 : index
    %52 = vector.load %arg4[%c0_52, %c38] : memref<8x49xf32, #tpu.memory_space<vmem>>, vector<8x1xf32>
    %c0_53 = arith.constant 0 : index
    %c39 = arith.constant 39 : index
    %53 = vector.load %arg4[%c0_53, %c39] : memref<8x49xf32, #tpu.memory_space<vmem>>, vector<8x1xf32>
    %c0_54 = arith.constant 0 : index
    %c40 = arith.constant 40 : index
    %54 = vector.load %arg4[%c0_54, %c40] : memref<8x49xf32, #tpu.memory_space<vmem>>, vector<8x1xf32>
    %c0_55 = arith.constant 0 : index
    %c41 = arith.constant 41 : index
    %55 = vector.load %arg4[%c0_55, %c41] : memref<8x49xf32, #tpu.memory_space<vmem>>, vector<8x1xf32>
    %c0_56 = arith.constant 0 : index
    %c42 = arith.constant 42 : index
    %56 = vector.load %arg4[%c0_56, %c42] : memref<8x49xf32, #tpu.memory_space<vmem>>, vector<8x1xf32>
    %c0_57 = arith.constant 0 : index
    %c43 = arith.constant 43 : index
    %57 = vector.load %arg4[%c0_57, %c43] : memref<8x49xf32, #tpu.memory_space<vmem>>, vector<8x1xf32>
    %c0_58 = arith.constant 0 : index
    %c44 = arith.constant 44 : index
    %58 = vector.load %arg4[%c0_58, %c44] : memref<8x49xf32, #tpu.memory_space<vmem>>, vector<8x1xf32>
    %c0_59 = arith.constant 0 : index
    %c45 = arith.constant 45 : index
    %59 = vector.load %arg4[%c0_59, %c45] : memref<8x49xf32, #tpu.memory_space<vmem>>, vector<8x1xf32>
    %c0_60 = arith.constant 0 : index
    %c46 = arith.constant 46 : index
    %60 = vector.load %arg4[%c0_60, %c46] : memref<8x49xf32, #tpu.memory_space<vmem>>, vector<8x1xf32>
    %c0_61 = arith.constant 0 : index
    %c47 = arith.constant 47 : index
    %61 = vector.load %arg4[%c0_61, %c47] : memref<8x49xf32, #tpu.memory_space<vmem>>, vector<8x1xf32>
    %c0_62 = arith.constant 0 : index
    %c48 = arith.constant 48 : index
    %62 = vector.load %arg4[%c0_62, %c48] : memref<8x49xf32, #tpu.memory_space<vmem>>, vector<8x1xf32>
    %cst_63 = arith.constant 0.000000e+00 : f32
    %63 = vector.broadcast %cst_63 : f32 to vector<8x256xf32>
    %cst_64 = arith.constant 0.000000e+00 : f32
    %64 = vector.broadcast %cst_64 : f32 to vector<8x256xf32>
    %c0_65 = arith.constant 0 : index
    %c77 = arith.constant 77 : index
    %65 = vector.load %arg14[%c0_65, %c77] : memref<8x435xf32, #tpu.memory_space<vmem>>, vector<8x256xf32>
    %66 = vector.broadcast %14 : vector<8x1xf32> to vector<8x256xf32>
    %67 = arith.mulf %65, %66 : vector<8x256xf32>
    %68 = arith.addf %64, %67 : vector<8x256xf32>
    %c0_66 = arith.constant 0 : index
    %c93 = arith.constant 93 : index
    %69 = vector.load %arg14[%c0_66, %c93] : memref<8x435xf32, #tpu.memory_space<vmem>>, vector<8x256xf32>
    %70 = vector.broadcast %21 : vector<8x1xf32> to vector<8x256xf32>
    %71 = arith.mulf %69, %70 : vector<8x256xf32>
    %72 = arith.addf %68, %71 : vector<8x256xf32>
    %c0_67 = arith.constant 0 : index
    %c109 = arith.constant 109 : index
    %73 = vector.load %arg14[%c0_67, %c109] : memref<8x435xf32, #tpu.memory_space<vmem>>, vector<8x256xf32>
    %74 = vector.broadcast %28 : vector<8x1xf32> to vector<8x256xf32>
    %75 = arith.mulf %73, %74 : vector<8x256xf32>
    %76 = arith.addf %72, %75 : vector<8x256xf32>
    %c0_68 = arith.constant 0 : index
    %c125 = arith.constant 125 : index
    %77 = vector.load %arg14[%c0_68, %c125] : memref<8x435xf32, #tpu.memory_space<vmem>>, vector<8x256xf32>
    %78 = vector.broadcast %35 : vector<8x1xf32> to vector<8x256xf32>
    %79 = arith.mulf %77, %78 : vector<8x256xf32>
    %80 = arith.addf %76, %79 : vector<8x256xf32>
    %c0_69 = arith.constant 0 : index
    %c141 = arith.constant 141 : index
    %81 = vector.load %arg14[%c0_69, %c141] : memref<8x435xf32, #tpu.memory_space<vmem>>, vector<8x256xf32>
    %82 = vector.broadcast %42 : vector<8x1xf32> to vector<8x256xf32>
    %83 = arith.mulf %81, %82 : vector<8x256xf32>
    %84 = arith.addf %80, %83 : vector<8x256xf32>
    %c0_70 = arith.constant 0 : index
    %c157 = arith.constant 157 : index
    %85 = vector.load %arg14[%c0_70, %c157] : memref<8x435xf32, #tpu.memory_space<vmem>>, vector<8x256xf32>
    %86 = vector.broadcast %49 : vector<8x1xf32> to vector<8x256xf32>
    %87 = arith.mulf %85, %86 : vector<8x256xf32>
    %88 = arith.addf %84, %87 : vector<8x256xf32>
    %c0_71 = arith.constant 0 : index
    %c173 = arith.constant 173 : index
    %89 = vector.load %arg14[%c0_71, %c173] : memref<8x435xf32, #tpu.memory_space<vmem>>, vector<8x256xf32>
    %90 = vector.broadcast %56 : vector<8x1xf32> to vector<8x256xf32>
    %91 = arith.mulf %89, %90 : vector<8x256xf32>
    %92 = arith.addf %88, %91 : vector<8x256xf32>
    %c0_72 = arith.constant 0 : index
    %c0_73 = arith.constant 0 : index
    %93 = vector.load %arg5[%c0_72, %c0_73] : memref<7x256xf32, #tpu.memory_space<vmem>>, vector<1x256xf32>
    %94 = vector.broadcast %93 : vector<1x256xf32> to vector<8x256xf32>
    %95 = arith.mulf %92, %94 : vector<8x256xf32>
    %96 = arith.addf %63, %95 : vector<8x256xf32>
    %cst_74 = arith.constant 0.000000e+00 : f32
    %97 = vector.broadcast %cst_74 : f32 to vector<8x256xf32>
    %c0_75 = arith.constant 0 : index
    %c78 = arith.constant 78 : index
    %98 = vector.load %arg14[%c0_75, %c78] : memref<8x435xf32, #tpu.memory_space<vmem>>, vector<8x256xf32>
    %99 = vector.broadcast %15 : vector<8x1xf32> to vector<8x256xf32>
    %100 = arith.mulf %98, %99 : vector<8x256xf32>
    %101 = arith.addf %97, %100 : vector<8x256xf32>
    %c0_76 = arith.constant 0 : index
    %c94 = arith.constant 94 : index
    %102 = vector.load %arg14[%c0_76, %c94] : memref<8x435xf32, #tpu.memory_space<vmem>>, vector<8x256xf32>
    %103 = vector.broadcast %22 : vector<8x1xf32> to vector<8x256xf32>
    %104 = arith.mulf %102, %103 : vector<8x256xf32>
    %105 = arith.addf %101, %104 : vector<8x256xf32>
    %c0_77 = arith.constant 0 : index
    %c110 = arith.constant 110 : index
    %106 = vector.load %arg14[%c0_77, %c110] : memref<8x435xf32, #tpu.memory_space<vmem>>, vector<8x256xf32>
    %107 = vector.broadcast %29 : vector<8x1xf32> to vector<8x256xf32>
    %108 = arith.mulf %106, %107 : vector<8x256xf32>
    %109 = arith.addf %105, %108 : vector<8x256xf32>
    %c0_78 = arith.constant 0 : index
    %c126 = arith.constant 126 : index
    %110 = vector.load %arg14[%c0_78, %c126] : memref<8x435xf32, #tpu.memory_space<vmem>>, vector<8x256xf32>
    %111 = vector.broadcast %36 : vector<8x1xf32> to vector<8x256xf32>
    %112 = arith.mulf %110, %111 : vector<8x256xf32>
    %113 = arith.addf %109, %112 : vector<8x256xf32>
    %c0_79 = arith.constant 0 : index
    %c142 = arith.constant 142 : index
    %114 = vector.load %arg14[%c0_79, %c142] : memref<8x435xf32, #tpu.memory_space<vmem>>, vector<8x256xf32>
    %115 = vector.broadcast %43 : vector<8x1xf32> to vector<8x256xf32>
    %116 = arith.mulf %114, %115 : vector<8x256xf32>
    %117 = arith.addf %113, %116 : vector<8x256xf32>
    %c0_80 = arith.constant 0 : index
    %c158 = arith.constant 158 : index
    %118 = vector.load %arg14[%c0_80, %c158] : memref<8x435xf32, #tpu.memory_space<vmem>>, vector<8x256xf32>
    %119 = vector.broadcast %50 : vector<8x1xf32> to vector<8x256xf32>
    %120 = arith.mulf %118, %119 : vector<8x256xf32>
    %121 = arith.addf %117, %120 : vector<8x256xf32>
    %c0_81 = arith.constant 0 : index
    %c174 = arith.constant 174 : index
    %122 = vector.load %arg14[%c0_81, %c174] : memref<8x435xf32, #tpu.memory_space<vmem>>, vector<8x256xf32>
    %123 = vector.broadcast %57 : vector<8x1xf32> to vector<8x256xf32>
    %124 = arith.mulf %122, %123 : vector<8x256xf32>
    %125 = arith.addf %121, %124 : vector<8x256xf32>
    %c1_82 = arith.constant 1 : index
    %c0_83 = arith.constant 0 : index
    %126 = vector.load %arg5[%c1_82, %c0_83] : memref<7x256xf32, #tpu.memory_space<vmem>>, vector<1x256xf32>
    %127 = vector.broadcast %126 : vector<1x256xf32> to vector<8x256xf32>
    %128 = arith.mulf %125, %127 : vector<8x256xf32>
    %129 = arith.addf %96, %128 : vector<8x256xf32>
    %cst_84 = arith.constant 0.000000e+00 : f32
    %130 = vector.broadcast %cst_84 : f32 to vector<8x256xf32>
    %c0_85 = arith.constant 0 : index
    %c79 = arith.constant 79 : index
    %131 = vector.load %arg14[%c0_85, %c79] : memref<8x435xf32, #tpu.memory_space<vmem>>, vector<8x256xf32>
    %132 = vector.broadcast %16 : vector<8x1xf32> to vector<8x256xf32>
    %133 = arith.mulf %131, %132 : vector<8x256xf32>
    %134 = arith.addf %130, %133 : vector<8x256xf32>
    %c0_86 = arith.constant 0 : index
    %c95 = arith.constant 95 : index
    %135 = vector.load %arg14[%c0_86, %c95] : memref<8x435xf32, #tpu.memory_space<vmem>>, vector<8x256xf32>
    %136 = vector.broadcast %23 : vector<8x1xf32> to vector<8x256xf32>
    %137 = arith.mulf %135, %136 : vector<8x256xf32>
    %138 = arith.addf %134, %137 : vector<8x256xf32>
    %c0_87 = arith.constant 0 : index
    %c111 = arith.constant 111 : index
    %139 = vector.load %arg14[%c0_87, %c111] : memref<8x435xf32, #tpu.memory_space<vmem>>, vector<8x256xf32>
    %140 = vector.broadcast %30 : vector<8x1xf32> to vector<8x256xf32>
    %141 = arith.mulf %139, %140 : vector<8x256xf32>
    %142 = arith.addf %138, %141 : vector<8x256xf32>
    %c0_88 = arith.constant 0 : index
    %c127 = arith.constant 127 : index
    %143 = vector.load %arg14[%c0_88, %c127] : memref<8x435xf32, #tpu.memory_space<vmem>>, vector<8x256xf32>
    %144 = vector.broadcast %37 : vector<8x1xf32> to vector<8x256xf32>
    %145 = arith.mulf %143, %144 : vector<8x256xf32>
    %146 = arith.addf %142, %145 : vector<8x256xf32>
    %c0_89 = arith.constant 0 : index
    %c143 = arith.constant 143 : index
    %147 = vector.load %arg14[%c0_89, %c143] : memref<8x435xf32, #tpu.memory_space<vmem>>, vector<8x256xf32>
    %148 = vector.broadcast %44 : vector<8x1xf32> to vector<8x256xf32>
    %149 = arith.mulf %147, %148 : vector<8x256xf32>
    %150 = arith.addf %146, %149 : vector<8x256xf32>
    %c0_90 = arith.constant 0 : index
    %c159 = arith.constant 159 : index
    %151 = vector.load %arg14[%c0_90, %c159] : memref<8x435xf32, #tpu.memory_space<vmem>>, vector<8x256xf32>
    %152 = vector.broadcast %51 : vector<8x1xf32> to vector<8x256xf32>
    %153 = arith.mulf %151, %152 : vector<8x256xf32>
    %154 = arith.addf %150, %153 : vector<8x256xf32>
    %c0_91 = arith.constant 0 : index
    %c175 = arith.constant 175 : index
    %155 = vector.load %arg14[%c0_91, %c175] : memref<8x435xf32, #tpu.memory_space<vmem>>, vector<8x256xf32>
    %156 = vector.broadcast %58 : vector<8x1xf32> to vector<8x256xf32>
    %157 = arith.mulf %155, %156 : vector<8x256xf32>
    %158 = arith.addf %154, %157 : vector<8x256xf32>
    %c2_92 = arith.constant 2 : index
    %c0_93 = arith.constant 0 : index
    %159 = vector.load %arg5[%c2_92, %c0_93] : memref<7x256xf32, #tpu.memory_space<vmem>>, vector<1x256xf32>
    %160 = vector.broadcast %159 : vector<1x256xf32> to vector<8x256xf32>
    %161 = arith.mulf %158, %160 : vector<8x256xf32>
    %162 = arith.addf %129, %161 : vector<8x256xf32>
    %cst_94 = arith.constant 0.000000e+00 : f32
    %163 = vector.broadcast %cst_94 : f32 to vector<8x256xf32>
    %c0_95 = arith.constant 0 : index
    %c80 = arith.constant 80 : index
    %164 = vector.load %arg14[%c0_95, %c80] : memref<8x435xf32, #tpu.memory_space<vmem>>, vector<8x256xf32>
    %165 = vector.broadcast %17 : vector<8x1xf32> to vector<8x256xf32>
    %166 = arith.mulf %164, %165 : vector<8x256xf32>
    %167 = arith.addf %163, %166 : vector<8x256xf32>
    %c0_96 = arith.constant 0 : index
    %c96 = arith.constant 96 : index
    %168 = vector.load %arg14[%c0_96, %c96] : memref<8x435xf32, #tpu.memory_space<vmem>>, vector<8x256xf32>
    %169 = vector.broadcast %24 : vector<8x1xf32> to vector<8x256xf32>
    %170 = arith.mulf %168, %169 : vector<8x256xf32>
    %171 = arith.addf %167, %170 : vector<8x256xf32>
    %c0_97 = arith.constant 0 : index
    %c112 = arith.constant 112 : index
    %172 = vector.load %arg14[%c0_97, %c112] : memref<8x435xf32, #tpu.memory_space<vmem>>, vector<8x256xf32>
    %173 = vector.broadcast %31 : vector<8x1xf32> to vector<8x256xf32>
    %174 = arith.mulf %172, %173 : vector<8x256xf32>
    %175 = arith.addf %171, %174 : vector<8x256xf32>
    %c0_98 = arith.constant 0 : index
    %c128_99 = arith.constant 128 : index
    %176 = vector.load %arg14[%c0_98, %c128_99] : memref<8x435xf32, #tpu.memory_space<vmem>>, vector<8x256xf32>
    %177 = vector.broadcast %38 : vector<8x1xf32> to vector<8x256xf32>
    %178 = arith.mulf %176, %177 : vector<8x256xf32>
    %179 = arith.addf %175, %178 : vector<8x256xf32>
    %c0_100 = arith.constant 0 : index
    %c144 = arith.constant 144 : index
    %180 = vector.load %arg14[%c0_100, %c144] : memref<8x435xf32, #tpu.memory_space<vmem>>, vector<8x256xf32>
    %181 = vector.broadcast %45 : vector<8x1xf32> to vector<8x256xf32>
    %182 = arith.mulf %180, %181 : vector<8x256xf32>
    %183 = arith.addf %179, %182 : vector<8x256xf32>
    %c0_101 = arith.constant 0 : index
    %c160 = arith.constant 160 : index
    %184 = vector.load %arg14[%c0_101, %c160] : memref<8x435xf32, #tpu.memory_space<vmem>>, vector<8x256xf32>
    %185 = vector.broadcast %52 : vector<8x1xf32> to vector<8x256xf32>
    %186 = arith.mulf %184, %185 : vector<8x256xf32>
    %187 = arith.addf %183, %186 : vector<8x256xf32>
    %c0_102 = arith.constant 0 : index
    %c176 = arith.constant 176 : index
    %188 = vector.load %arg14[%c0_102, %c176] : memref<8x435xf32, #tpu.memory_space<vmem>>, vector<8x256xf32>
    %189 = vector.broadcast %59 : vector<8x1xf32> to vector<8x256xf32>
    %190 = arith.mulf %188, %189 : vector<8x256xf32>
    %191 = arith.addf %187, %190 : vector<8x256xf32>
    %c3_103 = arith.constant 3 : index
    %c0_104 = arith.constant 0 : index
    %192 = vector.load %arg5[%c3_103, %c0_104] : memref<7x256xf32, #tpu.memory_space<vmem>>, vector<1x256xf32>
    %193 = vector.broadcast %192 : vector<1x256xf32> to vector<8x256xf32>
    %194 = arith.mulf %191, %193 : vector<8x256xf32>
    %195 = arith.addf %162, %194 : vector<8x256xf32>
    %cst_105 = arith.constant 0.000000e+00 : f32
    %196 = vector.broadcast %cst_105 : f32 to vector<8x256xf32>
    %c0_106 = arith.constant 0 : index
    %c81 = arith.constant 81 : index
    %197 = vector.load %arg14[%c0_106, %c81] : memref<8x435xf32, #tpu.memory_space<vmem>>, vector<8x256xf32>
    %198 = vector.broadcast %18 : vector<8x1xf32> to vector<8x256xf32>
    %199 = arith.mulf %197, %198 : vector<8x256xf32>
    %200 = arith.addf %196, %199 : vector<8x256xf32>
    %c0_107 = arith.constant 0 : index
    %c97 = arith.constant 97 : index
    %201 = vector.load %arg14[%c0_107, %c97] : memref<8x435xf32, #tpu.memory_space<vmem>>, vector<8x256xf32>
    %202 = vector.broadcast %25 : vector<8x1xf32> to vector<8x256xf32>
    %203 = arith.mulf %201, %202 : vector<8x256xf32>
    %204 = arith.addf %200, %203 : vector<8x256xf32>
    %c0_108 = arith.constant 0 : index
    %c113 = arith.constant 113 : index
    %205 = vector.load %arg14[%c0_108, %c113] : memref<8x435xf32, #tpu.memory_space<vmem>>, vector<8x256xf32>
    %206 = vector.broadcast %32 : vector<8x1xf32> to vector<8x256xf32>
    %207 = arith.mulf %205, %206 : vector<8x256xf32>
    %208 = arith.addf %204, %207 : vector<8x256xf32>
    %c0_109 = arith.constant 0 : index
    %c129 = arith.constant 129 : index
    %209 = vector.load %arg14[%c0_109, %c129] : memref<8x435xf32, #tpu.memory_space<vmem>>, vector<8x256xf32>
    %210 = vector.broadcast %39 : vector<8x1xf32> to vector<8x256xf32>
    %211 = arith.mulf %209, %210 : vector<8x256xf32>
    %212 = arith.addf %208, %211 : vector<8x256xf32>
    %c0_110 = arith.constant 0 : index
    %c145 = arith.constant 145 : index
    %213 = vector.load %arg14[%c0_110, %c145] : memref<8x435xf32, #tpu.memory_space<vmem>>, vector<8x256xf32>
    %214 = vector.broadcast %46 : vector<8x1xf32> to vector<8x256xf32>
    %215 = arith.mulf %213, %214 : vector<8x256xf32>
    %216 = arith.addf %212, %215 : vector<8x256xf32>
    %c0_111 = arith.constant 0 : index
    %c161 = arith.constant 161 : index
    %217 = vector.load %arg14[%c0_111, %c161] : memref<8x435xf32, #tpu.memory_space<vmem>>, vector<8x256xf32>
    %218 = vector.broadcast %53 : vector<8x1xf32> to vector<8x256xf32>
    %219 = arith.mulf %217, %218 : vector<8x256xf32>
    %220 = arith.addf %216, %219 : vector<8x256xf32>
    %c0_112 = arith.constant 0 : index
    %c177 = arith.constant 177 : index
    %221 = vector.load %arg14[%c0_112, %c177] : memref<8x435xf32, #tpu.memory_space<vmem>>, vector<8x256xf32>
    %222 = vector.broadcast %60 : vector<8x1xf32> to vector<8x256xf32>
    %223 = arith.mulf %221, %222 : vector<8x256xf32>
    %224 = arith.addf %220, %223 : vector<8x256xf32>
    %c4_113 = arith.constant 4 : index
    %c0_114 = arith.constant 0 : index
    %225 = vector.load %arg5[%c4_113, %c0_114] : memref<7x256xf32, #tpu.memory_space<vmem>>, vector<1x256xf32>
    %226 = vector.broadcast %225 : vector<1x256xf32> to vector<8x256xf32>
    %227 = arith.mulf %224, %226 : vector<8x256xf32>
    %228 = arith.addf %195, %227 : vector<8x256xf32>
    %cst_115 = arith.constant 0.000000e+00 : f32
    %229 = vector.broadcast %cst_115 : f32 to vector<8x256xf32>
    %c0_116 = arith.constant 0 : index
    %c82 = arith.constant 82 : index
    %230 = vector.load %arg14[%c0_116, %c82] : memref<8x435xf32, #tpu.memory_space<vmem>>, vector<8x256xf32>
    %231 = vector.broadcast %19 : vector<8x1xf32> to vector<8x256xf32>
    %232 = arith.mulf %230, %231 : vector<8x256xf32>
    %233 = arith.addf %229, %232 : vector<8x256xf32>
    %c0_117 = arith.constant 0 : index
    %c98 = arith.constant 98 : index
    %234 = vector.load %arg14[%c0_117, %c98] : memref<8x435xf32, #tpu.memory_space<vmem>>, vector<8x256xf32>
    %235 = vector.broadcast %26 : vector<8x1xf32> to vector<8x256xf32>
    %236 = arith.mulf %234, %235 : vector<8x256xf32>
    %237 = arith.addf %233, %236 : vector<8x256xf32>
    %c0_118 = arith.constant 0 : index
    %c114 = arith.constant 114 : index
    %238 = vector.load %arg14[%c0_118, %c114] : memref<8x435xf32, #tpu.memory_space<vmem>>, vector<8x256xf32>
    %239 = vector.broadcast %33 : vector<8x1xf32> to vector<8x256xf32>
    %240 = arith.mulf %238, %239 : vector<8x256xf32>
    %241 = arith.addf %237, %240 : vector<8x256xf32>
    %c0_119 = arith.constant 0 : index
    %c130 = arith.constant 130 : index
    %242 = vector.load %arg14[%c0_119, %c130] : memref<8x435xf32, #tpu.memory_space<vmem>>, vector<8x256xf32>
    %243 = vector.broadcast %40 : vector<8x1xf32> to vector<8x256xf32>
    %244 = arith.mulf %242, %243 : vector<8x256xf32>
    %245 = arith.addf %241, %244 : vector<8x256xf32>
    %c0_120 = arith.constant 0 : index
    %c146 = arith.constant 146 : index
    %246 = vector.load %arg14[%c0_120, %c146] : memref<8x435xf32, #tpu.memory_space<vmem>>, vector<8x256xf32>
    %247 = vector.broadcast %47 : vector<8x1xf32> to vector<8x256xf32>
    %248 = arith.mulf %246, %247 : vector<8x256xf32>
    %249 = arith.addf %245, %248 : vector<8x256xf32>
    %c0_121 = arith.constant 0 : index
    %c162 = arith.constant 162 : index
    %250 = vector.load %arg14[%c0_121, %c162] : memref<8x435xf32, #tpu.memory_space<vmem>>, vector<8x256xf32>
    %251 = vector.broadcast %54 : vector<8x1xf32> to vector<8x256xf32>
    %252 = arith.mulf %250, %251 : vector<8x256xf32>
    %253 = arith.addf %249, %252 : vector<8x256xf32>
    %c0_122 = arith.constant 0 : index
    %c178 = arith.constant 178 : index
    %254 = vector.load %arg14[%c0_122, %c178] : memref<8x435xf32, #tpu.memory_space<vmem>>, vector<8x256xf32>
    %255 = vector.broadcast %61 : vector<8x1xf32> to vector<8x256xf32>
    %256 = arith.mulf %254, %255 : vector<8x256xf32>
    %257 = arith.addf %253, %256 : vector<8x256xf32>
    %c5_123 = arith.constant 5 : index
    %c0_124 = arith.constant 0 : index
    %258 = vector.load %arg5[%c5_123, %c0_124] : memref<7x256xf32, #tpu.memory_space<vmem>>, vector<1x256xf32>
    %259 = vector.broadcast %258 : vector<1x256xf32> to vector<8x256xf32>
    %260 = arith.mulf %257, %259 : vector<8x256xf32>
    %261 = arith.addf %228, %260 : vector<8x256xf32>
    %cst_125 = arith.constant 0.000000e+00 : f32
    %262 = vector.broadcast %cst_125 : f32 to vector<8x256xf32>
    %c0_126 = arith.constant 0 : index
    %c83 = arith.constant 83 : index
    %263 = vector.load %arg14[%c0_126, %c83] : memref<8x435xf32, #tpu.memory_space<vmem>>, vector<8x256xf32>
    %264 = vector.broadcast %20 : vector<8x1xf32> to vector<8x256xf32>
    %265 = arith.mulf %263, %264 : vector<8x256xf32>
    %266 = arith.addf %262, %265 : vector<8x256xf32>
    %c0_127 = arith.constant 0 : index
    %c99 = arith.constant 99 : index
    %267 = vector.load %arg14[%c0_127, %c99] : memref<8x435xf32, #tpu.memory_space<vmem>>, vector<8x256xf32>
    %268 = vector.broadcast %27 : vector<8x1xf32> to vector<8x256xf32>
    %269 = arith.mulf %267, %268 : vector<8x256xf32>
    %270 = arith.addf %266, %269 : vector<8x256xf32>
    %c0_128 = arith.constant 0 : index
    %c115 = arith.constant 115 : index
    %271 = vector.load %arg14[%c0_128, %c115] : memref<8x435xf32, #tpu.memory_space<vmem>>, vector<8x256xf32>
    %272 = vector.broadcast %34 : vector<8x1xf32> to vector<8x256xf32>
    %273 = arith.mulf %271, %272 : vector<8x256xf32>
    %274 = arith.addf %270, %273 : vector<8x256xf32>
    %c0_129 = arith.constant 0 : index
    %c131 = arith.constant 131 : index
    %275 = vector.load %arg14[%c0_129, %c131] : memref<8x435xf32, #tpu.memory_space<vmem>>, vector<8x256xf32>
    %276 = vector.broadcast %41 : vector<8x1xf32> to vector<8x256xf32>
    %277 = arith.mulf %275, %276 : vector<8x256xf32>
    %278 = arith.addf %274, %277 : vector<8x256xf32>
    %c0_130 = arith.constant 0 : index
    %c147 = arith.constant 147 : index
    %279 = vector.load %arg14[%c0_130, %c147] : memref<8x435xf32, #tpu.memory_space<vmem>>, vector<8x256xf32>
    %280 = vector.broadcast %48 : vector<8x1xf32> to vector<8x256xf32>
    %281 = arith.mulf %279, %280 : vector<8x256xf32>
    %282 = arith.addf %278, %281 : vector<8x256xf32>
    %c0_131 = arith.constant 0 : index
    %c163 = arith.constant 163 : index
    %283 = vector.load %arg14[%c0_131, %c163] : memref<8x435xf32, #tpu.memory_space<vmem>>, vector<8x256xf32>
    %284 = vector.broadcast %55 : vector<8x1xf32> to vector<8x256xf32>
    %285 = arith.mulf %283, %284 : vector<8x256xf32>
    %286 = arith.addf %282, %285 : vector<8x256xf32>
    %c0_132 = arith.constant 0 : index
    %c179 = arith.constant 179 : index
    %287 = vector.load %arg14[%c0_132, %c179] : memref<8x435xf32, #tpu.memory_space<vmem>>, vector<8x256xf32>
    %288 = vector.broadcast %62 : vector<8x1xf32> to vector<8x256xf32>
    %289 = arith.mulf %287, %288 : vector<8x256xf32>
    %290 = arith.addf %286, %289 : vector<8x256xf32>
    %c6_133 = arith.constant 6 : index
    %c0_134 = arith.constant 0 : index
    %291 = vector.load %arg5[%c6_133, %c0_134] : memref<7x256xf32, #tpu.memory_space<vmem>>, vector<1x256xf32>
    %292 = vector.broadcast %291 : vector<1x256xf32> to vector<8x256xf32>
    %293 = arith.mulf %290, %292 : vector<8x256xf32>
    %294 = arith.addf %261, %293 : vector<8x256xf32>
    %c0_135 = arith.constant 0 : index
    %c0_136 = arith.constant 0 : index
    %295 = vector.load %arg15[%c0_135, %c0_136] : memref<8x256xf32, #tpu.memory_space<vmem>>, vector<8x256xf32>
    tpu.vector_store %arg15[%c0_135, %c0_136], %294 {strides = array<i32>} : memref<8x256xf32, #tpu.memory_space<vmem>>, vector<8x256xf32>,
    %c0_137 = arith.constant 0 : index
    %c0_138 = arith.constant 0 : index
    %296 = vector.load %arg6[%c0_137, %c0_138] : memref<8x8xf32, #tpu.memory_space<vmem>>, vector<8x8xf32>
    %c0_139 = arith.constant 0 : index
    %c0_140 = arith.constant 0 : index
    %297 = vector.load %arg15[%c0_139, %c0_140] : memref<8x256xf32, #tpu.memory_space<vmem>>, vector<8x256xf32>
    %cst_141 = arith.constant dense<0.000000e+00> : vector<8x256xf32>
    %298 = tpu.matmul %296, %297, %cst_141 {dimension_numbers = #tpu.dot_dimension_numbers<[1], [0], [0], [1], [0, 0, 1, 1], [], []>} : vector<8x8xf32>, vector<8x256xf32>, vector<8x256xf32> -> vector<8x256xf32>
    %c0_142 = arith.constant 0 : index
    %c0_143 = arith.constant 0 : index
    %299 = vector.load %arg7[%c0_142, %c0_143] : memref<8x1xf32, #tpu.memory_space<vmem>>, vector<8x1xf32>
    %300 = vector.broadcast %299 : vector<8x1xf32> to vector<8x256xf32>
    %301 = arith.addf %298, %300 : vector<8x256xf32>
    %cst_144 = arith.constant 0.000000e+00 : f32
    %302 = vector.broadcast %cst_144 : f32 to vector<8x256xf32>
    %303 = arith.maximumf %301, %302 : vector<8x256xf32>
    %c0_145 = arith.constant 0 : index
    %c0_146 = arith.constant 0 : index
    %304 = vector.load %arg8[%c0_145, %c0_146] : memref<40x8xf32, #tpu.memory_space<vmem>>, vector<40x8xf32>
    %cst_147 = arith.constant dense<0.000000e+00> : vector<40x256xf32>
    %305 = tpu.matmul %304, %303, %cst_147 {dimension_numbers = #tpu.dot_dimension_numbers<[1], [0], [0], [1], [0, 0, 1, 1], [], []>} : vector<40x8xf32>, vector<8x256xf32>, vector<40x256xf32> -> vector<40x256xf32>
    %c0_148 = arith.constant 0 : index
    %c0_149 = arith.constant 0 : index
    %306 = vector.load %arg9[%c0_148, %c0_149] : memref<40x1xf32, #tpu.memory_space<vmem>>, vector<40x1xf32>
    %307 = vector.broadcast %306 : vector<40x1xf32> to vector<40x256xf32>
    %308 = arith.addf %305, %307 : vector<40x256xf32>
    %c0_150 = arith.constant 0 : index
    %c0_151 = arith.constant 0 : index
    %309 = vector.load %arg10[%c0_150, %c0_151] : memref<40x40xf32, #tpu.memory_space<vmem>>, vector<40x40xf32>
    %cst_152 = arith.constant dense<0.000000e+00> : vector<40xf32>
    %310 = vector.multi_reduction <add>, %308, %cst_152 [1] : vector<40x256xf32> to vector<40xf32>
    %311 = vector.shape_cast %310 : vector<40xf32> to vector<40x1xf32>
    %cst_153 = arith.constant dense<0.000000e+00> : vector<40x1xf32>
    %312 = tpu.matmul %309, %311, %cst_153 {dimension_numbers = #tpu.dot_dimension_numbers<[1], [0], [0], [1], [0, 0, 1, 1], [], []>} : vector<40x40xf32>, vector<40x1xf32>, vector<40x1xf32> -> vector<40x1xf32>
    %cst_154 = arith.constant 2.304000e+03 : f32
    %313 = vector.broadcast %cst_154 : f32 to vector<40x1xf32>
    %314 = arith.divf %312, %313 : vector<40x1xf32>
    %315 = vector.broadcast %314 : vector<40x1xf32> to vector<40x256xf32>
    %316 = arith.subf %308, %315 : vector<40x256xf32>
    %317 = arith.mulf %316, %316 : vector<40x256xf32>
    %cst_155 = arith.constant dense<0.000000e+00> : vector<40xf32>
    %318 = vector.multi_reduction <add>, %317, %cst_155 [1] : vector<40x256xf32> to vector<40xf32>
    %319 = vector.shape_cast %318 : vector<40xf32> to vector<40x1xf32>
    %cst_156 = arith.constant dense<0.000000e+00> : vector<40x1xf32>
    %320 = tpu.matmul %309, %319, %cst_156 {dimension_numbers = #tpu.dot_dimension_numbers<[1], [0], [0], [1], [0, 0, 1, 1], [], []>} : vector<40x40xf32>, vector<40x1xf32>, vector<40x1xf32> -> vector<40x1xf32>
    %cst_157 = arith.constant 2.304000e+03 : f32
    %321 = vector.broadcast %cst_157 : f32 to vector<40x1xf32>
    %322 = arith.divf %320, %321 : vector<40x1xf32>
    %cst_158 = arith.constant 9.99999974E-6 : f32
    %323 = vector.broadcast %cst_158 : f32 to vector<40x1xf32>
    %324 = arith.addf %322, %323 : vector<40x1xf32>
    %325 = math.rsqrt %324 : vector<40x1xf32>
    %c0_159 = arith.constant 0 : index
    %c0_160 = arith.constant 0 : index
    %326 = vector.load %arg11[%c0_159, %c0_160] : memref<40x1xf32, #tpu.memory_space<vmem>>, vector<40x1xf32>
    %327 = arith.mulf %325, %326 : vector<40x1xf32>
    %328 = vector.broadcast %327 : vector<40x1xf32> to vector<40x256xf32>
    %329 = arith.mulf %316, %328 : vector<40x256xf32>
    %c0_161 = arith.constant 0 : index
    %c0_162 = arith.constant 0 : index
    %330 = vector.load %arg12[%c0_161, %c0_162] : memref<40x1xf32, #tpu.memory_space<vmem>>, vector<40x1xf32>
    %331 = vector.broadcast %330 : vector<40x1xf32> to vector<40x256xf32>
    %332 = arith.addf %329, %331 : vector<40x256xf32>
    %c0_163 = arith.constant 0 : index
    %c0_164 = arith.constant 0 : index
    %c0_165 = arith.constant 0 : index
    %333 = vector.load %arg13[%c0_163, %c0_164, %c0_165] : memref<1x40x256xf32, #tpu.memory_space<vmem>>, vector<1x40x256xf32>
    %334 = vector.shape_cast %333 : vector<1x40x256xf32> to vector<40x256xf32>
    %335 = vector.shape_cast %332 : vector<40x256xf32> to vector<1x40x256xf32>
    tpu.vector_store %arg13[%c0_163, %c0_164, %c0_165], %335 {strides = array<i32>} : memref<1x40x256xf32, #tpu.memory_space<vmem>>, vector<1x40x256xf32>,
    return
  }
  func.func @transform_0(%arg0: i32) -> (i32, i32, i32) {
    %c0_i32 = arith.constant 0 : i32
    %c0_i32_0 = arith.constant 0 : i32
    %c0_i32_1 = arith.constant 0 : i32
    return %arg0, %c0_i32, %c0_i32_0 : i32, i32, i32
  }
  func.func @transform_1(%arg0: i32) -> (i32, i32) {
    %c0_i32 = arith.constant 0 : i32
    %c0_i32_0 = arith.constant 0 : i32
    %c0_i32_1 = arith.constant 0 : i32
    return %c0_i32, %c0_i32_0 : i32, i32
  }
  func.func @transform_2(%arg0: i32) -> (i32, i32) {
    %c0_i32 = arith.constant 0 : i32
    %c0_i32_0 = arith.constant 0 : i32
    %c0_i32_1 = arith.constant 0 : i32
    return %c0_i32, %c0_i32_0 : i32, i32
  }
  func.func @transform_3(%arg0: i32) -> (i32, i32) {
    %c0_i32 = arith.constant 0 : i32
    %c0_i32_0 = arith.constant 0 : i32
    %c0_i32_1 = arith.constant 0 : i32
    return %c0_i32, %c0_i32_0 : i32, i32
  }
  func.func @transform_4(%arg0: i32) -> (i32, i32) {
    %c0_i32 = arith.constant 0 : i32
    %c0_i32_0 = arith.constant 0 : i32
    %c0_i32_1 = arith.constant 0 : i32
    return %c0_i32, %c0_i32_0 : i32, i32
  }
  func.func @transform_5(%arg0: i32) -> (i32, i32) {
    %c0_i32 = arith.constant 0 : i32
    %c0_i32_0 = arith.constant 0 : i32
    %c0_i32_1 = arith.constant 0 : i32
    return %c0_i32, %c0_i32_0 : i32, i32
  }
  func.func @transform_6(%arg0: i32) -> (i32, i32) {
    %c0_i32 = arith.constant 0 : i32
    %c0_i32_0 = arith.constant 0 : i32
    %c0_i32_1 = arith.constant 0 : i32
    return %c0_i32, %c0_i32_0 : i32, i32
  }
  func.func @transform_7(%arg0: i32) -> (i32, i32) {
    %c0_i32 = arith.constant 0 : i32
    %c0_i32_0 = arith.constant 0 : i32
    %c0_i32_1 = arith.constant 0 : i32
    return %c0_i32, %c0_i32_0 : i32, i32
  }
  func.func @transform_8(%arg0: i32) -> (i32, i32) {
    %c0_i32 = arith.constant 0 : i32
    %c0_i32_0 = arith.constant 0 : i32
    %c0_i32_1 = arith.constant 0 : i32
    return %c0_i32, %c0_i32_0 : i32, i32
  }
  func.func @transform_9(%arg0: i32) -> (i32, i32) {
    %c0_i32 = arith.constant 0 : i32
    %c0_i32_0 = arith.constant 0 : i32
    %c0_i32_1 = arith.constant 0 : i32
    return %c0_i32, %c0_i32_0 : i32, i32
  }
  func.func @transform_10(%arg0: i32) -> (i32, i32) {
    %c0_i32 = arith.constant 0 : i32
    %c0_i32_0 = arith.constant 0 : i32
    %c0_i32_1 = arith.constant 0 : i32
    return %c0_i32, %c0_i32_0 : i32, i32
  }
  func.func @transform_11(%arg0: i32) -> (i32, i32) {
    %c0_i32 = arith.constant 0 : i32
    %c0_i32_0 = arith.constant 0 : i32
    %c0_i32_1 = arith.constant 0 : i32
    return %c0_i32, %c0_i32_0 : i32, i32
  }
  func.func @transform_12(%arg0: i32) -> (i32, i32, i32) {
    %c0_i32 = arith.constant 0 : i32
    %c0_i32_0 = arith.constant 0 : i32
    %c0_i32_1 = arith.constant 0 : i32
    return %arg0, %c0_i32, %c0_i32_0 : i32, i32, i32
  }
}

</mosaic_0001>

<bundles_post_ra>
// kernel: tpu_custom_call.1
= control target key start
LH: loop header
LB: loop body
LE: loop exit
PB: predicated region body
PF: predicated region fallthrough
CT: control target
= control target key end

     0   :  { %s4519_s0 = inlined_call_operand.vmem [shape: f32[2,8,256], index: 0, kind: input, shape index: {}]   ;;  %s4520_s1 = inlined_call_operand.vmem [shape: f32[8,8], index: 1, kind: input, shape index: {}]   ;;  %s4521_s2 = inlined_call_operand.vmem [shape: f32[8,1], index: 2, kind: input, shape index: {}]   ;;  %s4522_s3 = inlined_call_operand.vmem [shape: f32[8,49], index: 3, kind: input, shape index: {}]   ;;  %s4523_s4 = inlined_call_operand.vmem [shape: f32[7,256], index: 4, kind: input, shape index: {}]   ;;  %s4524_s5 = inlined_call_operand.vmem [shape: f32[8,8], index: 5, kind: input, shape index: {}]   ;;  %s4525_s6 = inlined_call_operand.vmem [shape: f32[8,1], index: 6, kind: input, shape index: {}]   ;;  %s4526_s7 = inlined_call_operand.vmem [shape: f32[40,8], index: 7, kind: input, shape index: {}]   ;;  %s4527_s8 = inlined_call_operand.vmem [shape: f32[40,1], index: 8, kind: input, shape index: {}]   ;;  %s4528_s9 = inlined_call_operand.vmem [shape: f32[40,40], index: 9, kind: input, shape index: {}]   ;;  %s4529_s10 = inlined_call_operand.vmem [shape: f32[40,1], index: 10, kind: input, shape index: {}]   ;;  %s4530_s11 = inlined_call_operand.vmem [shape: f32[40,1], index: 11, kind: input, shape index: {}]   ;;  %s4531_s12 = inlined_call_operand.hbm [shape: f32[2,40,256], index: 12, kind: output, shape index: {}]  }
   0x1   :  { %4559 = sst [smem:[#allocation44_spill]] %s4519_s0 }
   0x2   :  { %4560 = sst [smem:[#allocation45_spill]] %s4520_s1 }
   0x3   :  { %17 = vsyncpa [#allocation5], 0 }
   0x4   :  { %19 = vsyncpa [#allocation5 + $0x1], 0  ;;  %s3056_s21 = smov 0   ;;  %s3058_s22 = smov 0  }
   0x5   :  { %s3060_s23 = smov 0   ;;  %s3062_s24 = smov 0  }
   0x6 LB: > { %s3077_s25 = sadd.s32 4294967295, %s2916_s24   ;;  %s2573_s26 = sadd.s32 4294967294, %s2916_s24   ;;  %s2916_s24 = sphi %s3062_s24, %s4642_s24   ;;  %s2912_s23 = sphi %s3060_s23, %s4641_s23   ;;  %s2908_s22 = sphi %s3058_s22, %s4640_s22   ;;  %s2904_s21 = sphi %s3056_s21, %s4639_s21  }
   0x7   : > { %s3081_s27 = sadd.s32 1, %s2916_s24   ;;  %s289_s28 = sadd.s32 1, %s2912_s23 }
   0x8   : > { %s286_s29 = ssub.s32 %s2916_s24, %s3081_s27  ;;  %p299_p0 = scmp.ne.s32.totalorder %s2912_s23, %s2908_s22 }
   0x9   : > { %p287_p1 = scmp.eq.s32.totalorder %s286_s29, 0  ;;  %p300_p2 = scmp.eq.s32.totalorder %s3077_s25, 1 }
   0xa   : > { %p305_p3 = scmp.ne.s32.totalorder %s2908_s22, %s2904_s21  ;;  %p306_p4 = scmp.eq.s32.totalorder %s2573_s26, 1 }
   0xb   : > { %s3092_s30 = scalar_select %p287_p1, %s2912_s23, %s289_s28  }
   0xc   : > { %p3094_p5 = por %p300_p2, %p299_p0  ;;  %p3098_p6 = por %p306_p4, %p305_p3 }
   0xd   : > { %p2576_p7 = scmp.ge.s32.totalorder %s2916_s24, 1  ;;  %p365_p8 = scmp.lt.s32.totalorder %s2916_s24, 3 }
   0xf   : > { %p366_p9 = pnand %p2576_p7, %p365_p8 }
  0x11   : > { %369 = sbr.rel (%p366_p9) target bundleno = 2227 (0x8b3), region = 68 }
  0x16   : > { %v3107_v0 = vld [vmem:[%s4522_s3] sm:$0xff]  ;;  %p407_p10 = scmp.lt.s32.totalorder %s3077_s25, 1  ;;  %v2918_v1 = vmov 15   ;;  %v2919_v2 = vmov 8   ;;  %v2920_v3 = vmov 0.0   ;;  %s4563_s0 = sld [smem:[#allocation44_spill]] }
  0x17   : > { %2792 = vset.pattern.permute.xlu1 %v2918_v1  ;;  %2791 = vset.pattern.permute.xlu0 %v2919_v2  ;;  %498 = vst [vmem:[#allocation2] sm:$0xff] %v2920_v3  ;;  %v2921_v4 = vmov 9   ;;  %v2922_v5 = vmov 16   ;;  %s4564_s1 = sld [smem:[#allocation45_spill]]  ;;  %vm421_vm0 = vcmask 64512   ;;  %v2923_v9 = vmov 22  }
  0x18   : > { %731 = vperm.xlu1 %2792, %v3107_v0   ;;  %707 = vperm.xlu0 %2791, %v3107_v0   ;;  %s408_s17 = scalar_select %p407_p10, %s3077_s25, 1  ;;  %v2924_v10 = vmov 23   ;;  %vm499_vm1 = vcmask 416768   ;;  %v2925_v11 = vmov 10   ;;  %v2926_v12 = vmov 36   ;;  %v415_v41 = vld [vmem:[%s4521_s2] sm:$0xff] }
  0x19   : > { %489 = vmatprep.mubr.f32.mxu0 %v2920_v3  ;;  %1951 = vmatprep.mubr.f32.mxu1 %v2920_v3  ;;  %500 = vst.msk [vmem:[#allocation2 + $0x18] sm:$0xff] %vm499_vm1, %v2920_v3  ;;  %v2927_v13 = vmov 29   ;;  %v2928_v14 = vmov 18   ;;  %v2929_v15 = vmov 17   ;;  %v2930_v16 = vmov 37   ;;  %s2970_s19 = smov 96  }
  0x1a   : > { %s2605_s18 = sshll.u32 %s408_s17, 4  ;;  %v2931_v17 = vmov 11   ;;  %v2932_v18 = vmov 19   ;;  %v2933_v19 = vmov 30   ;;  %v2934_v20 = vmov 38   ;;  %s2967_s17 = smov 112  }
  0x1b   : > { %v2935_v21 = vmov 24   ;;  %v2936_v22 = vmov 20   ;;  %v2937_v23 = vmov 12   ;;  %v2938_v24 = vmov 33   ;;  %s2971_s20 = smov 64   ;;  %s2973_s28 = smov 32  }
  0x1c   : > { %s411_s26 = scalar_lea.vmem %s4563_s0, %s2605_s18  ;;  %2793 = vset.pattern.permute.xlu1 %v2921_v4  ;;  %2795 = vset.pattern.permute.xlu0 %v2922_v5  ;;  %v2939_v25 = vmov 43   ;;  %v2940_v26 = vmov 40   ;;  %v2941_v27 = vmov 31   ;;  %v2942_v28 = vmov 41   ;;  %s2969_s18 = smov 80  }
  0x1d   : > { %v414_v6 = vld [vmem:[%s411_s26 + $0x8] sm:$0xff]  ;;  %v413_v7 = vld [vmem:[%s411_s26] sm:$0xff]  ;;  %902 = vperm.xlu1 %2793, %v3107_v0   ;;  %926 = vperm.xlu0 %2795, %v3107_v0   ;;  %v2943_v29 = vmov 25   ;;  %v2944_v30 = vmov 1   ;;  %v2945_v31 = vmov 13   ;;  %v2946_v32 = vmov 21  }
  0x1e   : > { %v412_v8 = vld [vmem:[%s4564_s1] sm:$0xff]  ;;  %455 = vmatprep.subr.mxu0 %v414_v6  ;;  %v2947_v33 = vmov 44   ;;  %v2948_v34 = vmov 4   ;;  %v2949_v35 = vmov 32   ;;  %v2950_v36 = vmov 5   ;;  %s2972_s26 = smov 48  }
  0x1f   : > { %456 = vmatpush1.msra.mxu0 %v413_v7  ;;  %v2951_v37 = vmov 26   ;;  %v2952_v38 = vmov 42   ;;  %v2953_v39 = vmov 45   ;;  %v2954_v40 = vmov 6   ;;  %s2974_s16 = smov 78   ;;  %s2976_s15 = smov 81  }
  0x20   : > { %2579 = vmatmul.mubr.msk.f32.vlgmr.msra.gmra.mxu0 %vm421_vm0, %v412_v8  ;;  %v2955_v42 = vmov 39   ;;  %v2956_v43 = vmov 0   ;;  %v2957_v44 = vmov 27   ;;  %v2958_v45 = vmov 46   ;;  %s2985_s29 = smov 122   ;;  %s404_s0 = sand.u32 1, %s2908_s22  }
  0x21   : > { %2794 = vset.pattern.permute.xlu1 %v2923_v9  ;;  %2798 = vset.pattern.permute.xlu0 %v2924_v10  ;;  %v2959_v46 = vmov 34   ;;  %v2960_v47 = vmov 47   ;;  %v2961_v48 = vmov 48   ;;  %v2962_v49 = vmov 7  }
  0x22   : > { %755 = vperm.xlu1 %2794, %v3107_v0   ;;  %950 = vperm.xlu0 %2798, %v3107_v0   ;;  %v2963_v52 = vmov 14   ;;  %v2964_v55 = vmov 2   ;;  %v2965_v58 = vmov 3   ;;  %v2966_v61 = vmov 28  }
  0x23   : > { %2074 = vmatprep.mubr.f32.mxu0 %v2920_v3  ;;  %v2968_v3 = vmov 35   ;;  %vm534_vm2 = vcmask 916480   ;;  %vm559_vm3 = vcmask 785408   ;;  %vm584_vm4 = vcmask 654336  }
  0x24   : > { %vm612_vm5 = vcmask 523264   ;;  %vm637_vm6 = vcmask 392192   ;;  %vm662_vm7 = vcmask 261120   ;;  %vm865_vm8 = vcmask 637952  }
  0x25   : > { %vm1060_vm9 = vcmask 646144   ;;  %vm1444_vm10 = vcmask 662528   ;;  %vm1639_vm11 = vcmask 670720   ;;  %vm1834_vm12 = vcmask 678912  }
  0x26   : > { %2796 = vset.pattern.permute.xlu1 %v2925_v11  ;;  %2801 = vset.pattern.permute.xlu0 %v2926_v12  ;;  %vm685_vm13 = vcmask 629760   ;;  %vm882_vm14 = vcmask 1039360   ;;  %vm1077_vm15 = vcmask 1031168  }
  0x27   : > { %1097 = vperm.xlu1 %2796, %v3107_v0   ;;  %803 = vperm.xlu0 %2801, %v3107_v0  }
  0x2b   : > { %2797 = vset.pattern.permute.xlu1 %v2927_v13  ;;  %2804 = vset.pattern.permute.xlu0 %v2928_v14  ;;  %v3213_v13 = vld [vmem:[#allocation2 + $0x18] sm:$0xff] }
  0x2c   : > { %779 = vperm.xlu1 %2797, %v3107_v0   ;;  %1310 = vperm.xlu0 %2804, %v3107_v0  }
  0x30   : > { %2799 = vset.pattern.permute.xlu1 %v2929_v15  ;;  %2807 = vset.pattern.permute.xlu0 %v2930_v16 }
  0x31   : > { %1121 = vperm.xlu1 %2799, %v3107_v0   ;;  %998 = vperm.xlu0 %2807, %v3107_v0  }
  0x35   : > { %2800 = vset.pattern.permute.xlu1 %v2931_v17  ;;  %2810 = vset.pattern.permute.xlu0 %v2932_v18 }
  0x36   : > { %1286 = vperm.xlu1 %2800, %v3107_v0   ;;  %1505 = vperm.xlu0 %2810, %v3107_v0  }
  0x3a   : > { %2802 = vset.pattern.permute.xlu1 %v2933_v19  ;;  %2813 = vset.pattern.permute.xlu0 %v2934_v20 }
  0x3b   : > { %974 = vperm.xlu1 %2802, %v3107_v0   ;;  %1188 = vperm.xlu0 %2813, %v3107_v0  }
  0x3f   : > { %2803 = vset.pattern.permute.xlu1 %v2935_v21  ;;  %2816 = vset.pattern.permute.xlu0 %v2936_v22 }
  0x40   : > { %1145 = vperm.xlu1 %2803, %v3107_v0   ;;  %1700 = vperm.xlu0 %2816, %v3107_v0  }
  0x44   : > { %2805 = vset.pattern.permute.xlu1 %v2937_v23  ;;  %2819 = vset.pattern.permute.xlu0 %v2938_v24 }
  0x45   : > { %1481 = vperm.xlu1 %2805, %v3107_v0   ;;  %1553 = vperm.xlu0 %2819, %v3107_v0  }
  0x49   : > { %2806 = vset.pattern.permute.xlu1 %v2939_v25  ;;  %2822 = vset.pattern.permute.xlu0 %v2940_v26 }
  0x4a   : > { %827 = vperm.xlu1 %2806, %v3107_v0   ;;  %1577 = vperm.xlu0 %2822, %v3107_v0  }
  0x4e   : > { %2808 = vset.pattern.permute.xlu1 %v2941_v27  ;;  %2825 = vset.pattern.permute.xlu0 %v2942_v28 }
  0x4f   : > { %1164 = vperm.xlu1 %2808, %v3107_v0   ;;  %1772 = vperm.xlu0 %2825, %v3107_v0  }
  0x53   : > { %2809 = vset.pattern.permute.xlu1 %v2943_v29  ;;  %2828 = vset.pattern.permute.xlu0 %v2944_v30 }
  0x54   : > { %1334 = vperm.xlu1 %2809, %v3107_v0   ;;  %697 = vperm.xlu0 %2828, %v3107_v0  }
  0x58   : > { %2811 = vset.pattern.permute.xlu1 %v2945_v31  ;;  %2831 = vset.pattern.permute.xlu0 %v2946_v32 }
  0x59   : > { %1676 = vperm.xlu1 %2811, %v3107_v0   ;;  %569 = vperm.xlu0 %2831, %v3107_v0  }
  0x5d   : > { %2812 = vset.pattern.permute.xlu1 %v2947_v33  ;;  %2834 = vset.pattern.permute.xlu0 %v2948_v34 }
  0x5e   : > { %1022 = vperm.xlu1 %2812, %v3107_v0   ;;  %1276 = vperm.xlu0 %2834, %v3107_v0  }
  0x62   : > { %2814 = vset.pattern.permute.xlu1 %v2949_v35  ;;  %2836 = vset.pattern.permute.xlu0 %v2950_v36 }
  0x63   : > { %1358 = vperm.xlu1 %2814, %v3107_v0   ;;  %1471 = vperm.xlu0 %2836, %v3107_v0  }
  0x67   : > { %2815 = vset.pattern.permute.xlu1 %v2951_v37  ;;  %2837 = vset.pattern.permute.xlu0 %v2952_v38 }
  0x68   : > { %1529 = vperm.xlu1 %2815, %v3107_v0   ;;  %647 = vperm.xlu0 %2837, %v3107_v0  }
  0x6c   : > { %2817 = vset.pattern.permute.xlu1 %v2953_v39  ;;  %2838 = vset.pattern.permute.xlu0 %v2954_v40 }
  0x6d   : > { %1212 = vperm.xlu1 %2817, %v3107_v0   ;;  %1666 = vperm.xlu0 %2838, %v3107_v0  }
  0x71   : > { %2818 = vset.pattern.permute.xlu1 %v2955_v42  ;;  %2839 = vset.pattern.permute.xlu0 %v2956_v43 }
  0x72   : > { %1382 = vperm.xlu1 %2818, %v3107_v0   ;;  %418 = vperm.xlu0 %2839, %v415_v41  }
  0x76   : > { %2820 = vset.pattern.permute.xlu1 %v2957_v44 }
  0x77   : > { %1724 = vperm.xlu1 %2820, %v3107_v0  }
  0x7b   : > { %2821 = vset.pattern.permute.xlu1 %v2958_v45 }
  0x7c   : > { %1406 = vperm.xlu1 %2821, %v3107_v0  }
  0x80   : > { %2823 = vset.pattern.permute.xlu1 %v2959_v46 }
  0x81   : > { %1748 = vperm.xlu1 %2823, %v3107_v0  }
  0x85   : > { %2824 = vset.pattern.permute.xlu1 %v2960_v47 }
  0x86   : > { %1601 = vperm.xlu1 %2824, %v3107_v0  }
  0x8a   : > { %2826 = vset.pattern.permute.xlu1 %v2961_v48 }
  0x8b   : > { %1796 = vperm.xlu1 %2826, %v3107_v0  }
  0x8f   : > { %2827 = vset.pattern.permute.xlu1 %v2962_v49 }
  0x90   : > { %519 = vperm.xlu1 %2827, %v3107_v0  }
  0x93   : > { %v3165_v50 = vpop.permute.xlu0 %707  ;;  %v3167_v51 = vpop.permute.xlu1 %731 }
  0x94   : > { %2829 = vset.pattern.permute.xlu1 %v2963_v52  ;;  %v710_v4 = vmul.f32 0.0, %v3165_v50  ;;  %v734_v7 = vmul.f32 0.0, %v3167_v51 }
  0x95   : > { %544 = vperm.xlu1 %2829, %v3107_v0  }
  0x98   : > { %v3170_v53 = vpop.permute.xlu0 %926  ;;  %v3172_v54 = vpop.permute.xlu1 %902 }
  0x99   : > { %2830 = vset.pattern.permute.xlu1 %v2964_v55  ;;  %v929_v17 = vmul.f32 0.0, %v3170_v53 }
  0x9a   : > { %892 = vperm.xlu1 %2830, %v3107_v0  }
  0x9d   : > { %v3175_v56 = vpop.permute.xlu0 %950  ;;  %v3177_v57 = vpop.permute.xlu1 %755 }
  0x9e   : > { %2832 = vset.pattern.permute.xlu1 %v2965_v58  ;;  %v953_v1 = vmul.f32 0.0, %v3175_v56  ;;  %v758_v11 = vmul.f32 0.0, %v3177_v57 }
  0x9f   : > { %1087 = vperm.xlu1 %2832, %v3107_v0  }
  0xa2   : > { %v3180_v59 = vpop.permute.xlu1 %1097  ;;  %v3182_v60 = vpop.permute.xlu0 %803 }
  0xa3   : > { %2833 = vset.pattern.permute.xlu1 %v2966_v61  ;;  %v1100_v62 = vmul.f32 0.0, %v3180_v59  ;;  %v808_v25 = vmul.f32 %v3182_v60, %v3213_v13 }
  0xa4   : > { %597 = vperm.xlu1 %2833, %v3107_v0  }
  0xa5   : > { %1106 = vrot.lane.b32.xlu0 %v1100_v62, %s2967_s17 }
  0xa7   : > { %v3187_v63 = vpop.permute.xlu0 %1310  ;;  %v3190_v2 = vpop.permute.xlu1 %779 }
  0xa8   : > { %2835 = vset.pattern.permute.xlu1 %v2968_v3  ;;  %v784_v19 = vmul.f32 %v3190_v2, %v3213_v13  ;;  %v1313_v28 = vmul.f32 0.0, %v3187_v63 }
  0xa9   : > { %622 = vperm.xlu1 %2835, %v3107_v0   ;;  %959 = vrot.lane.b32.xlu0 %v953_v1, %s2969_s18  ;;  %v905_v0 = vmul.f32 0.0, %v3172_v54 }
  0xac   : > { %v3195_v5 = vpop.permute.xlu0 %998  ;;  %v3197_v6 = vpop.permute.xlu1 %1121 }
  0xad   : > { %716 = vrot.lane.b32.xlu1 %v710_v4, %s2967_s17  ;;  %v1124_v22 = vmul.f32 0.0, %v3197_v6 }
  0xae   : > { %2840 = vset.pattern.permute.xlu1 %v2956_v43 }
  0xb1   : > { %v3201_v8 = vpop.permute.xlu0 %1505  ;;  %740 = vrot.lane.b32.xlu1 %v734_v7, %s2970_s19  ;;  %v3205_v9 = vpop.permute.xlu1 %1286 }
  0xb2   : > { %v1289_v10 = vmul.f32 0.0, %v3205_v9 }
  0xb4   : > { %1295 = vrot.lane.b32.xlu0 %v1289_v10, %s2967_s17 }
  0xb5   : > { %911 = vrot.lane.b32.xlu1 %v905_v0, %s2967_s17 }
  0xb6   : > { %v3211_v12 = vpop.permute.xlu0 %1188  ;;  %v3215_v14 = vpop.permute.xlu1 %974 }
  0xb7   : > { %v979_v15 = vmul.f32 %v3215_v14, %v3213_v13 }
  0xb9   : > { %764 = vrot.lane.b32.xlu1 %v758_v11, %s2969_s18  ;;  %987 = vrot.lane.b32.xlu0 %v979_v15, %s2971_s20 }
  0xbb   : > { %v3221_v16 = vpop.permute.xlu0 %1700  ;;  %v3224_v18 = vpop.permute.xlu1 %1145 }
  0xbd   : > { %935 = vrot.lane.b32.xlu1 %v929_v17, %s2970_s19 }
  0xc0   : > { %v3229_v20 = vpop.permute.xlu0 %1553  ;;  %v3231_v21 = vpop.permute.xlu1 %1481 }
  0xc1   : > { %792 = vrot.lane.b32.xlu1 %v784_v19, %s2971_s20 }
  0xc5   : > { %v3235_v23 = vpop.permute.xlu0 %1577  ;;  %1130 = vrot.lane.b32.xlu1 %v1124_v22, %s2970_s19  ;;  %v3238_v24 = vpop.permute.xlu1 %827 }
  0xc9   : > { %816 = vrot.lane.b32.xlu1 %v808_v25, %s2972_s26 }
  0xca   : > { %v3243_v26 = vpop.permute.xlu0 %1772  ;;  %v3245_v27 = vpop.permute.xlu1 %1164 }
  0xcd   : > { %1319 = vrot.lane.b32.xlu1 %v1313_v28, %s2970_s19 }
  0xcf   : > { %v3249_v29 = vpop.permute.xlu0 %697  ;;  %v3251_v30 = vpop.permute.xlu1 %1334 }
  0xd4   : > { %v3253_v31 = vpop.permute.xlu0 %569  ;;  %v3255_v32 = vpop.permute.xlu1 %1676 }
  0xd9   : > { %v3257_v33 = vpop.permute.xlu0 %1276  ;;  %v3259_v34 = vpop.permute.xlu1 %1022 }
  0xda   : > { %4565 = vst [vmem:[#allocation7_spill] sm:$0xff] %v3257_v33 }
  0xde   : > { %v3261_v35 = vpop.permute.xlu0 %1471  ;;  %v3263_v36 = vpop.permute.xlu1 %1358 }
  0xdf   : > { %4566 = vst [vmem:[#allocation8_spill] sm:$0xff] %v3261_v35 }
  0xe0   : > { %v491_v39 = vpop.f32.mrf.mxu0 }
  0xe2   : > { %v493_v42 = vpop.f32.mrf.mxu0 }
  0xe3   : > { %v3265_v37 = vpop.permute.xlu0 %647  ;;  %v3267_v38 = vpop.permute.xlu1 %1529 }
  0xe8   : > { %v3269_v40 = vpop.permute.xlu0 %1666  ;;  %v3271_v41 = vpop.permute.xlu1 %1212 }
  0xe9   : > { %4567 = vst [vmem:[#allocation9_spill] sm:$0xff] %v3269_v40 }
  0xed   : > { %v419_v43 = vpop.permute.xlu0 %418  ;;  %v3273_v44 = vpop.permute.xlu1 %1382 }
  0xee   : > { %v492_v45 = vadd.f32 %v491_v39, %v419_v43  ;;  %v494_v46 = vadd.f32 %v493_v42, %v419_v43 }
  0xf0   : > { %v3275_v47 = vmax.f32 %v492_v45, 0.0  ;;  %v3277_v48 = vmax.f32 %v494_v46, 0.0 }
  0xf2   : > { %501 = vst [vmem:[#allocation2 + $0x8] sm:$0xff] %v3275_v47  ;;  %502 = vst [vmem:[#allocation2 + $0x10] sm:$0xff] %v3277_v48  ;;  %v3281_v49 = vpop.permute.xlu1 %1724  ;;  %v759_v52 = vmul.f32 %v3177_v57, %v3275_v47  ;;  %v711_v55 = vmul.f32 %v3165_v50, %v3275_v47  ;;  %v782_v58 = vmul.f32 %v3190_v2, %v3275_v47 }
  0xf3   : > { %v735_v61 = vmul.f32 %v3167_v51, %v3275_v47  ;;  %v806_v1 = vmul.f32 %v3182_v60, %v3275_v47  ;;  %v906_v3 = vmul.f32 %v3172_v54, %v3275_v47  ;;  %v1148_v7 = vmul.f32 %v3224_v18, %v3275_v47 }
  0xf4   : > { %766 = vrot.lane.b32.xlu1 %v759_v52, %s2969_s18  ;;  %718 = vrot.lane.b32.xlu0 %v711_v55, %s2967_s17  ;;  %v930_v0 = vmul.f32 %v3170_v53, %v3275_v47  ;;  %v1314_v11 = vmul.f32 %v3187_v63, %v3275_v47  ;;  %v1101_v15 = vmul.f32 %v3180_v59, %v3275_v47 }
  0xf5   : > { %v1485_v17 = vmul.f32 %v3231_v21, %v3275_v47  ;;  %v954_v19 = vmul.f32 %v3175_v56, %v3275_v47  ;;  %v712_v25 = vmul.f32 %v3165_v50, %v3277_v48  ;;  %v1125_v28 = vmul.f32 %v3197_v6, %v3275_v47 }
  0xf6   : > { %v736_v42 = vmul.f32 %v3167_v51, %v3277_v48  ;;  %v1290_v43 = vmul.f32 %v3205_v9, %v3275_v47  ;;  %v907_v50 = vmul.f32 %v3172_v54, %v3277_v48  ;;  %v977_v45 = vmul.f32 %v3215_v14, %v3275_v47 }
  0xf7   : > { %v3293_v62 = vpop.permute.xlu1 %1406  ;;  %v760_v51 = vmul.f32 %v3177_v57, %v3277_v48  ;;  %v783_v52 = vmul.f32 %v3190_v2, %v3277_v48  ;;  %v931_v55 = vmul.f32 %v3170_v53, %v3277_v48  ;;  %v1102_v57 = vmul.f32 %v3180_v59, %v3277_v48 }
  0xf8   : > { %788 = vrot.lane.b32.xlu1 %v782_v58, %s2971_s20  ;;  %742 = vrot.lane.b32.xlu0 %v735_v61, %s2970_s19  ;;  %v807_v58 = vmul.f32 %v3182_v60, %v3277_v48  ;;  %v1149_v2 = vmul.f32 %v3224_v18, %v3277_v48  ;;  %v955_v53 = vmul.f32 %v3175_v56, %v3277_v48 }
  0xf9   : > { %v1315_v60 = vmul.f32 %v3187_v63, %v3277_v48  ;;  %v1126_v18 = vmul.f32 %v3197_v6, %v3277_v48  ;;  %v1291_v56 = vmul.f32 %v3205_v9, %v3277_v48  ;;  %v1484_v63 = vmul.f32 0.0, %v3231_v21 }
  0xfa   : > { %v978_v6 = vmul.f32 %v3215_v14, %v3277_v48  ;;  %v832_v14 = vmul.f32 %v3238_v24, %v3213_v13 }
  0xfc   : > { %v3301_v4 = vpop.permute.xlu1 %1748  ;;  %812 = vrot.lane.b32.xlu1 %v806_v1, %s2972_s26  ;;  %913 = vrot.lane.b32.xlu0 %v906_v3, %s2967_s17  ;;  %v1486_v1 = vmul.f32 %v3231_v21, %v3277_v48  ;;  %v830_v21 = vmul.f32 %v3238_v24, %v3275_v47 }
 0x100   : > { %1152 = vrot.lane.b32.xlu1 %v1148_v7, %s2969_s18  ;;  %937 = vrot.lane.b32.xlu0 %v930_v0, %s2970_s19  ;;  %v831_v7 = vmul.f32 %v3238_v24, %v3277_v48  ;;  %v1001_v0 = vmul.f32 %v3195_v5, %v3275_v47 }
 0x101   : > { %v3311_v10 = vpop.permute.xlu1 %1601 }
 0x104   : > { %1321 = vrot.lane.b32.xlu1 %v1314_v11, %s2970_s19  ;;  %1108 = vrot.lane.b32.xlu0 %v1101_v15, %s2967_s17  ;;  %v1003_v11 = vmul.f32 %v3195_v5, %v3213_v13 }
 0x106   : > { %v3323_v22 = vpop.permute.xlu1 %1796 }
 0x108   : > { %1492 = vrot.lane.b32.xlu1 %v1485_v17, %s2967_s17  ;;  %961 = vrot.lane.b32.xlu0 %v954_v19, %s2969_s18  ;;  %v1002_v17 = vmul.f32 %v3195_v5, %v3277_v48  ;;  %v1168_v19 = vmul.f32 %v3245_v27, %v3277_v48  ;;  %v1169_v5 = vmul.f32 %v3245_v27, %v3213_v13 }
 0x10b   : > { %v3333_v39 = vpop.permute.xlu1 %519 }
 0x10c   : > { %720 = vrot.lane.b32.xlu1 %v712_v25, %s2967_s17  ;;  %1132 = vrot.lane.b32.xlu0 %v1125_v28, %s2970_s19  ;;  %v1167_v25 = vmul.f32 %v3245_v27, %v3275_v47  ;;  %v1337_v28 = vmul.f32 %v3251_v30, %v3275_v47 }
 0x110   : > { %744 = vrot.lane.b32.xlu1 %v736_v42, %s2970_s19  ;;  %1297 = vrot.lane.b32.xlu0 %v1290_v43, %s2967_s17  ;;  %v3345_v46 = vpop.permute.xlu1 %544  ;;  %v1339_v42 = vmul.f32 %v3251_v30, %v3213_v13 }
 0x114   : > { %915 = vrot.lane.b32.xlu1 %v907_v50, %s2967_s17  ;;  %983 = vrot.lane.b32.xlu0 %v977_v45, %s2971_s20  ;;  %v673_v50 = vlaneseq  ;;  %v1338_v45 = vmul.f32 %v3251_v30, %v3277_v48 }
 0x115   : > { %v3355_v54 = vpop.permute.xlu1 %892 }
 0x116   : > { %v674_v27 = vshrl.u32 %v673_v50, 7 }
 0x118   : > { %768 = vrot.lane.b32.xlu1 %v760_v51, %s2969_s18  ;;  %790 = vrot.lane.b32.xlu0 %v783_v52, %s2971_s20  ;;  %v1510_v51 = vmul.f32 %v3201_v8, %v3277_v48  ;;  %v3450_v30 = vsub.s32 1, %v674_v27 }
 0x11a   : > { %v3367_v61 = vpop.permute.xlu1 %1087 }
 0x11c   : > { %939 = vrot.lane.b32.xlu1 %v931_v55, %s2970_s19  ;;  %814 = vrot.lane.b32.xlu0 %v807_v58, %s2972_s26  ;;  %v1509_v55 = vmul.f32 %v3201_v8, %v3275_v47  ;;  %v1681_v58 = vmul.f32 %v3255_v32, %v3277_v48 }
 0x11f   : > { %v3377_v59 = vpop.permute.xlu1 %597 }
 0x120   : > { %1110 = vrot.lane.b32.xlu1 %v1102_v57, %s2967_s17  ;;  %1154 = vrot.lane.b32.xlu0 %v1149_v2, %s2969_s18  ;;  %v2580_v57 = vld [vmem:[%s4523_s4 + $0x1] ss:$8 sm:$0x3]  ;;  %v1680_v2 = vmul.f32 %v3255_v32, %v3275_v47 }
 0x124   : > { %963 = vrot.lane.b32.xlu1 %v955_v53, %s2969_s18  ;;  %1323 = vrot.lane.b32.xlu0 %v1315_v60, %s2970_s19  ;;  %v3388_v3 = vpop.permute.xlu1 %622  ;;  %v1679_v53 = vmul.f32 0.0, %v3255_v32 }
 0x128   : > { %1134 = vrot.lane.b32.xlu1 %v1126_v18, %s2970_s19  ;;  %1494 = vrot.lane.b32.xlu0 %v1486_v1, %s2967_s17  ;;  %v3398_v9 = vpop.permute.xlu1 %716  ;;  %v3462_v18 = vsub.s32 0, %v674_v27  ;;  %v860_v1 = vrot.slane %v2580_v57, %v3450_v30  ;;  %v1534_v27 = vmul.f32 %v3267_v38, %v3213_v13 }
 0x12c   : > { %1299 = vrot.lane.b32.xlu1 %v1291_v56, %s2967_s17  ;;  %1490 = vrot.lane.b32.xlu0 %v1484_v63, %s2967_s17  ;;  %v3410_v15 = vpop.permute.xlu1 %740  ;;  %v1508_v56 = vmul.f32 0.0, %v3201_v8  ;;  %v3466_v63 = vpop.permute.xlu0 %1106  ;;  %v1025_v8 = vmul.f32 %v3259_v34, %v3275_v47 }
 0x12d   : > { %4568 = vst [vmem:[#allocation10_spill] sm:$0xff] %v3466_v63 }
 0x130   : > { %985 = vrot.lane.b32.xlu1 %v978_v6, %s2971_s20  ;;  %838 = vrot.lane.b32.xlu0 %v831_v7, %s2973_s28  ;;  %v3420_v24 = vpop.permute.xlu1 %911  ;;  %v856_v6 = vrot.slane %v2580_v57, %v3462_v18  ;;  %v1026_v7 = vmul.f32 %v3259_v34, %v3277_v48  ;;  %v2581_v57 = vld [vmem:[%s4523_s4 + $0x2] ss:$8 sm:$0x3] }
 0x134   : > { %836 = vrot.lane.b32.xlu1 %v830_v21, %s2973_s28  ;;  %1007 = vrot.lane.b32.xlu0 %v1001_v0, %s2972_s26  ;;  %v3432_v43 = vpop.permute.xlu1 %764  ;;  %v3474_v21 = vpop.permute.xlu0 %959  ;;  %v1191_v0 = vmul.f32 %v3211_v12, %v3275_v47 }
 0x138   : > { %840 = vrot.lane.b32.xlu1 %v832_v14, %s2973_s28  ;;  %1011 = vrot.lane.b32.xlu0 %v1003_v11, %s2972_s26  ;;  %v3442_v52 = vpop.permute.xlu1 %935  ;;  %v3483_v11 = vpop.permute.xlu0 %1295 }
 0x139   : > { %4570 = vst [vmem:[#allocation12_spill] sm:$0xff] %v3483_v11 }
 0x13c   : > { %1009 = vrot.lane.b32.xlu1 %v1002_v17, %s2972_s26  ;;  %1175 = vrot.lane.b32.xlu0 %v1168_v19, %s2971_s20  ;;  %v3458_v60 = vpop.permute.xlu1 %792  ;;  %v1193_v17 = vmul.f32 %v3211_v12, %v3213_v13  ;;  %v1027_v19 = vmul.f32 %v3259_v34, %v3213_v13 }
 0x140   : > { %1173 = vrot.lane.b32.xlu1 %v1167_v25, %s2971_s20  ;;  %1343 = vrot.lane.b32.xlu0 %v1337_v28, %s2969_s18  ;;  %v3470_v32 = vpop.permute.xlu1 %1130  ;;  %v3495_v28 = vpop.permute.xlu0 %987 }
 0x141   : > { %4569 = vst [vmem:[#allocation11_spill] sm:$0xff] %v3470_v32  ;;  %v1776_v32 = vmul.f32 %v3243_v26, %v3277_v48 }
 0x144   : > { %1177 = vrot.lane.b32.xlu1 %v1169_v5, %s2971_s20  ;;  %1347 = vrot.lane.b32.xlu0 %v1339_v42, %s2969_s18  ;;  %v3481_v14 = vpop.permute.xlu1 %816  ;;  %v1192_v5 = vmul.f32 %v3211_v12, %v3277_v48  ;;  %v1362_v42 = vmul.f32 %v3263_v36, %v3277_v48  ;;  %v1363_v12 = vmul.f32 %v3263_v36, %v3213_v13 }
 0x148   : > { %1345 = vrot.lane.b32.xlu1 %v1338_v45, %s2969_s18  ;;  %1518 = vrot.lane.b32.xlu0 %v1510_v51, %s2970_s19  ;;  %v3493_v25 = vpop.permute.xlu1 %1319  ;;  %v1361_v45 = vmul.f32 %v3263_v36, %v3275_v47  ;;  %v1532_v51 = vmul.f32 %v3267_v38, %v3275_v47  ;;  %v1533_v36 = vmul.f32 %v3267_v38, %v3277_v48  ;;  %v1703_v38 = vmul.f32 0.0, %v3221_v16 }
 0x149   : > { %4571 = vst [vmem:[#allocation13_spill] sm:$0xff] %v3493_v25 }
 0x14c   : > { %1516 = vrot.lane.b32.xlu1 %v1509_v55, %s2970_s19  ;;  %1689 = vrot.lane.b32.xlu0 %v1681_v58, %s2967_s17 }
 0x150   : > { %1687 = vrot.lane.b32.xlu1 %v1680_v2, %s2967_s17  ;;  %1685 = vrot.lane.b32.xlu0 %v1679_v53, %s2967_s17 }
 0x154   : > { %1514 = vrot.lane.b32.xlu1 %v1508_v56, %s2970_s19  ;;  %863 = vrot.lane.b32.xlu0 %v860_v1, %s2974_s16  ;;  %v1705_v1 = vmul.f32 %v3221_v16, %v3277_v48  ;;  %v1051_v56 = vrot.slane %v2581_v57, %v3462_v18 }
 0x158   : > { %861 = vrot.lane.b32.xlu1 %v856_v6, %s2974_s16  ;;  %1033 = vrot.lane.b32.xlu0 %v1026_v7, %s2973_s28  ;;  %s2975_s16 = smov 79  }
 0x15c   : > { %1031 = vrot.lane.b32.xlu1 %v1025_v8, %s2973_s28  ;;  %1197 = vrot.lane.b32.xlu0 %v1191_v0, %s2972_s26  ;;  %v1704_v8 = vmul.f32 %v3221_v16, %v3275_v47  ;;  %v1386_v16 = vmul.f32 %v3273_v44, %v3277_v48 }
 0x160   : > { %1035 = vrot.lane.b32.xlu1 %v1027_v19, %s2973_s28  ;;  %1201 = vrot.lane.b32.xlu0 %v1193_v17, %s2972_s26  ;;  %v1215_v19 = vmul.f32 %v3271_v41, %v3275_v47 }
 0x164   : > { %1199 = vrot.lane.b32.xlu1 %v1192_v5, %s2972_s26  ;;  %1369 = vrot.lane.b32.xlu0 %v1362_v42, %s2971_s20  ;;  %v1055_v5 = vrot.slane %v2581_v57, %v3450_v30  ;;  %v1217_v42 = vmul.f32 %v3271_v41, %v3213_v13  ;;  %v1216_v57 = vmul.f32 %v3271_v41, %v3277_v48 }
 0x165   : > { %v1558_v41 = vmul.f32 %v3229_v20, %v3213_v13 }
 0x166   : > { %v3503_v50 = vpop.permute.xlu1 %766  ;;  %v3505_v34 = vpop.permute.xlu0 %718 }
 0x168   : > { %1367 = vrot.lane.b32.xlu1 %v1361_v45, %s2971_s20  ;;  %1538 = vrot.lane.b32.xlu0 %v1532_v51, %s2969_s18 }
 0x16a   : > { %v3517_v55 = vpop.permute.xlu1 %788  ;;  %v3519_v58 = vpop.permute.xlu0 %742 }
 0x16c   : > { %1371 = vrot.lane.b32.xlu1 %v1363_v12, %s2971_s20  ;;  %1542 = vrot.lane.b32.xlu0 %v1534_v27, %s2969_s18 }
 0x16e   : > { %v3526_v2 = vpop.permute.xlu1 %812  ;;  %v3528_v53 = vpop.permute.xlu0 %913 }
 0x170   : > { %1540 = vrot.lane.b32.xlu1 %v1533_v36, %s2969_s18  ;;  %1713 = vrot.lane.b32.xlu0 %v1705_v1, %s2970_s19  ;;  %v1385_v36 = vmul.f32 %v3273_v44, %v3275_v47 }
 0x172   : > { %v3537_v6 = vpop.permute.xlu1 %1152  ;;  %v3539_v7 = vpop.permute.xlu0 %937 }
 0x173   : > { %4572 = vst [vmem:[#allocation14_spill] sm:$0xff] %v3537_v6 }
 0x174   : > { %1711 = vrot.lane.b32.xlu1 %v1704_v8, %s2970_s19  ;;  %1056 = vrot.lane.b32.xlu0 %v1051_v56, %s2975_s16  ;;  %v1556_v8 = vmul.f32 %v3229_v20, %v3275_v47 }
 0x176   : > { %v3545_v0 = vpop.permute.xlu1 %1321  ;;  %v3547_v17 = vpop.permute.xlu0 %1108 }
 0x177   : > { %4573 = vst [vmem:[#allocation15_spill] sm:$0xff] %v3545_v0  ;;  %4574 = vst [vmem:[#allocation16_spill] sm:$0xff] %v3547_v17 }
 0x178   : > { %1709 = vrot.lane.b32.xlu1 %v1703_v38, %s2970_s19  ;;  %1221 = vrot.lane.b32.xlu0 %v1215_v19, %s2973_s28  ;;  %v1387_v38 = vmul.f32 %v3273_v44, %v3213_v13  ;;  %v1557_v44 = vmul.f32 %v3229_v20, %v3277_v48  ;;  %v1729_v20 = vmul.f32 %v3281_v49, %v3213_v13 }
 0x17a   : > { %v3556_v45 = vpop.permute.xlu1 %1492  ;;  %v3558_v51 = vpop.permute.xlu0 %961 }
 0x17b   : > { %4575 = vst [vmem:[#allocation17_spill] sm:$0xff] %v3556_v45 }
 0x17c   : > { %1058 = vrot.lane.b32.xlu1 %v1055_v5, %s2975_s16  ;;  %1225 = vrot.lane.b32.xlu0 %v1217_v42, %s2973_s28  ;;  %v2582_v42 = vld [vmem:[%s4523_s4 + $0x3] ss:$8 sm:$0x3]  ;;  %s2978_s16 = smov 83  }
 0x17d   : > { %v1245_v35 = vrot.slane %v2582_v42, %v3450_v30 }
 0x17e   : > { %v3563_v12 = vpop.permute.xlu1 %720  ;;  %v3565_v27 = vpop.permute.xlu0 %1132 }
 0x17f   : > { %4576 = vst [vmem:[#allocation18_spill] sm:$0xff] %v3565_v27  ;;  %v723_v63 = vsel %vm534_vm2, %v3505_v34, %v3563_v12 }
 0x180   : > { %1223 = vrot.lane.b32.xlu1 %v1216_v57, %s2973_s28  ;;  %1393 = vrot.lane.b32.xlu0 %v1386_v16, %s2972_s26  ;;  %v1728_v16 = vmul.f32 %v3281_v49, %v3277_v48 }
 0x182   : > { %v3573_v1 = vpop.permute.xlu1 %744  ;;  %v3575_v56 = vpop.permute.xlu0 %1297 }
 0x183   : > { %4577 = vst [vmem:[#allocation19_spill] sm:$0xff] %v3575_v56 }
 0x184   : > { %1391 = vrot.lane.b32.xlu1 %v1385_v36, %s2972_s26  ;;  %1562 = vrot.lane.b32.xlu0 %v1556_v8, %s2971_s20  ;;  %v1241_v8 = vrot.slane %v2582_v42, %v3462_v18  ;;  %v1581_v42 = vmul.f32 %v3235_v23, %v3277_v48 }
 0x186   : > { %v3585_v19 = vpop.permute.xlu1 %915  ;;  %v3587_v5 = vpop.permute.xlu0 %983 }
 0x188   : > { %1395 = vrot.lane.b32.xlu1 %v1387_v38, %s2972_s26  ;;  %1566 = vrot.lane.b32.xlu0 %v1558_v41, %s2971_s20  ;;  %v1727_v41 = vmul.f32 %v3281_v49, %v3275_v47  ;;  %v1410_v49 = vmul.f32 %v3293_v62, %v3277_v48 }
 0x18a   : > { %v3596_v57 = vpop.permute.xlu1 %768  ;;  %v3598_v36 = vpop.permute.xlu0 %790 }
 0x18c   : > { %1564 = vrot.lane.b32.xlu1 %v1557_v44, %s2971_s20  ;;  %1735 = vrot.lane.b32.xlu0 %v1728_v16, %s2969_s18  ;;  %v1409_v44 = vmul.f32 %v3293_v62, %v3275_v47 }
 0x18e   : > { %v3607_v38 = vpop.permute.xlu1 %939  ;;  %v3609_v40 = vpop.permute.xlu0 %814 }
 0x190   : > { %1733 = vrot.lane.b32.xlu1 %v1727_v41, %s2969_s18  ;;  %1246 = vrot.lane.b32.xlu0 %v1241_v8, %s2969_s18  ;;  %v1411_v41 = vmul.f32 %v3293_v62, %v3213_v13  ;;  %v1580_v62 = vmul.f32 %v3235_v23, %v3275_v47 }
 0x192   : > { %v3617_v16 = vpop.permute.xlu1 %1110  ;;  %v3619_v45 = vpop.permute.xlu0 %1154 }
 0x193   : > { %4578 = vst [vmem:[#allocation20_spill] sm:$0xff] %v3619_v45 }
 0x194   : > { %1737 = vrot.lane.b32.xlu1 %v1729_v20, %s2969_s18  ;;  %1415 = vrot.lane.b32.xlu0 %v1409_v44, %s2973_s28  ;;  %v1751_v44 = vmul.f32 %v3301_v4, %v3275_v47 }
 0x196   : > { %v3626_v8 = vpop.permute.xlu1 %963  ;;  %v3628_v25 = vpop.permute.xlu0 %1323 }
 0x197   : > { %4579 = vst [vmem:[#allocation21_spill] sm:$0xff] %v3628_v25 }
 0x198   : > { %1248 = vrot.lane.b32.xlu1 %v1245_v35, %s2969_s18  ;;  %1419 = vrot.lane.b32.xlu0 %v1411_v41, %s2973_s28 }
 0x19a   : > { %v3634_v0 = vpop.permute.xlu1 %1134  ;;  %v3636_v20 = vpop.permute.xlu0 %1494 }
 0x19b   : > { %4580 = vst [vmem:[#allocation22_spill] sm:$0xff] %v3634_v0  ;;  %4581 = vst [vmem:[#allocation23_spill] sm:$0xff] %v3636_v20  ;;  %v1753_v20 = vmul.f32 %v3301_v4, %v3213_v13 }
 0x19c   : > { %1417 = vrot.lane.b32.xlu1 %v1410_v49, %s2973_s28  ;;  %1588 = vrot.lane.b32.xlu0 %v1581_v42, %s2972_s26  ;;  %v2583_v49 = vld [vmem:[%s4523_s4 + $0x4] ss:$8 sm:$0x3]  ;;  %v1582_v42 = vmul.f32 %v3235_v23, %v3213_v13 }
 0x19d   : > { %v1435_v23 = vrot.slane %v2583_v49, %v3462_v18 }
 0x19e   : > { %v3644_v35 = vpop.permute.xlu1 %1299  ;;  %v3646_v41 = vpop.permute.xlu0 %1490 }
 0x19f   : > { %4582 = vst [vmem:[#allocation24_spill] sm:$0xff] %v3644_v35  ;;  %4583 = vst [vmem:[#allocation25_spill] sm:$0xff] %v3646_v41 }
 0x1a0   : > { %1586 = vrot.lane.b32.xlu1 %v1580_v62, %s2972_s26  ;;  %1757 = vrot.lane.b32.xlu0 %v1751_v44, %s2971_s20  ;;  %v1439_v44 = vrot.slane %v2583_v49, %v3450_v30  ;;  %v1752_v62 = vmul.f32 %v3301_v4, %v3277_v48  ;;  %v1604_v4 = vmul.f32 %v3311_v10, %v3275_v47 }
 0x1a1   : > { %v1775_v49 = vmul.f32 %v3243_v26, %v3275_v47 }
 0x1a2   : > { %v3659_v11 = vpop.permute.xlu1 %985  ;;  %v3661_v41 = vpop.permute.xlu0 %838 }
 0x1a4   : > { %1590 = vrot.lane.b32.xlu1 %v1582_v42, %s2972_s26  ;;  %1761 = vrot.lane.b32.xlu0 %v1753_v20, %s2971_s20  ;;  %v1605_v42 = vmul.f32 %v3311_v10, %v3277_v48 }
 0x1a6   : > { %v3668_v25 = vpop.permute.xlu1 %836  ;;  %v3670_v56 = vpop.permute.xlu0 %1007 }
 0x1a8   : > { %1759 = vrot.lane.b32.xlu1 %v1752_v62, %s2971_s20  ;;  %1442 = vrot.lane.b32.xlu0 %v1439_v44, %s2976_s15  ;;  %v2584_v44 = vld [vmem:[%s4523_s4 + $0x5] ss:$8 sm:$0x3] }
 0x1aa   : > { %v3676_v35 = vpop.permute.xlu1 %840  ;;  %v3678_v20 = vpop.permute.xlu0 %1011 }
 0x1ac   : > { %1440 = vrot.lane.b32.xlu1 %v1435_v23, %s2976_s15  ;;  %1612 = vrot.lane.b32.xlu0 %v1605_v42, %s2973_s28  ;;  %v1777_v23 = vmul.f32 %v3243_v26, %v3213_v13  ;;  %v1606_v42 = vmul.f32 %v3311_v10, %v3213_v13  ;;  %s2977_s15 = smov 82   ;;  %v1630_v10 = vrot.slane %v2584_v44, %v3462_v18 }
 0x1ae   : > { %v3683_v33 = vpop.permute.xlu1 %1009  ;;  %v3685_v62 = vpop.permute.xlu0 %1175 }
 0x1af   : > { %4584 = vst [vmem:[#allocation26_spill] sm:$0xff] %v3685_v62 }
 0x1b0   : > { %1610 = vrot.lane.b32.xlu1 %v1604_v4, %s2973_s28  ;;  %1781 = vrot.lane.b32.xlu0 %v1775_v49, %s2972_s26  ;;  %v1634_v4 = vrot.slane %v2584_v44, %v3450_v30 }
 0x1b2   : > { %v3698_v6 = vpop.permute.xlu1 %1173  ;;  %v3700_v45 = vpop.permute.xlu0 %1343 }
 0x1b3   : > { %4585 = vst [vmem:[#allocation27_spill] sm:$0xff] %v3698_v6  ;;  %4586 = vst [vmem:[#allocation28_spill] sm:$0xff] %v3700_v45 }
 0x1b4   : > { %1614 = vrot.lane.b32.xlu1 %v1606_v42, %s2973_s28  ;;  %1785 = vrot.lane.b32.xlu0 %v1777_v23, %s2972_s26  ;;  %v2585_v42 = vld [vmem:[%s4523_s4 + $0x6] ss:$8 sm:$0x3]  ;;  %v1800_v23 = vmul.f32 %v3323_v22, %v3277_v48 }
 0x1b5   : > { %v1825_v26 = vrot.slane %v2585_v42, %v3462_v18 }
 0x1b6   : > { %v3705_v49 = vpop.permute.xlu1 %1177  ;;  %v3707_v62 = vpop.permute.xlu0 %1347 }
 0x1b7   : > { %4587 = vst [vmem:[#allocation29_spill] sm:$0xff] %v3705_v49  ;;  %4588 = vst [vmem:[#allocation30_spill] sm:$0xff] %v3707_v62 }
 0x1b8   : > { %1783 = vrot.lane.b32.xlu1 %v1776_v32, %s2972_s26  ;;  %1637 = vrot.lane.b32.xlu0 %v1634_v4, %s2977_s15  ;;  %v1799_v32 = vmul.f32 %v3323_v22, %v3275_v47 }
 0x1ba   : > { %v3718_v45 = vpop.permute.xlu1 %1345  ;;  %v3720_v6 = vpop.permute.xlu0 %1518 }
 0x1bb   : > { %4589 = vst [vmem:[#allocation31_spill] sm:$0xff] %v3718_v45  ;;  %4590 = vst [vmem:[#allocation32_spill] sm:$0xff] %v3720_v6  ;;  %v1801_v45 = vmul.f32 %v3323_v22, %v3213_v13 }
 0x1bc   : > { %1635 = vrot.lane.b32.xlu1 %v1630_v10, %s2977_s15  ;;  %1807 = vrot.lane.b32.xlu0 %v1800_v23, %s2973_s28  ;;  %v2851_v23 = vld [vmem:[%s4522_s3] sm:$0xff]  ;;  %s2984_s15 = smov 123  }
 0x1be   : > { %v3726_v44 = vpop.permute.xlu1 %1516  ;;  %v3728_v4 = vpop.permute.xlu0 %1689 }
 0x1bf   : > { %4591 = vst [vmem:[#allocation33_spill] sm:$0xff] %v3726_v44  ;;  %4592 = vst [vmem:[#allocation34_spill] sm:$0xff] %v3728_v4  ;;  %v1829_v4 = vrot.slane %v2585_v42, %v3450_v30  ;;  %v3742_v44 = vld [vmem:[#allocation2] sm:$0xff] }
 0x1c0   : > { %1805 = vrot.lane.b32.xlu1 %v1799_v32, %s2973_s28  ;;  %1830 = vrot.lane.b32.xlu0 %v1825_v26, %s2978_s16  ;;  %v522_v26 = vmul.f32 %v3742_v44, %v3333_v39  ;;  %v572_v62 = vmul.f32 %v3742_v44, %v3253_v31 }
 0x1c2   : > { %v3733_v6 = vpop.permute.xlu1 %1687  ;;  %v3735_v10 = vpop.permute.xlu0 %1685 }
 0x1c3   : > { %4593 = vst [vmem:[#allocation35_spill] sm:$0xff] %v3733_v6  ;;  %4594 = vst [vmem:[#allocation36_spill] sm:$0xff] %v3735_v10  ;;  %v524_v6 = vmul.f32 %v3333_v39, %v3277_v48 }
 0x1c4   : > { %1809 = vrot.lane.b32.xlu1 %v1801_v45, %s2973_s28  ;;  %509 = vperm.xlu0 %2839, %v2851_v23   ;;  %v523_v45 = vmul.f32 %v3333_v39, %v3275_v47  ;;  %v549_v23 = vmul.f32 %v3345_v46, %v3277_v48 }
 0x1c6   : > { %v3746_v32 = vpop.permute.xlu1 %1514  ;;  %v3748_v22 = vpop.permute.xlu0 %863 }
 0x1c7   : > { %4595 = vst [vmem:[#allocation37_spill] sm:$0xff] %v3746_v32  ;;  %v573_v32 = vmul.f32 %v3253_v31, %v3275_v47 }
 0x1c8   : > { %1832 = vrot.lane.b32.xlu1 %v1829_v4, %s2978_s16  ;;  %528 = vrot.lane.b32.xlu0 %v522_v26, %s2967_s17  ;;  %s2983_s16 = smov 124  }
 0x1ca   : > { %v3755_v10 = vpop.permute.xlu1 %861  ;;  %v3757_v42 = vpop.permute.xlu0 %1033 }
 0x1cc   : > { %557 = vrot.lane.b32.xlu0 %v549_v23, %s2970_s19  ;;  %530 = vrot.lane.b32.xlu1 %v523_v45, %s2967_s17  ;;  %v548_v45 = vmul.f32 %v3345_v46, %v3275_v47 }
 0x1ce   : > { %v3763_v4 = vpop.permute.xlu1 %1031  ;;  %v3765_v26 = vpop.permute.xlu0 %1197 }
 0x1cf   : > { %4596 = vst [vmem:[#allocation38_spill] sm:$0xff] %v3765_v26  ;;  %v547_v26 = vmul.f32 %v3742_v44, %v3345_v46  ;;  %v700_v46 = vmul.f32 %v3742_v44, %v3249_v29 }
 0x1d0   : > { %580 = vrot.lane.b32.xlu0 %v573_v32, %s2969_s18  ;;  %532 = vrot.lane.b32.xlu1 %v524_v6, %s2967_s17  ;;  %v601_v6 = vmul.f32 %v3377_v59, %v3277_v48  ;;  %s2986_s17 = smov 51  }
 0x1d2   : > { %v3775_v23 = vpop.permute.xlu1 %1035  ;;  %v3777_v39 = vpop.permute.xlu0 %1201 }
 0x1d3   : > { %4597 = vst [vmem:[#allocation39_spill] sm:$0xff] %v3777_v39 }
 0x1d4   : > { %578 = vrot.lane.b32.xlu0 %v572_v62, %s2969_s18  ;;  %555 = vrot.lane.b32.xlu1 %v548_v45, %s2970_s19  ;;  %v701_v62 = vmul.f32 %v3249_v29, %v3275_v47  ;;  %v722_v45 = vsel %vm534_vm2, %v3398_v9, %v3505_v34  ;;  %v746_v9 = vsel %vm559_vm3, %v3410_v15, %v3519_v58 }
 0x1d5   : > { %v771_v34 = vsel %vm584_vm4, %v3503_v50, %v3596_v57  ;;  %v727_v0 = vadd.f32 %v722_v45, %v700_v46 }
 0x1d6   : > { %v3785_v32 = vpop.permute.xlu1 %1199  ;;  %v3787_v49 = vpop.permute.xlu0 %1369  ;;  %v728_v39 = vadd.f32 %v723_v63, %v701_v62  ;;  %v600_v63 = vmul.f32 %v3377_v59, %v3275_v47 }
 0x1d7   : > { %4598 = vst [vmem:[#allocation40_spill] sm:$0xff] %v3785_v32  ;;  %4599 = vst [vmem:[#allocation41_spill] sm:$0xff] %v3787_v49  ;;  %v747_v49 = vsel %vm559_vm3, %v3519_v58, %v3573_v1  ;;  %v625_v32 = vmul.f32 %v3388_v3, %v3275_v47  ;;  %v751_v62 = vadd.f32 %v746_v9, %v727_v0 }
 0x1d8   : > { %608 = vrot.lane.b32.xlu0 %v601_v6, %s2971_s20  ;;  %553 = vrot.lane.b32.xlu1 %v547_v26, %s2970_s19  ;;  %v574_v26 = vmul.f32 %v3253_v31, %v3277_v48  ;;  %v752_v17 = vadd.f32 %v747_v49, %v728_v39  ;;  %v627_v31 = vmul.f32 %v3388_v3, %v3213_v13  ;;  %s2979_s19 = smov 77  }
 0x1d9   : > { %v770_v49 = vsel %vm584_vm4, %v3432_v43, %v3503_v50  ;;  %v794_v39 = vsel %vm612_vm5, %v3517_v55, %v3598_v36  ;;  %v651_v0 = vmul.f32 %v3265_v37, %v3277_v48  ;;  %v818_v50 = vsel %vm637_vm6, %v3526_v2, %v3609_v40 }
 0x1da   : > { %v3806_v27 = vpop.permute.xlu1 %1367  ;;  %v3808_v6 = vpop.permute.xlu0 %1538  ;;  %v775_v46 = vadd.f32 %v770_v49, %v751_v62  ;;  %v702_v9 = vmul.f32 %v3249_v29, %v3277_v48 }
 0x1db   : > { %4600 = vst [vmem:[#allocation42_spill] sm:$0xff] %v3808_v6  ;;  %v776_v6 = vadd.f32 %v771_v34, %v752_v17  ;;  %v3841_v17 = vld [vmem:[%s4523_s4] ss:$8 sm:$0x3]  ;;  %v897_v34 = vmul.f32 %v3355_v54, %v3277_v48 }
 0x1dc   : > { %631 = vrot.lane.b32.xlu0 %v625_v32, %s2972_s26  ;;  %582 = vrot.lane.b32.xlu1 %v574_v26, %s2969_s18  ;;  %v602_v32 = vmul.f32 %v3377_v59, %v3213_v13  ;;  %v676_v59 = vrot.slane %v3841_v17, %v3462_v18  ;;  %v799_v29 = vadd.f32 %v3517_v55, %v775_v46 }
 0x1dd   : > { %v800_v45 = vadd.f32 %v794_v39, %v776_v6  ;;  %v626_v6 = vmul.f32 %v3388_v3, %v3277_v48  ;;  %v924_v62 = vadd.f32 %v3585_v19, %v897_v34  ;;  %v866_v18 = vsel %vm865_vm8, %v3755_v10, %v3748_v22 }
 0x1de   : > { %v3824_v15 = vpop.permute.xlu1 %1371  ;;  %v3826_v58 = vpop.permute.xlu0 %1542  ;;  %v990_v55 = vsel %vm612_vm5, %v3659_v11, %v3495_v28  ;;  %v823_v46 = vadd.f32 %v3526_v2, %v799_v29  ;;  %v795_v28 = vsel %vm612_vm5, %v3598_v36, %v3458_v60  ;;  %v1014_v2 = vsel %vm637_vm6, %v3683_v33, %v3678_v20 }
 0x1df   : > { %v824_v49 = vadd.f32 %v818_v50, %v800_v45  ;;  %v942_v60 = vsel %vm559_vm3, %v3539_v7, %v3607_v38  ;;  %v1038_v36 = vsel %vm662_vm7, %v3757_v42, %v3775_v23 }
 0x1e0   : > { %635 = vrot.lane.b32.xlu0 %v627_v31, %s2972_s26  ;;  %606 = vrot.lane.b32.xlu1 %v600_v63, %s2971_s20  ;;  %v842_v63 = vsel %vm662_vm7, %v3668_v25, %v3661_v41  ;;  %v729_v31 = vadd.f32 %v3563_v12, %v702_v9  ;;  %v650_v12 = vmul.f32 %v3265_v37, %v3275_v47 }
 0x1e2   : > { %v3845_v26 = vpop.permute.xlu1 %1540  ;;  %v3847_v43 = vpop.permute.xlu0 %1713  ;;  %v753_v3 = vadd.f32 %v3573_v1, %v729_v31 }
 0x1e3   : > { %4601 = vst [vmem:[#allocation43_spill] sm:$0xff] %v3847_v43  ;;  %v848_v43 = vadd.f32 %v842_v63, %v824_v49  ;;  %v895_v49 = vmul.f32 %v3742_v44, %v3355_v54 }
 0x1e4   : > { %658 = vrot.lane.b32.xlu0 %v651_v0, %s2973_s28  ;;  %610 = vrot.lane.b32.xlu1 %v602_v32, %s2971_s20  ;;  %v948_v32 = vadd.f32 %v3607_v38, %v924_v62  ;;  %v777_v45 = vadd.f32 %v3596_v57, %v753_v3  ;;  %v896_v57 = vmul.f32 %v3355_v54, %v3275_v47  ;;  %s2980_s20 = smov 127  }
 0x1e5   : > { %v871_v50 = vmul.f32 %v866_v18, %v848_v43  ;;  %v966_v38 = vsel %vm584_vm4, %v3558_v51, %v3626_v8  ;;  %v680_v54 = vrot.slane %v3841_v17, %v3450_v30  ;;  %v965_v30 = vsel %vm584_vm4, %v3474_v21, %v3558_v51 }
 0x1e6   : > { %v3868_v39 = vpop.permute.xlu1 %1711  ;;  %v3870_v0 = vpop.permute.xlu0 %1056  ;;  %v972_v1 = vadd.f32 %v3626_v8, %v948_v32  ;;  %v801_v63 = vadd.f32 %v795_v28, %v777_v45 }
 0x1e8   : > { %681 = vrot.lane.b32.xlu0 %v676_v59, %s2979_s19  ;;  %633 = vrot.lane.b32.xlu1 %v626_v6, %s2972_s26  ;;  %v918_v59 = vsel %vm534_vm2, %v3528_v53, %v3585_v19  ;;  %v996_v43 = vadd.f32 %v990_v55, %v972_v1  ;;  %v847_v6 = vadd.f32 %v3668_v25, %v823_v46  ;;  %s2981_s26 = smov 126  }
 0x1e9   : > { %v652_v19 = vmul.f32 %v3265_v37, %v3213_v13  ;;  %v923_v20 = vadd.f32 %v918_v59, %v896_v57  ;;  %v917_v13 = vsel %vm534_vm2, %v3420_v24, %v3528_v53  ;;  %v819_v37 = vsel %vm637_vm6, %v3609_v40, %v3481_v14 }
 0x1ea   : > { %v3886_v9 = vpop.permute.xlu1 %1709  ;;  %v3888_v34 = vpop.permute.xlu0 %1221  ;;  %v1020_v29 = vadd.f32 %v1014_v2, %v996_v43  ;;  %v870_v25 = vmul.f32 %v3755_v10, %v847_v6  ;;  %v941_v24 = vsel %vm559_vm3, %v3442_v52, %v3539_v7  ;;  %v989_v40 = vsel %vm612_vm5, %v3587_v5, %v3659_v11  ;;  %v4602_v2 = vld [vmem:[#allocation16_spill] sm:$0xff]  ;;  %v4603_v6 = vld [vmem:[#allocation22_spill] sm:$0xff] }
 0x1eb   : > { %v947_v23 = vadd.f32 %v942_v60, %v923_v20  ;;  %v843_v14 = vsel %vm662_vm7, %v3661_v41, %v3676_v35  ;;  %v922_v53 = vadd.f32 %v917_v13, %v895_v49  ;;  %v825_v8 = vadd.f32 %v819_v37, %v801_v63  ;;  %v4606_v49 = vld [vmem:[#allocation11_spill] sm:$0xff]  ;;  %v4607_v37 = vld [vmem:[#allocation29_spill] sm:$0xff] }
 0x1ec   : > { %878 = vrot.lane.b32.xlu0 %v871_v50, %s2980_s20  ;;  %656 = vrot.lane.b32.xlu1 %v650_v12, %s2973_s28  ;;  %v1044_v10 = vadd.f32 %v1038_v36, %v1020_v29  ;;  %v1013_v52 = vsel %vm637_vm6, %v3670_v56, %v3683_v33  ;;  %v1037_v35 = vsel %vm662_vm7, %v3763_v4, %v3757_v42 }
 0x1ed   : > { %v971_v18 = vadd.f32 %v966_v38, %v947_v23  ;;  %v946_v11 = vadd.f32 %v941_v24, %v922_v53  ;;  %v849_v17 = vadd.f32 %v843_v14, %v825_v8  ;;  %v1113_v57 = vsel %vm534_vm2, %v4602_v2, %v3617_v16  ;;  %v4608_v38 = vld [vmem:[#allocation26_spill] sm:$0xff]  ;;  %v4609_v24 = vld [vmem:[#allocation20_spill] sm:$0xff] }
 0x1ee   : > { %v1059_v31 = vpop.permute.xlu1 %1058  ;;  %v3913_v62 = vpop.permute.xlu0 %1225  ;;  %v1180_v23 = vsel %vm612_vm5, %v4608_v38, %v4607_v37 }
 0x1ef   : > { %v1067_v3 = vmul.f32 %v1059_v31, %v1044_v10  ;;  %v995_v7 = vadd.f32 %v989_v40, %v971_v18  ;;  %v970_v41 = vadd.f32 %v965_v30, %v946_v11  ;;  %v872_v21 = vmul.f32 %v3748_v22, %v849_v17  ;;  %v4610_v40 = vld [vmem:[#allocation14_spill] sm:$0xff]  ;;  %v4612_v30 = vld [vmem:[#allocation39_spill] sm:$0xff] }
 0x1f0   : > { %876 = vrot.lane.b32.xlu0 %v870_v25, %s2980_s20  ;;  %660 = vrot.lane.b32.xlu1 %v652_v19, %s2973_s28  ;;  %v1061_v46 = vsel %vm1060_vm9, %v3870_v0, %v1059_v31  ;;  %v1092_v22 = vmul.f32 %v3367_v61, %v3277_v48  ;;  %v4604_v19 = vld [vmem:[#allocation18_spill] sm:$0xff]  ;;  %v1156_v14 = vsel %vm584_vm4, %v4610_v40, %v4609_v24  ;;  %s2982_s28 = smov 125  }
 0x1f1   : > { %v1019_v12 = vadd.f32 %v1013_v52, %v995_v7  ;;  %v994_v45 = vadd.f32 %v3587_v5, %v970_v41  ;;  %v1091_v5 = vmul.f32 %v3367_v61, %v3275_v47  ;;  %v1137_v60 = vsel %vm559_vm3, %v4604_v19, %v4603_v6  ;;  %v4605_v25 = vld [vmem:[#allocation10_spill] sm:$0xff]  ;;  %v4613_v52 = vld [vmem:[#allocation40_spill] sm:$0xff] }
 0x1f2   : > { %v1224_v32 = vpop.permute.xlu1 %1223  ;;  %v3939_v55 = vpop.permute.xlu0 %1393  ;;  %v1112_v47 = vsel %vm534_vm2, %v4605_v25, %v4602_v2  ;;  %v1204_v11 = vsel %vm637_vm6, %v4613_v52, %v4612_v30  ;;  %v4614_v17 = vld [vmem:[#allocation38_spill] sm:$0xff] }
 0x1f3   : > { %v1043_v1 = vadd.f32 %v1037_v35, %v1019_v12  ;;  %v1018_v50 = vadd.f32 %v3670_v56, %v994_v45  ;;  %v1119_v56 = vadd.f32 %v3617_v16, %v1092_v22  ;;  %v1118_v36 = vadd.f32 %v1113_v57, %v1091_v5 }
 0x1f4   : > { %1075 = vrot.lane.b32.xlu0 %v1067_v3, %s2981_s26  ;;  %683 = vrot.lane.b32.xlu1 %v680_v54, %s2979_s19  ;;  %v1090_v16 = vmul.f32 %v3742_v44, %v3367_v61  ;;  %v4611_v61 = vld [vmem:[#allocation27_spill] sm:$0xff]  ;;  %v1203_v35 = vsel %vm637_vm6, %v4614_v17, %v4613_v52  ;;  %v1228_v12 = vsel %vm662_vm7, %v1224_v32, %v3913_v62  ;;  %s4479_s19 = scalar_lea.sflag [#allocation5], %s404_s0 }
 0x1f5   : > { %v1066_v59 = vmul.f32 %v1061_v46, %v1043_v1  ;;  %v1042_v43 = vadd.f32 %v3763_v4, %v1018_v50  ;;  %v1143_v4 = vadd.f32 %v4603_v6, %v1119_v56  ;;  %v1142_v31 = vadd.f32 %v1137_v60, %v1118_v36  ;;  %v4615_v56 = vld [vmem:[#allocation7_spill] sm:$0xff] }
 0x1f6   : > { %v3953_v51 = vpop.permute.xlu1 %1391  ;;  %v3955_v33 = vpop.permute.xlu0 %1562  ;;  %v1117_v13 = vadd.f32 %v1112_v47, %v1090_v16  ;;  %v1179_v53 = vsel %vm612_vm5, %v4611_v61, %v4608_v38  ;;  %v1227_v1 = vsel %vm662_vm7, %v3888_v34, %v1224_v32  ;;  %v1281_v62 = vmul.f32 %v4615_v56, %v3277_v48  ;;  %v4617_v16 = vld [vmem:[#allocation19_spill] sm:$0xff] }
 0x1f7   : > { %v1065_v20 = vmul.f32 %v3870_v0, %v1042_v43  ;;  %v1136_v0 = vsel %vm559_vm3, %v4606_v49, %v4604_v19  ;;  %v1162_v8 = vadd.f32 %v4609_v24, %v1143_v4  ;;  %v1161_v3 = vadd.f32 %v1156_v14, %v1142_v31  ;;  %v4032_v31 = vld [vmem:[#allocation2 + $0x8] sm:$0xff]  ;;  %v4623_v52 = vld [vmem:[#allocation15_spill] sm:$0xff] }
 0x1f8   : > { %880 = vrot.lane.b32.xlu1 %v872_v21, %s2980_s20  ;;  %v1141_v18 = vadd.f32 %v1136_v0, %v1117_v13  ;;  %v1280_v49 = vmul.f32 %v4032_v31, %v4615_v56  ;;  %v4618_v0 = vld [vmem:[#allocation30_spill] sm:$0xff]  ;;  %v4619_v13 = vld [vmem:[#allocation31_spill] sm:$0xff] }
 0x1f9   : > { %v1186_v7 = vadd.f32 %v1180_v23, %v1162_v8  ;;  %v1185_v41 = vadd.f32 %v1179_v53, %v1161_v3  ;;  %v1350_v37 = vsel %vm584_vm4, %v4619_v13, %v4618_v0  ;;  %v4620_v23 = vld [vmem:[#allocation21_spill] sm:$0xff]  ;;  %v4622_v8 = vld [vmem:[#allocation12_spill] sm:$0xff] }
 0x1fa   : > { %v3961_v28 = vpop.permute.xlu1 %1395  ;;  %v3963_v42 = vpop.permute.xlu0 %1566  ;;  %v1160_v50 = vadd.f32 %v4610_v40, %v1141_v18  ;;  %v4621_v40 = vld [vmem:[#allocation41_spill] sm:$0xff]  ;;  %v1301_v18 = vsel %vm534_vm2, %v4622_v8, %v4617_v16 }
 0x1fb   : > { %v1210_v45 = vadd.f32 %v1204_v11, %v1186_v7  ;;  %v1374_v14 = vsel %vm612_vm5, %v4621_v40, %v3824_v15  ;;  %v1398_v30 = vsel %vm637_vm6, %v3939_v55, %v3961_v28  ;;  %v1326_v15 = vsel %vm559_vm3, %v4623_v52, %v4620_v23  ;;  %v4624_v11 = vld [vmem:[#allocation28_spill] sm:$0xff] }
 0x1fc   : > { %1073 = vrot.lane.b32.xlu1 %v1066_v59, %s2981_s26  ;;  %v1209_v59 = vadd.f32 %v1203_v35, %v1185_v41  ;;  %v1184_v2 = vadd.f32 %v4611_v61, %v1160_v50  ;;  %v1349_v7 = vsel %vm584_vm4, %v4624_v11, %v4619_v13  ;;  %v1373_v28 = vsel %vm612_vm5, %v3806_v27, %v4621_v40 }
 0x1fd   : > { %v1234_v22 = vadd.f32 %v1228_v12, %v1210_v45 }
 0x1fe   : > { %v3979_v63 = vpop.permute.xlu1 %1564  ;;  %v3981_v29 = vpop.permute.xlu0 %1735  ;;  %v1233_v57 = vadd.f32 %v1227_v1, %v1209_v59  ;;  %v1208_v60 = vadd.f32 %v4614_v17, %v1184_v2 }
 0x200   : > { %1071 = vrot.lane.b32.xlu1 %v1065_v20, %s2981_s26  ;;  %v4616_v20 = vld [vmem:[#allocation24_spill] sm:$0xff]  ;;  %v1232_v25 = vadd.f32 %v3888_v34, %v1208_v60  ;;  %s2988_s26 = smov [#allocation4]  }
 0x201   : > { %v1308_v32 = vadd.f32 %v4616_v20, %v1281_v62  ;;  %v1302_v48 = vsel %vm534_vm2, %v4617_v16, %v4616_v20  ;;  %v4626_v20 = vld [vmem:[#allocation8_spill] sm:$0xff] }
 0x202   : > { %v3996_v10 = vpop.permute.xlu1 %1733  ;;  %v1247_v54 = vpop.permute.xlu0 %1246  ;;  %v1307_v24 = vadd.f32 %v1302_v48, %v1280_v49 }
 0x203   : > { %v1254_v38 = vmul.f32 %v1247_v54, %v1232_v25  ;;  %v1332_v34 = vadd.f32 %v4620_v23, %v1308_v32  ;;  %v4628_v23 = vld [vmem:[#allocation32_spill] sm:$0xff] }
 0x204   : > { %v1331_v41 = vadd.f32 %v1326_v15, %v1307_v24 }
 0x205   : > { %v1356_v3 = vadd.f32 %v1350_v37, %v1332_v34  ;;  %v1545_v37 = vsel %vm584_vm4, %v3845_v26, %v3826_v58 }
 0x206   : > { %v4013_v21 = vpop.permute.xlu1 %1737  ;;  %v4015_v46 = vpop.permute.xlu0 %1415  ;;  %v1355_v59 = vadd.f32 %v1349_v7, %v1331_v41 }
 0x207   : > { %v1380_v17 = vadd.f32 %v1374_v14, %v1356_v3  ;;  %v4629_v14 = vld [vmem:[#allocation17_spill] sm:$0xff] }
 0x209   : > { %v1404_v50 = vadd.f32 %v1398_v30, %v1380_v17  ;;  %v4631_v17 = vld [vmem:[#allocation25_spill] sm:$0xff] }
 0x20a   : > { %v1249_v5 = vpop.permute.xlu1 %1248  ;;  %v1420_v43 = vpop.permute.xlu0 %1419 }
 0x20b   : > { %v1250_v6 = vsel %vm584_vm4, %v1247_v54, %v1249_v5  ;;  %v1256_v19 = vmul.f32 %v1249_v5, %v1234_v22  ;;  %v1279_v54 = vmul.f32 %v3742_v44, %v4615_v56  ;;  %v4625_v22 = vld [vmem:[#allocation13_spill] sm:$0xff] }
 0x20c   : > { %v1255_v36 = vmul.f32 %v1250_v6, %v1233_v57  ;;  %v1325_v2 = vsel %vm559_vm3, %v4625_v22, %v4623_v52  ;;  %v1397_v57 = vsel %vm637_vm6, %v3953_v51, %v3939_v55  ;;  %v4627_v55 = vld [vmem:[#allocation23_spill] sm:$0xff] }
 0x20d   : > { %1264 = vrot.lane.b32.xlu1 %v1256_v19, %s2982_s28  ;;  %v1306_v35 = vadd.f32 %v1301_v18, %v1279_v54  ;;  %v1497_v8 = vsel %vm534_vm2, %v4629_v14, %v4627_v55  ;;  %v1475_v18 = vmul.f32 %v4032_v31, %v4626_v20 }
 0x20e   : > { %v1418_v47 = vpop.permute.xlu1 %1417  ;;  %v4027_v4 = vpop.permute.xlu0 %1588  ;;  %1262 = vrot.lane.b32.xlu0 %v1255_v36, %s2982_s28  ;;  %v4077_v36 = vld [vmem:[#allocation2 + $0x10] sm:$0xff] }
 0x20f   : > { %v1422_v12 = vsel %vm662_vm7, %v1418_v47, %v1420_v43  ;;  %v1330_v56 = vadd.f32 %v1325_v2, %v1306_v35  ;;  %v1379_v43 = vadd.f32 %v1373_v28, %v1355_v59  ;;  %v1421_v19 = vsel %vm662_vm7, %v4015_v46, %v1418_v47 }
 0x210   : > { %v1428_v5 = vadd.f32 %v1422_v12, %v1404_v50  ;;  %v1476_v32 = vmul.f32 %v4077_v36, %v4626_v20  ;;  %v1496_v35 = vsel %vm534_vm2, %v4631_v17, %v4629_v14  ;;  %v1474_v12 = vmul.f32 %v3742_v44, %v4626_v20 }
 0x211   : > { %v1354_v25 = vadd.f32 %v4624_v11, %v1330_v56  ;;  %v1403_v16 = vadd.f32 %v1397_v57, %v1379_v43  ;;  %v1502_v11 = vadd.f32 %v1497_v8, %v1475_v18  ;;  %v1568_v57 = vsel %vm612_vm5, %v3955_v33, %v3979_v63  ;;  %v4638_v8 = vld [vmem:[#allocation43_spill] sm:$0xff] }
 0x212   : > { %v4043_v61 = vpop.permute.xlu1 %1586  ;;  %v4045_v53 = vpop.permute.xlu0 %1757  ;;  %1260 = vrot.lane.b32.xlu0 %v1254_v38, %s2982_s28  ;;  %v1503_v48 = vadd.f32 %v4627_v55, %v1476_v32  ;;  %v4634_v55 = vld [vmem:[#allocation9_spill] sm:$0xff]  ;;  %v1740_v18 = vsel %vm584_vm4, %v3981_v29, %v4013_v21  ;;  %s2678_s28 = smul.u32 80, %s404_s0 }
 0x213   : > { %v1378_v49 = vadd.f32 %v3806_v27, %v1354_v25  ;;  %v1427_v0 = vadd.f32 %v1421_v19, %v1403_v16  ;;  %v1569_v27 = vsel %vm612_vm5, %v3979_v63, %v3963_v42 }
 0x214   : > { %v1527_v34 = vadd.f32 %v4628_v23, %v1503_v48  ;;  %v1671_v48 = vmul.f32 %v4077_v36, %v4634_v55 }
 0x215   : > { %v1402_v24 = vadd.f32 %v3953_v51, %v1378_v49  ;;  %v4630_v51 = vld [vmem:[#allocation33_spill] sm:$0xff] }
 0x216   : > { %v1591_v45 = vpop.permute.xlu1 %1590  ;;  %v4062_v1 = vpop.permute.xlu0 %1761  ;;  %v1551_v3 = vadd.f32 %v1545_v37, %v1527_v34  ;;  %v1521_v52 = vsel %vm559_vm3, %v4630_v51, %v4628_v23 }
 0x217   : > { %v1426_v58 = vadd.f32 %v4015_v46, %v1402_v24  ;;  %v1593_v15 = vsel %vm637_vm6, %v4027_v4, %v1591_v45  ;;  %v4632_v46 = vld [vmem:[#allocation42_spill] sm:$0xff]  ;;  %v1526_v28 = vadd.f32 %v1521_v52, %v1502_v11  ;;  %v4633_v45 = vld [vmem:[#allocation37_spill] sm:$0xff]  ;;  %v1739_v11 = vsel %vm584_vm4, %v3996_v10, %v3981_v29 }
 0x218   : > { %v1575_v42 = vadd.f32 %v1569_v27, %v1551_v3  ;;  %v1544_v41 = vsel %vm584_vm4, %v4632_v46, %v3845_v26  ;;  %v1520_v2 = vsel %vm559_vm3, %v4633_v45, %v4630_v51  ;;  %v1501_v26 = vadd.f32 %v1496_v35, %v1474_v12 }
 0x219   : > { %v1550_v56 = vadd.f32 %v1544_v41, %v1526_v28  ;;  %v1716_v27 = vsel %vm559_vm3, %v3868_v39, %v4638_v8 }
 0x21a   : > { %v4073_v62 = vpop.permute.xlu1 %1759  ;;  %v1443_v6 = vpop.permute.xlu0 %1442  ;;  %v1599_v50 = vadd.f32 %v1593_v15, %v1575_v42  ;;  %v1525_v19 = vadd.f32 %v1520_v2, %v1501_v26  ;;  %v1715_v15 = vsel %vm559_vm3, %v3886_v9, %v3868_v39 }
 0x21b   : > { %v1451_v60 = vmul.f32 %v1443_v6, %v1428_v5  ;;  %v1764_v42 = vsel %vm612_vm5, %v4073_v62, %v4062_v1 }
 0x21c   : > { %v1549_v63 = vadd.f32 %v4632_v46, %v1525_v19 }
 0x21d   : > { %1459 = vrot.lane.b32.xlu0 %v1451_v60, %s2983_s16  ;;  %v1574_v60 = vadd.f32 %v1568_v57, %v1550_v56 }
 0x21e   : > { %v1441_v13 = vpop.permute.xlu1 %1440  ;;  %v1613_v47 = vpop.permute.xlu0 %1612  ;;  %v1573_v23 = vadd.f32 %v3955_v33, %v1549_v63 }
 0x21f   : > { %v1445_v38 = vsel %vm1444_vm10, %v1441_v13, %v1443_v6  ;;  %v1449_v7 = vmul.f32 %v1441_v13, %v1426_v58  ;;  %v1592_v6 = vsel %vm637_vm6, %v4043_v61, %v4027_v4  ;;  %v4636_v13 = vld [vmem:[#allocation35_spill] sm:$0xff]  ;;  %v1669_v4 = vmul.f32 %v3742_v44, %v4634_v55 }
 0x220   : > { %v1450_v40 = vmul.f32 %v1445_v38, %v1427_v0  ;;  %v1598_v49 = vadd.f32 %v1592_v6, %v1574_v60  ;;  %v4635_v0 = vld [vmem:[#allocation34_spill] sm:$0xff]  ;;  %v1670_v38 = vmul.f32 %v4032_v31, %v4634_v55  ;;  %v1597_v33 = vadd.f32 %v4043_v61, %v1573_v23 }
 0x221   : > { %v1692_v37 = vsel %vm534_vm2, %v4636_v13, %v4635_v0  ;;  %v1763_v61 = vsel %vm612_vm5, %v4045_v53, %v4073_v62 }
 0x222   : > { %v1611_v54 = vpop.permute.xlu1 %1610  ;;  %v4099_v30 = vpop.permute.xlu0 %1781  ;;  %1457 = vrot.lane.b32.xlu1 %v1450_v40, %s2983_s16  ;;  %v4637_v40 = vld [vmem:[#allocation36_spill] sm:$0xff]  ;;  %v1697_v58 = vadd.f32 %v1692_v37, %v1670_v38 }
 0x223   : > { %v1616_v25 = vsel %vm662_vm7, %v1611_v54, %v1613_v47  ;;  %v1691_v14 = vsel %vm534_vm2, %v4637_v40, %v4636_v13  ;;  %v1621_v35 = vadd.f32 %v1611_v54, %v1597_v33 }
 0x224   : > { %v1622_v34 = vadd.f32 %v1616_v25, %v1598_v49  ;;  %v1696_v21 = vadd.f32 %v1691_v14, %v1669_v4 }
 0x226   : > { %v1615_v59 = vpop.permute.xlu1 %1614  ;;  %v1786_v22 = vpop.permute.xlu0 %1785  ;;  %1455 = vrot.lane.b32.xlu1 %v1449_v7, %s2983_s16  ;;  %v1721_v7 = vadd.f32 %v1716_v27, %v1697_v58  ;;  %v1720_v9 = vadd.f32 %v1715_v15, %v1696_v21  ;;  %s4448_s16 = scalar_lea.vmem [#allocation4], %s2678_s28  ;;  %s2860_s28 = sshll.u32 %s2988_s26, 4  ;;  %s2861_s28 = int_to_ptr.vmem [resolvable:$false] %s2860_s28 }
 0x227   : > { %v1617_v5 = vsel %vm662_vm7, %v1613_v47, %v1615_v59  ;;  %v1698_v47 = vadd.f32 %v4635_v0, %v1671_v48  ;;  %s2862_s1 = scalar_lea.vmem %s2861_s28, 2560 }
 0x228   : > { %v1623_v43 = vadd.f32 %v1617_v5, %v1599_v50  ;;  %v1745_v41 = vadd.f32 %v1739_v11, %v1721_v7  ;;  %v1744_v28 = vadd.f32 %v3996_v10, %v1720_v9 }
 0x229   : > { %v1722_v51 = vadd.f32 %v4638_v8, %v1698_v47 }
 0x22a   : > { %v1784_v20 = vpop.permute.xlu1 %1783  ;;  %v1638_v32 = vpop.permute.xlu0 %1637  ;;  %v1769_v50 = vadd.f32 %v1763_v61, %v1745_v41 }
 0x22b   : > { %v1646_v16 = vmul.f32 %v1638_v32, %v1623_v43  ;;  %v1746_v17 = vadd.f32 %v1740_v18, %v1722_v51  ;;  %v1788_v39 = vsel %vm637_vm6, %v1784_v20, %v1786_v22  ;;  %v1787_v1 = vsel %vm637_vm6, %v4099_v30, %v1784_v20 }
 0x22c   : > { %v1768_v22 = vadd.f32 %v4045_v53, %v1744_v28  ;;  %v1793_v57 = vadd.f32 %v1787_v1, %v1769_v50 }
 0x22d   : > { %1654 = vrot.lane.b32.xlu1 %v1646_v16, %s2984_s15  ;;  %v1770_v29 = vadd.f32 %v1764_v42, %v1746_v17 }
 0x22e   : > { %v1636_v24 = vpop.permute.xlu1 %1635  ;;  %v1808_v59 = vpop.permute.xlu0 %1807  ;;  %v1792_v26 = vadd.f32 %v4099_v30, %v1768_v22 }
 0x22f   : > { %v1640_v3 = vsel %vm1639_vm11, %v1636_v24, %v1638_v32  ;;  %v1644_v12 = vmul.f32 %v1636_v24, %v1621_v35  ;;  %v1794_v54 = vadd.f32 %v1788_v39, %v1770_v29 }
 0x230   : > { %v1645_v52 = vmul.f32 %v1640_v3, %v1622_v34 }
 0x232   : > { %v1806_v46 = vpop.permute.xlu1 %1805  ;;  %1652 = vrot.lane.b32.xlu0 %v1645_v52, %s2984_s15  ;;  %v1831_v43 = vpop.permute.xlu0 %1830 }
 0x233   : > { %v1811_v2 = vsel %vm662_vm7, %v1806_v46, %v1808_v59  ;;  %v1816_v60 = vadd.f32 %v1806_v46, %v1792_v26 }
 0x234   : > { %v1817_v56 = vadd.f32 %v1811_v2, %v1793_v57 }
 0x235   : > { %v1839_v32 = vmul.f32 %v1831_v43, %v1816_v60 }
 0x236   : > { %v1810_v45 = vpop.permute.xlu1 %1809  ;;  %1650 = vrot.lane.b32.xlu0 %v1644_v12, %s2984_s15  ;;  %s2679_s15 = smul.u32 1280, %s3077_s25 }
 0x237   : > { %v1812_v62 = vsel %vm662_vm7, %v1808_v59, %v1810_v45 }
 0x238   : > { %v1818_v5 = vadd.f32 %v1812_v62, %v1794_v54  ;;  %s4473_s18 = scalar_lea.hbm %s4531_s12, %s2679_s15 }
 0x23a   : > { %v1833_v10 = vpop.permute.xlu1 %1832 }
 0x23b   : > { %v1835_v6 = vsel %vm1834_vm12, %v1831_v43, %v1833_v10  ;;  %v1841_v19 = vmul.f32 %v1833_v10, %v1818_v5 }
 0x23c   : > { %v1840_v20 = vmul.f32 %v1835_v6, %v1817_v56 }
 0x23d   : > { %1849 = vrot.lane.b32.xlu0 %v1841_v19, %s2985_s29 }
 0x23e   : > { %1847 = vrot.lane.b32.xlu1 %v1840_v20, %s2985_s29  ;;  %v531_v25 = vpop.permute.xlu1 %530 }
 0x23f   : > { %v510_v16 = vpop.permute.xlu0 %509 }
 0x240   : > { %v514_v51 = vmul.f32 %v4077_v36, %v510_v16  ;;  %v513_v21 = vmul.f32 %v4032_v31, %v510_v16  ;;  %v512_v39 = vmul.f32 %v3742_v44, %v510_v16 }
 0x242   : > { %1845 = vrot.lane.b32.xlu1 %v1839_v32, %s2985_s29  ;;  %v533_v53 = vpop.permute.xlu1 %532  ;;  %s2511_s29 = sshll.u32 %s4448_s16, 4  ;;  %s4466_s29 = int_to_ptr.vmem [resolvable:$true] %s2511_s29 }
 0x243   : > { %v529_v55 = vpop.permute.xlu0 %528  ;;  %v542_v15 = vadd.f32 %v533_v53, %v514_v51  ;;  %v536_v11 = vsel %vm534_vm2, %v531_v25, %v533_v53  ;;  %s2856_s20 = scalar_lea.vmem %s4466_s29, 1280  ;;  %p2863_p0 = scmp.lt.s32.totalorder %s4466_s29, %s2861_s28 }
 0x244   : > { %v535_v17 = vsel %vm534_vm2, %v529_v55, %v531_v25  ;;  %v541_v36 = vadd.f32 %v536_v11, %v513_v21  ;;  %vm1266_vm2 = vcmask 1022976   ;;  %p2857_p11 = scmp.ne.s32.totalorder %s4466_s29, %s2856_s20  ;;  %p2864_p1 = scmp.lt.s32.totalorder %s2862_s1, %s2856_s20 }
 0x245   : > { %v540_v1 = vadd.f32 %v535_v17, %v512_v39 }
 0x246   : > { %v556_v48 = vpop.permute.xlu1 %555  ;;  %p2858_p12 = pnand %p2857_p11, %p3094_p5  ;;  %p2865_p2 = por %p2864_p1, %p2863_p0 }
 0x247   : > { %v558_v63 = vpop.permute.xlu0 %557 }
 0x248   : > { %v567_v7 = vadd.f32 %v558_v63, %v542_v15  ;;  %v561_v35 = vsel %vm559_vm3, %v556_v48, %v558_v63  ;;  %p2859_p13 = pneg %p2858_p12 }
 0x249   : > { %v566_v31 = vadd.f32 %v561_v35, %v541_v36 }
 0x24a   : > { %v554_v49 = vpop.permute.xlu1 %553  ;;  %p2866_p3 = pnand %p2865_p2, %p2859_p13 }
 0x24b   : > { %v581_v30 = vpop.permute.xlu0 %580  ;;  %v560_v41 = vsel %vm559_vm3, %v554_v49, %v556_v48  ;;  %vm1461_vm3 = vcmask 1014784  }
 0x24c   : > { %v565_v62 = vadd.f32 %v560_v41, %v540_v1 }
 0x24e   : > { %v583_v0 = vpop.permute.xlu1 %582 }
 0x24f   : > { %v579_v13 = vpop.permute.xlu0 %578  ;;  %v592_v9 = vadd.f32 %v583_v0, %v567_v7  ;;  %v586_v29 = vsel %vm584_vm4, %v581_v30, %v583_v0 }
 0x250   : > { %v585_v50 = vsel %vm584_vm4, %v579_v13, %v581_v30  ;;  %v591_v22 = vadd.f32 %v586_v29, %v566_v31  ;;  %vm1656_vm4 = vcmask 1006592   ;;  %v1969_v31 = vld [vmem:[%s4527_s8 + $0x20] sm:$0xff] }
 0x251   : > { %v590_v26 = vadd.f32 %v585_v50, %v565_v62  ;;  %v1878_v50 = vld [vmem:[%s4525_s6] sm:$0xff] }
 0x252   : > { %v607_v37 = vpop.permute.xlu1 %606 }
 0x253   : > { %v609_v4 = vpop.permute.xlu0 %608  ;;  %v618_v32 = vadd.f32 %v607_v37, %v590_v26 }
 0x254   : > { %v613_v54 = vsel %vm612_vm5, %v607_v37, %v609_v4 }
 0x255   : > { %v619_v56 = vadd.f32 %v613_v54, %v591_v22  ;;  %v1965_v54 = vld [vmem:[%s4527_s8] sm:$0xff] }
 0x256   : > { %v611_v47 = vpop.permute.xlu1 %610 }
 0x257   : > { %v632_v38 = vpop.permute.xlu0 %631  ;;  %v614_v46 = vsel %vm612_vm5, %v609_v4, %v611_v47  ;;  %vm1851_vm5 = vcmask 998400  }
 0x258   : > { %v620_v28 = vadd.f32 %v614_v46, %v592_v9  ;;  %v643_v48 = vadd.f32 %v632_v38, %v618_v32  ;;  %v1960_v32 = vld [vmem:[%s4526_s7] sm:$0xff] }
 0x25a   : > { %v634_v23 = vpop.permute.xlu1 %633 }
 0x25b   : > { %v636_v34 = vpop.permute.xlu0 %635  ;;  %v638_v5 = vsel %vm637_vm6, %v632_v38, %v634_v23 }
 0x25c   : > { %v639_v12 = vsel %vm637_vm6, %v634_v23, %v636_v34  ;;  %v644_v60 = vadd.f32 %v638_v5, %v619_v56  ;;  %v1875_v5 = vld [vmem:[%s4524_s5] sm:$0xff] }
 0x25d   : > { %v645_v57 = vadd.f32 %v639_v12, %v620_v28  ;;  %v1967_v28 = vld [vmem:[%s4527_s8 + $0x10] sm:$0xff] }
 0x25e   : > { %v657_v24 = vpop.permute.xlu1 %656 }
 0x25f   : > { %v659_v40 = vpop.permute.xlu0 %658  ;;  %v668_v13 = vadd.f32 %v657_v24, %v643_v48 }
 0x260   : > { %v663_v10 = vsel %vm662_vm7, %v657_v24, %v659_v40 }
 0x261   : > { %v669_v25 = vadd.f32 %v663_v10, %v644_v60 }
 0x262   : > { %v661_v14 = vpop.permute.xlu1 %660 }
 0x263   : > { %v4173_v8 = vpop.permute.xlu0 %681  ;;  %v664_v59 = vsel %vm662_vm7, %v659_v40, %v661_v14 }
 0x264   : > { %v670_v43 = vadd.f32 %v664_v59, %v645_v57  ;;  %v690_v34 = vmul.f32 %v4173_v8, %v668_v13  ;;  %v1968_v59 = vld [vmem:[%s4527_s8 + $0x18] sm:$0xff] }
 0x266   : > { %v684_v27 = vpop.permute.xlu1 %683 }
 0x267   : > { %v879_v18 = vpop.permute.xlu0 %878  ;;  %v686_v20 = vsel %vm685_vm13, %v4173_v8, %v684_v27  ;;  %v692_v16 = vmul.f32 %v684_v27, %v670_v43 }
 0x268   : > { %v691_v63 = vmul.f32 %v686_v20, %v669_v25  ;;  %v1963_v25 = vld [vmem:[%s4526_s7 + $0x18] sm:$0xff] }
 0x26a   : > { %v881_v3 = vpop.permute.xlu1 %880 }
 0x26b   : > { %v877_v58 = vpop.permute.xlu0 %876  ;;  %v884_v53 = vsel %vm882_vm14, %v879_v18, %v881_v3  ;;  %v890_v49 = vadd.f32 %v881_v3, %v692_v16  ;;  %v4242_v16 = vld [vmem:[#allocation2] sm:$0xff] }
 0x26c   : > { %v889_v4 = vadd.f32 %v884_v53, %v691_v63  ;;  %v883_v23 = vsel %vm882_vm14, %v877_v58, %v879_v18  ;;  %v1961_v53 = vld [vmem:[%s4526_s7 + $0x8] sm:$0xff] }
 0x26d   : > { %v888_v24 = vadd.f32 %v883_v23, %v690_v34 }
 0x26e   : > { %v1074_v33 = vpop.permute.xlu1 %1073 }
 0x26f   : > { %v1076_v52 = vpop.permute.xlu0 %1075 }
 0x270   : > { %v1079_v30 = vsel %vm1077_vm15, %v1074_v33, %v1076_v52  ;;  %v1085_v47 = vadd.f32 %v1076_v52, %v890_v49 }
 0x271   : > { %v1084_v40 = vadd.f32 %v1079_v30, %v889_v4 }
 0x272   : > { %v1072_v61 = vpop.permute.xlu1 %1071 }
 0x273   : > { %v1078_v38 = vsel %vm1077_vm15, %v1072_v61, %v1074_v33 }
 0x274   : > { %v1083_v11 = vadd.f32 %v1078_v38, %v888_v24 }
 0x27f   : > { %v1265_v45 = vpop.permute.xlu1 %1264 }
 0x280   : > { %v4177_v42 = vpop.permute.xlu0 %1262  ;;  %v1274_v14 = vadd.f32 %v1265_v45, %v1085_v47 }
 0x281   : > { %v1268_v37 = vsel %vm1266_vm2, %v4177_v42, %v1265_v45  ;;  %v1966_v45 = vld [vmem:[%s4527_s8 + $0x8] sm:$0xff] }
 0x282   : > { %v1273_v15 = vadd.f32 %v1268_v37, %v1084_v40 }
 0x284   : > { %v1261_v2 = vpop.permute.xlu0 %1260 }
 0x285   : > { %v1267_v18 = vsel %vm1266_vm2, %v1261_v2, %v4177_v42 }
 0x286   : > { %v1272_v33 = vadd.f32 %v1267_v18, %v1083_v11 }
 0x28f   : > { %v1460_v6 = vpop.permute.xlu0 %1459 }
 0x290   : > { %v1469_v52 = vadd.f32 %v1460_v6, %v1274_v14 }
 0x294   : > { %v1458_v19 = vpop.permute.xlu1 %1457 }
 0x295   : > { %v1463_v27 = vsel %vm1461_vm3, %v1458_v19, %v1460_v6 }
 0x296   : > { %v1468_v21 = vadd.f32 %v1463_v27, %v1273_v15 }
 0x298   : > { %v1456_v0 = vpop.permute.xlu1 %1455 }
 0x299   : > { %v1462_v7 = vsel %vm1461_vm3, %v1456_v0, %v1458_v19 }
 0x29a   : > { %v1467_v9 = vadd.f32 %v1462_v7, %v1272_v33 }
 0x29f   : > { %v1655_v3 = vpop.permute.xlu1 %1654 }
 0x2a0   : > { %v1664_v8 = vadd.f32 %v1655_v3, %v1469_v52 }
 0x2a4   : > { %v1653_v55 = vpop.permute.xlu0 %1652 }
 0x2a5   : > { %v1658_v58 = vsel %vm1656_vm4, %v1653_v55, %v1655_v3 }
 0x2a6   : > { %v1663_v35 = vadd.f32 %v1658_v58, %v1468_v21 }
 0x2a8   : > { %v1651_v51 = vpop.permute.xlu0 %1650 }
 0x2a9   : > { %v1657_v39 = vsel %vm1656_vm4, %v1651_v51, %v1653_v55  ;;  %v1964_v55 = vld [vmem:[%s4526_s7 + $0x20] sm:$0xff] }
 0x2aa   : > { %v1662_v42 = vadd.f32 %v1657_v39, %v1467_v9 }
 0x2af   : > { %v1850_v17 = vpop.permute.xlu0 %1849 }
 0x2b0   : > { %v1859_v46 = vadd.f32 %v1850_v17, %v1664_v8  ;;  %v1848_v61 = vpop.permute.xlu1 %1847 }
 0x2b1   : > { %v1853_v36 = vsel %vm1851_vm5, %v1848_v61, %v1850_v17 }
 0x2b2   : > { %v1858_v41 = vadd.f32 %v1853_v36, %v1663_v35  ;;  %1867 = vrot.lane.b32.xlu1 %v1859_v46, %s2986_s17 }
 0x2b4   : > { %1865 = vrot.lane.b32.xlu0 %v1858_v41, %s2986_s17  ;;  %v1846_v29 = vpop.permute.xlu1 %1845  ;;  %v4300_v41 = vld [vmem:[%s4528_s9] sm:$0xff] }
 0x2b5   : > { %v1852_v12 = vsel %vm1851_vm5, %v1846_v29, %v1848_v61  ;;  %v4310_v29 = vld [vmem:[%s4528_s9 + $0x8] sm:$0xff] }
 0x2b6   : > { %v1857_v1 = vadd.f32 %v1852_v12, %v1662_v42  ;;  %1881 = vperm.xlu1 %2840, %v1878_v50   ;;  %v4319_v12 = vld [vmem:[%s4528_s9 + $0x10] sm:$0xff] }
 0x2b8   : > { %1863 = vrot.lane.b32.xlu0 %v1857_v1, %s2986_s17  ;;  %v4328_v1 = vld [vmem:[%s4528_s9 + $0x18] sm:$0xff] }
 0x2ba   : > { %1987 = vperm.xlu1 %2840, %v1968_v59  }
 0x2bc   : > { %1992 = vperm.xlu0 %2839, %v1969_v31   ;;  %v4337_v31 = vld [vmem:[%s4528_s9 + $0x20] sm:$0xff] }
 0x2be   : > { %1977 = vperm.xlu1 %2840, %v1966_v45  }
 0x2c0   : > { %1982 = vperm.xlu0 %2839, %v1967_v28  }
 0x2c4   : > { %1972 = vperm.xlu0 %2839, %v1965_v54  }
 0x324   : > { %v1868_v2 = vpop.permute.xlu1 %1867 }
 0x326   : > { %v1866_v62 = vpop.permute.xlu0 %1865 }
 0x327   : > { %v1870_v22 = vsel %vm499_vm1, %v1866_v62, %v1868_v2 }
 0x328   : > { %1917 = vmatprep.subr.mxu1 %v1870_v22 }
 0x32a   : > { %v1864_v57 = vpop.permute.xlu0 %1863 }
 0x32b   : > { %v1869_v26 = vsel %vm499_vm1, %v1864_v57, %v1866_v62  ;;  %vm2125_vm1 = vcmask 326656  }
 0x32c   : > { %1918 = vmatpush1.msra.mxu1 %v1869_v26 }
 0x32d   : > { %2586 = vmatmul.mubr.msk.f32.vlgmr.msra.gmra.mxu1 %vm421_vm0, %v1875_v5 }
 0x32e   : > { %2092 = vmatprep.mubr.f32.mxu1 %v3742_v44 }
 0x331   : > { %v1882_v43 = vpop.permute.xlu1 %1881 }
 0x335   : > { %v1988_v30 = vpop.permute.xlu1 %1987 }
 0x337   : > { %v1993_v48 = vpop.permute.xlu0 %1992 }
 0x339   : > { %v1978_v51 = vpop.permute.xlu1 %1977 }
 0x33b   : > { %v1983_v34 = vpop.permute.xlu0 %1982 }
 0x33f   : > { %v1973_v8 = vpop.permute.xlu0 %1972 }
 0x3ed   : > { %v1953_v56 = vpop.f32.mrf.mxu1 }
 0x3ee   : > { %v1954_v10 = vadd.f32 %v1953_v56, %v1882_v43 }
 0x3ef   : > { %v1955_v6 = vpop.f32.mrf.mxu1 }
 0x3f0   : > { %v1956_v19 = vadd.f32 %v1955_v6, %v1882_v43  ;;  %v1958_v20 = vmax.f32 %v1954_v10, 0.0 }
 0x3f2   : > { %v1959_v60 = vmax.f32 %v1956_v19, 0.0 }
 0x3f4   : > { %2040 = vmatprep.subr.mxu0 %v1959_v60  ;;  %2676 = vmatprep.subr.mxu1 %v1959_v60 }
 0x3f5   : > { %2041 = vmatpush1.msra.mxu0 %v1958_v20  ;;  %2677 = vmatpush1.msra.mxu1 %v1958_v20 }
 0x3f6   : > { %2587 = vmatmul.mubr.msk.f32.vlgmr.msra.gmra.mxu0 %vm421_vm0, %v1960_v32  ;;  %2590 = vmatmul.mubr.msk.f32.vlgmr.msra.gmra.mxu1 %vm421_vm0, %v1963_v25 }
 0x3f7   : > { %2080 = vmatprep.mubr.f32.mxu0 %v3742_v44  ;;  %2098 = vmatprep.mubr.f32.mxu1 %v4242_v16  ;;  %v1962_v44 = vld [vmem:[%s4526_s7 + $0x10] sm:$0xff] }
 0x3f8   : > { %2626 = vmatprep.subr.mxu1 %v4242_v16  ;;  %2651 = vmatprep.subr.mxu0 %v4242_v16 }
 0x3fa   : > { %2588 = vmatmul.mubr.msk.f32.gmra.mxu0 %vm421_vm0, %v1961_v53  ;;  %2591 = vmatmul.mubr.msk.f32.gmra.mxu1 %vm421_vm0, %v1964_v55 }
 0x3fb   : > { %2086 = vmatprep.mubr.f32.mxu0 %v4242_v16 }
 0x3fe   : > { %2589 = vmatmul.mubr.msk.f32.gmra.mxu0 %vm421_vm0, %v1962_v44  ;;  %vm2987_vm0 = vmmov 0  }
 0x3ff   : > { %2636 = vmatprep.mubr.msk.f32.mxu1 %vm2987_vm0, %v4242_v16  ;;  %2661 = vmatprep.mubr.msk.f32.mxu0 %vm2987_vm0, %v4242_v16 }
 0x4b6   : > { %v2076_v63 = vpop.f32.mrf.mxu0  ;;  %v2094_v49 = vpop.f32.mrf.mxu1 }
 0x4b7   : > { %v4260_v4 = vadd.f32 %v2094_v49, %v1988_v30  ;;  %v4286_v35 = vadd.f32 %v2076_v63, %v1973_v8 }
 0x4b8   : > { %v2078_v0 = vpop.f32.mrf.mxu0  ;;  %v2096_v13 = vpop.f32.mrf.mxu1 }
 0x4b9   : > { %v4262_v47 = vadd.f32 %v2096_v13, %v1988_v30  ;;  %v4280_v7 = vadd.f32 %v2078_v0, %v1973_v8  ;;  %v2448_v8 = vld [vmem:[%s4530_s11 + $0x8] sm:$0xff] }
 0x4ba   : > { %v2082_v23 = vpop.f32.mrf.mxu0  ;;  %v2100_v37 = vpop.f32.mrf.mxu1 }
 0x4bb   : > { %v2119_v40 = vadd.f32 %v4262_v47, %v4260_v4  ;;  %v4266_v27 = vadd.f32 %v2100_v37, %v1993_v48  ;;  %v4274_v58 = vadd.f32 %v2082_v23, %v1978_v51  ;;  %v2110_v46 = vadd.f32 %v4280_v7, %v4286_v35 }
 0x4bc   : > { %v2084_v14 = vpop.f32.mrf.mxu0  ;;  %v2102_v38 = vpop.f32.mrf.mxu1 }
 0x4bd   : > { %v4268_v3 = vadd.f32 %v2102_v38, %v1993_v48  ;;  %2120 = vadd.xlane.f32.xlu0 %v2119_v40  ;;  %v4270_v15 = vadd.f32 %v2084_v14, %v1978_v51 }
 0x4be   : > { %v2088_v24 = vpop.f32.mrf.mxu0 }
 0x4bf   : > { %v2122_v52 = vadd.f32 %v4268_v3, %v4266_v27  ;;  %v4276_v11 = vadd.f32 %v2088_v24, %v1983_v34  ;;  %v2113_v17 = vadd.f32 %v4270_v15, %v4274_v58 }
 0x4c0   : > { %v2090_v18 = vpop.f32.mrf.mxu0 }
 0x4c1   : > { %v4278_v21 = vadd.f32 %v2090_v18, %v1983_v34  ;;  %2123 = vadd.xlane.f32.xlu1 %v2122_v52 }
 0x4c3   : > { %v2116_v33 = vadd.f32 %v4278_v21, %v4276_v11 }
 0x4c5   : > { %2117 = vadd.xlane.f32.xlu0 %v2116_v33  ;;  %2114 = vadd.xlane.f32.xlu1 %v2113_v17 }
 0x4c9   : > { %2111 = vadd.xlane.f32.xlu0 %v2110_v46 }
 0x546   : > { %v2121_v61 = vpop.xlane.xlu0 %2120 }
 0x54a   : > { %v2124_v39 = vpop.xlane.xlu1 %2123 }
 0x54b   : > { %2627 = vmatpush3.msra.mxu1 %v2124_v39 }
 0x54c   : > { %2628 = vmatprep.subr.mxu1 %v4242_v16 }
 0x54d   : > { %2629 = vmatpush3.msra.mxu1 %v2121_v61 }
 0x54e   : > { %v2118_v36 = vpop.xlane.xlu0 %2117  ;;  %2630 = vmatprep.subr.mxu1 %v4242_v16  ;;  %v2115_v9 = vpop.xlane.xlu1 %2114 }
 0x54f   : > { %2631 = vmatpush3.msra.mxu1 %v2118_v36 }
 0x550   : > { %2632 = vmatprep.subr.mxu1 %v4242_v16 }
 0x551   : > { %2633 = vmatpush3.msra.mxu1 %v2115_v9 }
 0x552   : > { %v2112_v42 = vpop.xlane.xlu0 %2111  ;;  %2634 = vmatprep.subr.mxu1 %v4242_v16 }
 0x553   : > { %2635 = vmatpush3.msra.mxu1 %v2112_v42 }
 0x554   : > { %2637 = vmatmul.mubr.msk.f32.vlgmr.msra.gmra.mxu1 %vm2125_vm1, %v4300_v41 }
 0x555   : > { %2639 = vmatprep.mubr.msk.f32.mxu1 %vm2987_vm0, %v4242_v16 }
 0x558   : > { %2640 = vmatmul.mubr.msk.f32.gmra.mxu1 %vm2125_vm1, %v4310_v29 }
 0x559   : > { %2642 = vmatprep.mubr.msk.f32.mxu1 %vm2987_vm0, %v4242_v16 }
 0x55c   : > { %2643 = vmatmul.mubr.msk.f32.gmra.mxu1 %vm2125_vm1, %v4319_v12 }
 0x55d   : > { %2645 = vmatprep.mubr.msk.f32.mxu1 %vm2987_vm0, %v4242_v16 }
 0x560   : > { %2646 = vmatmul.mubr.msk.f32.gmra.mxu1 %vm2125_vm1, %v4328_v1 }
 0x561   : > { %2648 = vmatprep.mubr.msk.f32.mxu1 %vm2987_vm0, %v4242_v16 }
 0x564   : > { %2649 = vmatmul.mubr.msk.f32.gmra.mxu1 %vm2125_vm1, %v4337_v31 }
 0x614   : > { %v2207_v28 = vpop.f32.mrf.mxu1 }
 0x615   : > { %v2232_v26 = vmul.f32 0.00043402778, %v2207_v28 }
 0x616   : > { %v2638_v50 = vpop.f32.mrf.mxu1 }
 0x618   : > { %v2212_v54 = vpop.f32.mrf.mxu1 }
 0x619   : > { %v2233_v6 = vmul.f32 0.00043402778, %v2212_v54 }
 0x61a   : > { %v2641_v59 = vpop.f32.mrf.mxu1 }
 0x61c   : > { %v2217_v45 = vpop.f32.mrf.mxu1 }
 0x61d   : > { %v2234_v10 = vmul.f32 0.00043402778, %v2217_v45 }
 0x61e   : > { %v2644_v2 = vpop.f32.mrf.mxu1 }
 0x620   : > { %v2222_v62 = vpop.f32.mrf.mxu1 }
 0x621   : > { %v2235_v22 = vmul.f32 0.00043402778, %v2222_v62  ;;  %v2402_v62 = vld [vmem:[%s4529_s10] sm:$0xff] }
 0x622   : > { %v2647_v57 = vpop.f32.mrf.mxu1 }
 0x623   : > { %2254 = vperm.xlu0 %2839, %v2235_v22  }
 0x624   : > { %v2227_v5 = vpop.f32.mrf.mxu1 }
 0x625   : > { %v2236_v56 = vmul.f32 0.00043402778, %v2227_v5 }
 0x626   : > { %v2650_v43 = vpop.f32.mrf.mxu1 }
 0x627   : > { %2239 = vperm.xlu0 %2839, %v2232_v26   ;;  %2259 = vperm.xlu1 %2840, %v2236_v56   ;;  %v2403_v43 = vld [vmem:[%s4529_s10 + $0x8] sm:$0xff] }
 0x62b   : > { %2249 = vperm.xlu1 %2840, %v2234_v10  }
 0x62f   : > { %2244 = vperm.xlu1 %2840, %v2233_v6  }
 0x69e   : > { %v2255_v19 = vpop.permute.xlu0 %2254 }
 0x69f   : > { %v4342_v60 = vsub.f32 %v4260_v4, %v2255_v19  ;;  %v4345_v20 = vsub.f32 %v4262_v47, %v2255_v19  ;;  %v2404_v19 = vld [vmem:[%s4529_s10 + $0x10] sm:$0xff] }
 0x6a1   : > { %v2278_v32 = vmul.f32 %v4342_v60, %v4342_v60  ;;  %v2279_v25 = vmul.f32 %v4345_v20, %v4345_v20 }
 0x6a2   : > { %v2260_v53 = vpop.permute.xlu1 %2259  ;;  %v2240_v55 = vpop.permute.xlu0 %2239 }
 0x6a3   : > { %v4352_v44 = vsub.f32 %v4266_v27, %v2260_v53  ;;  %v4355_v48 = vsub.f32 %v4268_v3, %v2260_v53  ;;  %v2291_v63 = vadd.f32 %v2279_v25, %v2278_v32  ;;  %v4362_v0 = vsub.f32 %v4286_v35, %v2240_v55  ;;  %v2405_v53 = vld [vmem:[%s4529_s10 + $0x18] sm:$0xff] }
 0x6a4   : > { %v4365_v4 = vsub.f32 %v4280_v7, %v2240_v55 }
 0x6a5   : > { %v2280_v49 = vmul.f32 %v4352_v44, %v4352_v44  ;;  %v2281_v30 = vmul.f32 %v4355_v48, %v4355_v48  ;;  %2292 = vadd.xlane.f32.xlu0 %v2291_v63  ;;  %v2272_v14 = vmul.f32 %v4362_v0, %v4362_v0 }
 0x6a6   : > { %v2250_v13 = vpop.permute.xlu1 %2249  ;;  %v2273_v27 = vmul.f32 %v4365_v4, %v4365_v4 }
 0x6a7   : > { %v4368_v47 = vsub.f32 %v4276_v11, %v2250_v13  ;;  %v4371_v23 = vsub.f32 %v4278_v21, %v2250_v13  ;;  %v2294_v37 = vadd.f32 %v2281_v30, %v2280_v49  ;;  %v2406_v49 = vld [vmem:[%s4529_s10 + $0x20] sm:$0xff] }
 0x6a8   : > { %v2282_v11 = vadd.f32 %v2273_v27, %v2272_v14  ;;  %v2451_v13 = vld [vmem:[%s4530_s11 + $0x20] sm:$0xff] }
 0x6a9   : > { %v2276_v34 = vmul.f32 %v4368_v47, %v4368_v47  ;;  %v2277_v40 = vmul.f32 %v4371_v23, %v4371_v23  ;;  %2295 = vadd.xlane.f32.xlu1 %v2294_v37 }
 0x6aa   : > { %v2245_v38 = vpop.permute.xlu1 %2244 }
 0x6ab   : > { %v4382_v3 = vsub.f32 %v4274_v58, %v2245_v38  ;;  %v4385_v51 = vsub.f32 %v4270_v15, %v2245_v38  ;;  %v2288_v24 = vadd.f32 %v2277_v40, %v2276_v34  ;;  %v2447_v58 = vld [vmem:[%s4530_s11] sm:$0xff]  ;;  %v2449_v15 = vld [vmem:[%s4530_s11 + $0x10] sm:$0xff]  ;;  %v2450_v34 = vld [vmem:[%s4530_s11 + $0x18] sm:$0xff] }
 0x6ad   : > { %v2274_v52 = vmul.f32 %v4382_v3, %v4382_v3  ;;  %v2275_v18 = vmul.f32 %v4385_v51, %v4385_v51  ;;  %2289 = vadd.xlane.f32.xlu0 %v2288_v24 }
 0x6af   : > { %v2285_v21 = vadd.f32 %v2275_v18, %v2274_v52 }
 0x6b1   : > { %2283 = vadd.xlane.f32.xlu0 %v2282_v11  ;;  %2286 = vadd.xlane.f32.xlu1 %v2285_v21 }
 0x6c2   : > { %2454 = vperm.xlu1 %2840, %v2447_v58  }
 0x6c6   : > { %2464 = vperm.xlu1 %2840, %v2449_v15  }
 0x6c7   : > { %2459 = vperm.xlu0 %2839, %v2448_v8  }
 0x72e   : > { %v2293_v7 = vpop.xlane.xlu0 %2292 }
 0x732   : > { %v2296_v17 = vpop.xlane.xlu1 %2295 }
 0x733   : > { %2652 = vmatpush3.msra.mxu0 %v2296_v17 }
 0x734   : > { %2653 = vmatprep.subr.mxu0 %v4242_v16 }
 0x735   : > { %2654 = vmatpush3.msra.mxu0 %v2293_v7 }
 0x736   : > { %v2290_v33 = vpop.xlane.xlu0 %2289  ;;  %2655 = vmatprep.subr.mxu0 %v4242_v16 }
 0x737   : > { %2656 = vmatpush3.msra.mxu0 %v2290_v33 }
 0x738   : > { %2657 = vmatprep.subr.mxu0 %v4242_v16 }
 0x73a   : > { %v2287_v35 = vpop.xlane.xlu1 %2286  ;;  %v2284_v46 = vpop.xlane.xlu0 %2283 }
 0x73b   : > { %2658 = vmatpush3.msra.mxu0 %v2287_v35 }
 0x73c   : > { %2659 = vmatprep.subr.mxu0 %v4242_v16 }
 0x73d   : > { %2660 = vmatpush3.msra.mxu0 %v2284_v46 }
 0x73e   : > { %2662 = vmatmul.mubr.msk.f32.vlgmr.msra.gmra.mxu0 %vm2125_vm1, %v4300_v41  ;;  %v2455_v40 = vpop.permute.xlu1 %2454 }
 0x73f   : > { %2664 = vmatprep.mubr.msk.f32.mxu0 %vm2987_vm0, %v4242_v16 }
 0x742   : > { %2665 = vmatmul.mubr.msk.f32.gmra.mxu0 %vm2125_vm1, %v4310_v29  ;;  %v2465_v14 = vpop.permute.xlu1 %2464  ;;  %v2460_v38 = vpop.permute.xlu0 %2459 }
 0x743   : > { %2667 = vmatprep.mubr.msk.f32.mxu0 %vm2987_vm0, %v4242_v16 }
 0x746   : > { %2668 = vmatmul.mubr.msk.f32.gmra.mxu0 %vm2125_vm1, %v4319_v12 }
 0x747   : > { %2670 = vmatprep.mubr.msk.f32.mxu0 %vm2987_vm0, %v4242_v16 }
 0x74a   : > { %2671 = vmatmul.mubr.msk.f32.gmra.mxu0 %vm2125_vm1, %v4328_v1 }
 0x74b   : > { %2673 = vmatprep.mubr.msk.f32.mxu0 %vm2987_vm0, %v4242_v16 }
 0x74e   : > { %2674 = vmatmul.mubr.msk.f32.gmra.mxu0 %vm2125_vm1, %v4337_v31 }
 0x7fe   : > { %v2363_v61 = vpop.f32.mrf.mxu0 }
 0x7ff   : > { %v2387_v39 = vmul.f32 0.00043402778, %v2363_v61 }
 0x800   : > { %v2663_v36 = vpop.f32.mrf.mxu0 }
 0x801   : > { %v2392_v9 = vadd.f32 1e-05, %v2387_v39 }
 0x802   : > { %v2368_v41 = vpop.f32.mrf.mxu0 }
 0x803   : > { %2841 = vrsqrt.f32 %v2392_v9  ;;  %v2388_v42 = vmul.f32 0.00043402778, %v2368_v41 }
 0x804   : > { %v2666_v29 = vpop.f32.mrf.mxu0 }
 0x805   : > { %v2393_v12 = vadd.f32 1e-05, %v2388_v42 }
 0x806   : > { %v2373_v28 = vpop.f32.mrf.mxu0 }
 0x807   : > { %2843 = vrsqrt.f32 %v2393_v12  ;;  %v2389_v50 = vmul.f32 0.00043402778, %v2373_v28 }
 0x808   : > { %v2669_v54 = vpop.f32.mrf.mxu0 }
 0x809   : > { %v2394_v1 = vadd.f32 1e-05, %v2389_v50 }
 0x80a   : > { %v2378_v59 = vpop.f32.mrf.mxu0 }
 0x80b   : > { %2845 = vrsqrt.f32 %v2394_v1  ;;  %v2390_v16 = vmul.f32 0.00043402778, %v2378_v59 }
 0x80c   : > { %v2672_v45 = vpop.f32.mrf.mxu0 }
 0x80d   : > { %v2395_v2 = vadd.f32 1e-05, %v2390_v16 }
 0x80e   : > { %v2383_v31 = vpop.f32.mrf.mxu0 }
 0x80f   : > { %2847 = vrsqrt.f32 %v2395_v2  ;;  %v2391_v22 = vmul.f32 0.00043402778, %v2383_v31 }
 0x810   : > { %v2842_v57 = vpop.eup %2841  ;;  %v2675_v5 = vpop.f32.mrf.mxu0 }
 0x811   : > { %v2396_v26 = vadd.f32 1e-05, %v2391_v22  ;;  %v2407_v56 = vmul.f32 %v2842_v57, %v2402_v62 }
 0x813   : > { %2849 = vrsqrt.f32 %v2396_v26  ;;  %2414 = vperm.xlu1 %2840, %v2407_v56  }
 0x814   : > { %v2844_v10 = vpop.eup %2843 }
 0x815   : > { %v2408_v6 = vmul.f32 %v2844_v10, %v2403_v43 }
 0x817   : > { %2419 = vperm.xlu0 %2839, %v2408_v6  }
 0x818   : > { %v2846_v32 = vpop.eup %2845 }
 0x819   : > { %v2409_v25 = vmul.f32 %v2846_v32, %v2404_v19 }
 0x81b   : > { %2424 = vperm.xlu1 %2840, %v2409_v25  }
 0x81c   : > { %v2848_v55 = vpop.eup %2847 }
 0x81d   : > { %v2410_v63 = vmul.f32 %v2848_v55, %v2405_v53 }
 0x81f   : > { %2429 = vperm.xlu1 %2840, %v2410_v63  }
 0x820   : > { %v2850_v30 = vpop.eup %2849 }
 0x821   : > { %v2411_v37 = vmul.f32 %v2850_v30, %v2406_v49 }
 0x823   : > { %2474 = vperm.xlu1 %2840, %v2451_v13   ;;  %2434 = vperm.xlu0 %2839, %v2411_v37  }
 0x827   : > { %2469 = vperm.xlu0 %2839, %v2450_v34  }
 0x88e   : > { %v2415_v27 = vpop.permute.xlu1 %2414 }
 0x88f   : > { %v2437_v24 = vmul.f32 %v2415_v27, %v4362_v0  ;;  %v2438_v52 = vmul.f32 %v2415_v27, %v4365_v4 }
 0x891   : > { %v2477_v18 = vadd.f32 %v2455_v40, %v2437_v24  ;;  %v2478_v11 = vadd.f32 %v2455_v40, %v2438_v52 }
 0x892   : > { %v2420_v21 = vpop.permute.xlu0 %2419 }
 0x893   : > { %2487 = vst [vmem:[%s4448_s16] sm:$0xff] %v2477_v18  ;;  %2488 = vst [vmem:[%s4448_s16 + $0x8] sm:$0xff] %v2478_v11  ;;  %v2439_v58 = vmul.f32 %v2420_v21, %v4382_v3  ;;  %v2440_v15 = vmul.f32 %v2420_v21, %v4385_v51 }
 0x895   : > { %v2479_v0 = vadd.f32 %v2460_v38, %v2439_v58  ;;  %v2480_v4 = vadd.f32 %v2460_v38, %v2440_v15 }
 0x896   : > { %v2425_v8 = vpop.permute.xlu1 %2424 }
 0x897   : > { %2489 = vst [vmem:[%s4448_s16 + $0x10] sm:$0xff] %v2479_v0  ;;  %2490 = vst [vmem:[%s4448_s16 + $0x18] sm:$0xff] %v2480_v4  ;;  %v2441_v7 = vmul.f32 %v2425_v8, %v4368_v47  ;;  %v2442_v17 = vmul.f32 %v2425_v8, %v4371_v23 }
 0x899   : > { %v2481_v33 = vadd.f32 %v2465_v14, %v2441_v7  ;;  %v2482_v35 = vadd.f32 %v2465_v14, %v2442_v17 }
 0x89a   : > { %v2430_v46 = vpop.permute.xlu1 %2429 }
 0x89b   : > { %2491 = vst [vmem:[%s4448_s16 + $0x20] sm:$0xff] %v2481_v33  ;;  %2492 = vst [vmem:[%s4448_s16 + $0x28] sm:$0xff] %v2482_v35  ;;  %v2443_v23 = vmul.f32 %v2430_v46, %v4342_v60  ;;  %v2444_v39 = vmul.f32 %v2430_v46, %v4345_v20 }
 0x89e   : > { %v2435_v3 = vpop.permute.xlu0 %2434  ;;  %v2475_v47 = vpop.permute.xlu1 %2474 }
 0x89f   : > { %v2445_v51 = vmul.f32 %v2435_v3, %v4352_v44  ;;  %v2446_v61 = vmul.f32 %v2435_v3, %v4355_v48 }
 0x8a1   : > { %v2485_v36 = vadd.f32 %v2475_v47, %v2445_v51  ;;  %v2486_v9 = vadd.f32 %v2475_v47, %v2446_v61 }
 0x8a2   : > { %v2470_v41 = vpop.permute.xlu0 %2469 }
 0x8a3   : > { %2495 = vst [vmem:[%s4448_s16 + $0x40] sm:$0xff] %v2485_v36  ;;  %2496 = vst [vmem:[%s4448_s16 + $0x48] sm:$0xff] %v2486_v9  ;;  %v2483_v44 = vadd.f32 %v2470_v41, %v2443_v23  ;;  %v2484_v48 = vadd.f32 %v2470_v41, %v2444_v39 }
 0x8a5   : > { %2493 = vst [vmem:[%s4448_s16 + $0x30] sm:$0xff] %v2483_v44  ;;  %2494 = vst [vmem:[%s4448_s16 + $0x38] sm:$0xff] %v2484_v48 }
 0x8a6   : > { %2869 = shalt.err (!%p2866_p3)
}
 0x8a7   : > { %s2870_s0 = scalar_lea.hbm %s4473_s18, 1280  ;;  %s2874_s25 = scalar_lea.hbm %s4531_s12, 2560 }
 0x8a8   : > { %p2871_p4 = scmp.ne.s32.totalorder %s4473_s18, %s2870_s0  ;;  %p2875_p9 = scmp.lt.s32.totalorder %s4473_s18, %s4531_s12 }
 0x8a9   : > { %p2876_p10 = scmp.lt.s32.totalorder %s2874_s25, %s2870_s0 }
 0x8aa   : > { %p2872_p7 = pnand %p2871_p4, %p3094_p5 }
 0x8ab   : > { %p2877_p11 = por %p2876_p10, %p2875_p9 }
 0x8ac   : > { %p2873_p8 = pneg %p2872_p7 }
 0x8ae   : > { %p2878_p12 = pnand %p2877_p11, %p2873_p8 }
 0x8b0   : > { %2881 = shalt.err (!%p2878_p12)
}
 0x8b1   : > { %s2989_s1 = smov 256   ;;  %s2990_s20 = smov 16  }
 0x8b2   : > { %2680 = dma.vmem_to_hbm [thread:$0]  (%p3094_p5), %s4466_s29, 1280, %s4473_s18, %s4479_s19, %s2989_s1, %s2989_s1, %s2990_s20  }
 0x8b3 PF: > { %p2686_p13 = scmp.ge.s32.totalorder %s2916_s24, 2  ;;  %s2526_s28 = sand.u32 1, %s2904_s21  }
 0x8b4   : > { %s2527_s0 = scalar_lea.sflag [#allocation5], %s2526_s28 }
 0x8b5   : > { %p2683_p0 = pnand %p2686_p13, %p3098_p6 }
 0x8b7   : > { %p2684_p1 = pneg %p2683_p0 }
 0x8b9   : > { %2899 = dma.done.wait (%p2684_p1), %s2527_s0, 1280  }
 0x8ba   : > { %2901 = vsyncadd (%p2684_p1), %s2527_s0, 4294966016  ;;  %p22_p2 = scmp.ge.s32.totalorder %s3081_s27, 4   ;;  %s4639_s21 = smov %s2908_s22 }
 0x8bb   : > { %s4640_s22 = smov %s2912_s23  ;;  %s4641_s23 = smov %s3092_s30 }
 0x8bc   : > { %s4642_s24 = smov %s3081_s27  ;;  %24 = sbr.rel (!%p22_p2) target bundleno = 6 (0x6), region = 109 }
 0x8c1   :  { %2532 = vsyncpa [#allocation5], 1 }
 0x8c2   :  { %2534 = vsyncpa [#allocation5 + $0x1], 1 }

</bundles_post_ra>
